<compile_context>
chip_gen: v5e
topology: v5e:2x2
jax: 0.10.0
libtpu: 0.0.40
codegen_flags: <defaults>
</compile_context>

<pallas_src>
import functools

import jax
import jax.numpy as jnp
from jax import lax
from jax.experimental import pallas as pl
from jax.experimental.pallas import tpu as pltpu


def _dw_conv(x, h_idx, w_idx, w_ref, b_ref, *, K, pad, dil, H, W,
             full_width_masks):
    """Depthwise KxK conv (stride 1, zero-pad `pad`, dilation `dil`), packed rows.

    x      : (R, HW) f32, R = block_n * C (batch folded into sublanes),
             spatial H*W flattened onto the lane axis.
    w_ref  : (K*K, R, 1) f32 ref  -- per-row (channel, batch-tiled) taps.
    b_ref  : (R, 1) f32 ref.
    h_idx, w_idx : (1, HW) int32 row / col index of each flattened position.
    """
    R, HW = x.shape
    offs = [k * dil - pad for k in range(K)]

    # Column-validity masks are reused by every kernel row, so hoist them out
    # of the tap loop.  Broadcast to full sublane width only when the block is
    # a handful of vregs (avoids re-emitting (1,HW)->(R,HW) broadcasts per tap
    # without blowing vreg pressure on wide blocks).
    wmask = {}
    for d in offs:
        if d == 0:
            continue
        m = (w_idx >= -d) & (w_idx < W - d)              # (1, HW)
        wmask[d] = jnp.broadcast_to(m, (R, HW)) if full_width_masks else m

    acc = None
    for ky in range(K):
        dy = offs[ky]
        row = None
        for kx in range(K):
            dx = offs[kx]
            w_tap = w_ref[ky * K + kx]                   # (R, 1)
            if dy == 0 and dx == 0:
                term = x * w_tap
            else:
                # out[i] needs x[i + s]; wherever the masks keep the value,
                # i + s stays inside [0, HW), so the cyclic roll (XLU) is exact.
                s = dy * W + dx
                shifted = pltpu.roll(x, shift=(-s) % HW, axis=1)
                term = shifted * w_tap
                if dx != 0:
                    term = jnp.where(wmask[dx], term, 0.0)
            row = term if row is None else row + term
        if dy != 0:
            # Row validity distributes over the kx sum: one select per kernel
            # row instead of one per tap.
            hmask = (h_idx >= -dy) & (h_idx < H - dy)    # (1, HW)
            row = jnp.where(hmask, row, 0.0)
        # Per-kernel-row accumulation bounds live temporaries in the 49-tap case.
        acc = row if acc is None else acc + row
    return acc + b_ref[...]


def _pw_conv(a, w1f_ref, w1b_ref, b_ref):
    """1x1 conv on packed rows via sublane rotations (exact f32, VPU/XLU only).

    out[b*C + co] = sum_ci w1[co, ci] * a[b*C + ci] + b1[co]

    For shift s, row r = b*C + co needs a[r + s] when co + s < C (forward
    rotation) and a[r + s - C] otherwise (backward rotation); the host-prepared
    coefficient columns are zero where the other rotation applies, so wrapped
    rows are multiplied by 0 and no select is needed.
    """
    R = a.shape[0]
    C = w1f_ref.shape[0]
    out = a * w1f_ref[0] + b_ref[...]
    for s in range(1, C):
        fwd = pltpu.roll(a, shift=(-s) % R, axis=0)      # a[(r + s) % R]
        bwd = pltpu.roll(a, shift=C - s, axis=0)         # a[(r + s - C) % R]
        out = out + fwd * w1f_ref[s] + bwd * w1b_ref[s]
    # TODO(synk): for production channel counts (C >= ~64) replace this with a
    # single MXU matmul against a block-diagonal (R, R) mixing matrix.
    return out


def _lka_kernel(x_ref, hidx_ref, widx_ref, w0_ref, b0_ref, ws_ref, bs_ref,
                w1f_ref, w1b_ref, b1_ref, o_ref, *, H, W, full_width_masks):
    # f32 compute.  TODO(synk): bf16 tap math on v6e/v7x (f32 accumulation) to
    # halve HBM traffic / VMEM footprint where precision allows.
    x = x_ref[...].astype(jnp.float32)                   # (R, HW)
    h_idx = hidx_ref[...]                                 # (1, HW) int32
    w_idx = widx_ref[...]                                 # (1, HW) int32

    attn = _dw_conv(x, h_idx, w_idx, w0_ref, b0_ref, K=5, pad=2, dil=1,
                    H=H, W=W, full_width_masks=full_width_masks)
    attn = _dw_conv(attn, h_idx, w_idx, ws_ref, bs_ref, K=7, pad=9, dil=3,
                    H=H, W=W, full_width_masks=full_width_masks)
    attn = _pw_conv(attn, w1f_ref, w1b_ref, b1_ref)

    o_ref[...] = (x * attn).astype(o_ref.dtype)           # gate: u * attn


def _vmem_capacity_bytes():
    try:
        return int(pltpu.get_tpu_info().vmem_capacity_bytes)
    except Exception:
        return 64 * 1024 * 1024       # v7x-safe fallback


def _choose_block_n(N, C, HW, io_itemsize, work_budget):
    # Working set per image: 2x double-buffered input block + 2x output block
    # (I/O dtype) + ~6 live f32 intermediates (x, two conv activations,
    # row/acc temporaries, rolled taps, masks).
    per_img = 4 * C * HW * io_itemsize + 6 * C * HW * 4
    cap = max(1, work_budget // max(per_img, 1))
    bn = 1
    for d in range(1, N + 1):
        if N % d == 0 and d <= cap:
            bn = d
    # Sublane packing: fold enough images per step that block_n*C fills the 8
    # sublanes of a vreg (single biggest structural win at small C).
    if bn * C < 8:
        for d in range(bn + 1, N + 1):
            if N % d == 0 and d * C >= 8:
                bn = d
                break
    # v7x has 2 TensorCores: prefer >= 2 "parallel" grid steps when it does not
    # drop sublane occupancy below a full vreg.
    if N // bn < 2:
        for d in range(bn - 1, 0, -1):
            if N % d == 0 and d * C >= 8:
                bn = d
                break
    return bn


def lka_forward(x_nchw, params, *, block_n=None):
    """x_nchw: (N, C, H, W). params are PyTorch-layout LKA(dim=C) weights."""
    w0, b0, ws, bs, w1, b1 = params
    N, C, H, W = x_nchw.shape
    HW = H * W
    f32 = jnp.float32

    vmem_cap = _vmem_capacity_bytes()
    # 96 MiB scoped VMEM on v5e/v6e (128 MiB physical), ~48 MiB on v7x (64 MiB).
    vmem_limit = int(min(96 * 1024 * 1024, (3 * vmem_cap) // 4))
    work_budget = vmem_limit // 2

    if block_n is None:
        block_n = _choose_block_n(N, C, HW, x_nchw.dtype.itemsize, work_budget)
    R = block_n * C            # packed rows per block (batch folded into sublanes)

    # Sublane-packed, lane-dense layout: (N*C, H*W); row r = b*C + c.  The
    # reshape of a contiguous NCHW tensor is free on both sides.
    x2 = x_nchw.reshape(N * C, HW)

    # Per-row (channel, batch-tiled) weights / biases -> depthwise taps become
    # pure element-wise FMAs on fully packed vregs.
    def tile_rows(v):                                    # (C,) -> (R, 1)
        return jnp.tile(v.astype(f32), (block_n,)).reshape(R, 1)

    def tile_taps(w, K):                                 # (C,1,K,K) -> (K*K, R, 1)
        wt = w[:, 0].reshape(C, K * K).astype(f32).T     # (K*K, C)
        return jnp.tile(wt, (1, block_n)).reshape(K * K, R, 1)

    w0_k = tile_taps(w0, 5)
    ws_k = tile_taps(ws, 7)
    b0_k = tile_rows(b0)
    bs_k = tile_rows(bs)
    b1_k = tile_rows(b1)

    # 1x1-conv coefficients split for the two sublane rotations (see _pw_conv):
    # w1f[s, r] = w1[co, co+s]   where co = r % C and co+s <  C, else 0
    # w1b[s, r] = w1[co, co+s-C] where                co+s >= C, else 0
    w1_sq = w1[:, :, 0, 0].astype(f32)                   # (Cout, Cin)
    co = jnp.arange(C)
    rows_f, rows_b = [], []
    for s in range(C):
        coef = w1_sq[co, (co + s) % C]                   # (C,)
        rows_f.append(jnp.where(co + s < C, coef, 0.0))
        rows_b.append(jnp.where(co + s >= C, coef, 0.0))
    w1f_k = jnp.tile(jnp.stack(rows_f), (1, block_n)).reshape(C, R, 1)
    w1b_k = jnp.tile(jnp.stack(rows_b), (1, block_n)).reshape(C, R, 1)

    # Flattened-spatial row/col indices for the in-kernel validity masks
    # (replaces zero padding; no in-kernel integer div/mod).
    hw = jnp.arange(HW, dtype=jnp.int32)
    h_idx = (hw // W).reshape(1, HW)
    w_idx = (hw % W).reshape(1, HW)

    # Broadcast masks to full sublane width only while the block is small.
    full_width_masks = (R * HW * 4) <= 64 * 1024

    # TODO(synk): for very large H*W*C add an H-tiled grid axis with an 11-row
    # halo (5x5 pad2 + dilated 7x7 pad9 receptive field); not needed here.
    grid = (N // block_n,)
    kernel = functools.partial(_lka_kernel, H=H, W=W,
                               full_width_masks=full_width_masks)

    out2 = pl.pallas_call(
        kernel,
        out_shape=jax.ShapeDtypeStruct((N * C, HW), x_nchw.dtype),
        grid_spec=pltpu.PrefetchScalarGridSpec(
            num_scalar_prefetch=0,
            grid=grid,
            in_specs=[
                pl.BlockSpec((R, HW), lambda n: (n, 0)),
                pl.BlockSpec((1, HW), lambda n: (0, 0)),
                pl.BlockSpec((1, HW), lambda n: (0, 0)),
                pl.BlockSpec((25, R, 1), lambda n: (0, 0, 0)),
                pl.BlockSpec((R, 1), lambda n: (0, 0)),
                pl.BlockSpec((49, R, 1), lambda n: (0, 0, 0)),
                pl.BlockSpec((R, 1), lambda n: (0, 0)),
                pl.BlockSpec((C, R, 1), lambda n: (0, 0, 0)),
                pl.BlockSpec((C, R, 1), lambda n: (0, 0, 0)),
                pl.BlockSpec((R, 1), lambda n: (0, 0)),
            ],
            out_specs=pl.BlockSpec((R, HW), lambda n: (n, 0)),
        ),
        compiler_params=pltpu.CompilerParams(
            dimension_semantics=("parallel",),
            vmem_limit_bytes=vmem_limit,
        ),
    )(x2, h_idx, w_idx, w0_k, b0_k, ws_k, bs_k, w1f_k, w1b_k, b1_k)

    return out2.reshape(N, C, H, W)


def lka_reference(x, params):
    """Pure-JAX reference (lax conv, highest precision), NCHW, PyTorch semantics."""
    w0, b0, ws, bs, w1, b1 = params
    dn = ("NCHW", "OIHW", "NCHW")
    hp = lax.Precision.HIGHEST
    C = x.shape[1]
    a = lax.conv_general_dilated(
        x, w0, (1, 1), [(2, 2), (2, 2)], dimension_numbers=dn,
        feature_group_count=C, precision=hp) + b0[None, :, None, None]
    a = lax.conv_general_dilated(
        a, ws, (1, 1), [(9, 9), (9, 9)], rhs_dilation=(3, 3),
        dimension_numbers=dn, feature_group_count=C,
        precision=hp) + bs[None, :, None, None]
    a = lax.conv_general_dilated(
        a, w1, (1, 1), [(0, 0), (0, 0)], dimension_numbers=dn,
        precision=hp) + b1[None, :, None, None]
    return x * a


if __name__ == "__main__":
    N, dim, H, W = 2, 4, 16, 16

    key = jax.random.PRNGKey(0)
    kx, k0, kb0, ks, kbs, k1, kb1 = jax.random.split(key, 7)

    x = jax.random.normal(kx, (N, dim, H, W), dtype=jnp.float32)
    # Deterministic synthetic parameters (PyTorch layouts):
    w0 = 0.1 * jax.random.normal(k0, (dim, 1, 5, 5), dtype=jnp.float32)
    b0 = 0.1 * jax.random.normal(kb0, (dim,), dtype=jnp.float32)
    ws = 0.1 * jax.random.normal(ks, (dim, 1, 7, 7), dtype=jnp.float32)
    bs = 0.1 * jax.random.normal(kbs, (dim,), dtype=jnp.float32)
    w1 = 0.1 * jax.random.normal(k1, (dim, dim, 1, 1), dtype=jnp.float32)
    b1 = 0.1 * jax.random.normal(kb1, (dim,), dtype=jnp.float32)
    params = (w0, b0, ws, bs, w1, b1)

    out = jax.block_until_ready(lka_forward(x, params))

    ref = lka_reference(x, params)
    assert out.shape == (N, dim, H, W)
    assert jnp.allclose(out, ref, atol=1e-4, rtol=1e-4), "mismatch vs reference"

    print("KERNEL_OK")
</pallas_src>

<mosaic_0001>
module attributes {stable_mosaic.version = 11 : i64} {
  func.func @_lka_kernel(%arg0: i32, %arg1: memref<8x256xf32, #tpu.memory_space<vmem>>, %arg2: memref<1x256xi32, #tpu.memory_space<vmem>>, %arg3: memref<1x256xi32, #tpu.memory_space<vmem>>, %arg4: memref<25x8x1xf32, #tpu.memory_space<vmem>>, %arg5: memref<8x1xf32, #tpu.memory_space<vmem>>, %arg6: memref<49x8x1xf32, #tpu.memory_space<vmem>>, %arg7: memref<8x1xf32, #tpu.memory_space<vmem>>, %arg8: memref<4x8x1xf32, #tpu.memory_space<vmem>>, %arg9: memref<4x8x1xf32, #tpu.memory_space<vmem>>, %arg10: memref<8x1xf32, #tpu.memory_space<vmem>>, %arg11: memref<8x256xf32, #tpu.memory_space<vmem>>) attributes {dimension_semantics = [#tpu.dimension_semantics<parallel>], iteration_bounds = array<i64: 1>, scalar_prefetch = 0 : i64, scratch_operands = 0 : i64, tpu.core_type = #tpu.core_type<tc>, window_params = [{transform_indices = @transform_0, window_bounds = array<i64: 8, 256>}, {pipeline_mode = #tpu.pipeline_mode<synchronous>, transform_indices = @transform_1, window_bounds = array<i64: 1, 256>}, {pipeline_mode = #tpu.pipeline_mode<synchronous>, transform_indices = @transform_2, window_bounds = array<i64: 1, 256>}, {pipeline_mode = #tpu.pipeline_mode<synchronous>, transform_indices = @transform_3, window_bounds = array<i64: 25, 8, 1>}, {pipeline_mode = #tpu.pipeline_mode<synchronous>, transform_indices = @transform_4, window_bounds = array<i64: 8, 1>}, {pipeline_mode = #tpu.pipeline_mode<synchronous>, transform_indices = @transform_5, window_bounds = array<i64: 49, 8, 1>}, {pipeline_mode = #tpu.pipeline_mode<synchronous>, transform_indices = @transform_6, window_bounds = array<i64: 8, 1>}, {pipeline_mode = #tpu.pipeline_mode<synchronous>, transform_indices = @transform_7, window_bounds = array<i64: 4, 8, 1>}, {pipeline_mode = #tpu.pipeline_mode<synchronous>, transform_indices = @transform_8, window_bounds = array<i64: 4, 8, 1>}, {pipeline_mode = #tpu.pipeline_mode<synchronous>, transform_indices = @transform_9, window_bounds = array<i64: 8, 1>}, {transform_indices = @transform_10, window_bounds = array<i64: 8, 256>}]} {
    %c0 = arith.constant 0 : index
    %c0_0 = arith.constant 0 : index
    %0 = vector.load %arg1[%c0, %c0_0] : memref<8x256xf32, #tpu.memory_space<vmem>>, vector<8x256xf32>
    %c0_1 = arith.constant 0 : index
    %c0_2 = arith.constant 0 : index
    %1 = vector.load %arg2[%c0_1, %c0_2] : memref<1x256xi32, #tpu.memory_space<vmem>>, vector<1x256xi32>
    %c0_3 = arith.constant 0 : index
    %c0_4 = arith.constant 0 : index
    %2 = vector.load %arg3[%c0_3, %c0_4] : memref<1x256xi32, #tpu.memory_space<vmem>>, vector<1x256xi32>
    %c2_i32 = arith.constant 2 : i32
    %3 = vector.broadcast %c2_i32 : i32 to vector<1x256xi32>
    %4 = arith.cmpi sge, %2, %3 : vector<1x256xi32>
    %c18_i32 = arith.constant 18 : i32
    %5 = vector.broadcast %c18_i32 : i32 to vector<1x256xi32>
    %6 = arith.cmpi slt, %2, %5 : vector<1x256xi32>
    %7 = arith.andi %4, %6 : vector<1x256xi1>
    %8 = vector.shape_cast %7 : vector<1x256xi1> to vector<1x256xi1>
    %9 = vector.broadcast %8 : vector<1x256xi1> to vector<8x256xi1>
    %c1_i32 = arith.constant 1 : i32
    %10 = vector.broadcast %c1_i32 : i32 to vector<1x256xi32>
    %11 = arith.cmpi sge, %2, %10 : vector<1x256xi32>
    %c17_i32 = arith.constant 17 : i32
    %12 = vector.broadcast %c17_i32 : i32 to vector<1x256xi32>
    %13 = arith.cmpi slt, %2, %12 : vector<1x256xi32>
    %14 = arith.andi %11, %13 : vector<1x256xi1>
    %15 = vector.shape_cast %14 : vector<1x256xi1> to vector<1x256xi1>
    %16 = vector.broadcast %15 : vector<1x256xi1> to vector<8x256xi1>
    %c-1_i32 = arith.constant -1 : i32
    %17 = vector.broadcast %c-1_i32 : i32 to vector<1x256xi32>
    %18 = arith.cmpi sge, %2, %17 : vector<1x256xi32>
    %c15_i32 = arith.constant 15 : i32
    %19 = vector.broadcast %c15_i32 : i32 to vector<1x256xi32>
    %20 = arith.cmpi slt, %2, %19 : vector<1x256xi32>
    %21 = arith.andi %18, %20 : vector<1x256xi1>
    %22 = vector.shape_cast %21 : vector<1x256xi1> to vector<1x256xi1>
    %23 = vector.broadcast %22 : vector<1x256xi1> to vector<8x256xi1>
    %c-2_i32 = arith.constant -2 : i32
    %24 = vector.broadcast %c-2_i32 : i32 to vector<1x256xi32>
    %25 = arith.cmpi sge, %2, %24 : vector<1x256xi32>
    %c14_i32 = arith.constant 14 : i32
    %26 = vector.broadcast %c14_i32 : i32 to vector<1x256xi32>
    %27 = arith.cmpi slt, %2, %26 : vector<1x256xi32>
    %28 = arith.andi %25, %27 : vector<1x256xi1>
    %29 = vector.shape_cast %28 : vector<1x256xi1> to vector<1x256xi1>
    %30 = vector.broadcast %29 : vector<1x256xi1> to vector<8x256xi1>
    %c0_5 = arith.constant 0 : index
    %c0_6 = arith.constant 0 : index
    %c0_7 = arith.constant 0 : index
    %31 = vector.load %arg4[%c0_5, %c0_6, %c0_7] : memref<25x8x1xf32, #tpu.memory_space<vmem>>, vector<1x8x1xf32>
    %32 = vector.shape_cast %31 : vector<1x8x1xf32> to vector<8x1xf32>
    %c34_i32 = arith.constant 34 : i32
    %33 = tpu.dynamic_rotate %0 by %c34_i32 dim 1 : vector<8x256xf32>, i32 -> vector<8x256xf32>
    %34 = vector.broadcast %32 : vector<8x1xf32> to vector<8x256xf32>
    %35 = arith.mulf %33, %34 : vector<8x256xf32>
    %cst = arith.constant 0.000000e+00 : f32
    %36 = vector.broadcast %cst : f32 to vector<8x256xf32>
    %37 = arith.select %9, %35, %36 : vector<8x256xi1>, vector<8x256xf32>
    %c1 = arith.constant 1 : index
    %c0_8 = arith.constant 0 : index
    %c0_9 = arith.constant 0 : index
    %38 = vector.load %arg4[%c1, %c0_8, %c0_9] : memref<25x8x1xf32, #tpu.memory_space<vmem>>, vector<1x8x1xf32>
    %39 = vector.shape_cast %38 : vector<1x8x1xf32> to vector<8x1xf32>
    %c33_i32 = arith.constant 33 : i32
    %40 = tpu.dynamic_rotate %0 by %c33_i32 dim 1 : vector<8x256xf32>, i32 -> vector<8x256xf32>
    %41 = vector.broadcast %39 : vector<8x1xf32> to vector<8x256xf32>
    %42 = arith.mulf %40, %41 : vector<8x256xf32>
    %cst_10 = arith.constant 0.000000e+00 : f32
    %43 = vector.broadcast %cst_10 : f32 to vector<8x256xf32>
    %44 = arith.select %16, %42, %43 : vector<8x256xi1>, vector<8x256xf32>
    %45 = arith.addf %37, %44 : vector<8x256xf32>
    %c2 = arith.constant 2 : index
    %c0_11 = arith.constant 0 : index
    %c0_12 = arith.constant 0 : index
    %46 = vector.load %arg4[%c2, %c0_11, %c0_12] : memref<25x8x1xf32, #tpu.memory_space<vmem>>, vector<1x8x1xf32>
    %47 = vector.shape_cast %46 : vector<1x8x1xf32> to vector<8x1xf32>
    %c32_i32 = arith.constant 32 : i32
    %48 = tpu.dynamic_rotate %0 by %c32_i32 dim 1 : vector<8x256xf32>, i32 -> vector<8x256xf32>
    %49 = vector.broadcast %47 : vector<8x1xf32> to vector<8x256xf32>
    %50 = arith.mulf %48, %49 : vector<8x256xf32>
    %51 = arith.addf %45, %50 : vector<8x256xf32>
    %c3 = arith.constant 3 : index
    %c0_13 = arith.constant 0 : index
    %c0_14 = arith.constant 0 : index
    %52 = vector.load %arg4[%c3, %c0_13, %c0_14] : memref<25x8x1xf32, #tpu.memory_space<vmem>>, vector<1x8x1xf32>
    %53 = vector.shape_cast %52 : vector<1x8x1xf32> to vector<8x1xf32>
    %c31_i32 = arith.constant 31 : i32
    %54 = tpu.dynamic_rotate %0 by %c31_i32 dim 1 : vector<8x256xf32>, i32 -> vector<8x256xf32>
    %55 = vector.broadcast %53 : vector<8x1xf32> to vector<8x256xf32>
    %56 = arith.mulf %54, %55 : vector<8x256xf32>
    %cst_15 = arith.constant 0.000000e+00 : f32
    %57 = vector.broadcast %cst_15 : f32 to vector<8x256xf32>
    %58 = arith.select %23, %56, %57 : vector<8x256xi1>, vector<8x256xf32>
    %59 = arith.addf %51, %58 : vector<8x256xf32>
    %c4 = arith.constant 4 : index
    %c0_16 = arith.constant 0 : index
    %c0_17 = arith.constant 0 : index
    %60 = vector.load %arg4[%c4, %c0_16, %c0_17] : memref<25x8x1xf32, #tpu.memory_space<vmem>>, vector<1x8x1xf32>
    %61 = vector.shape_cast %60 : vector<1x8x1xf32> to vector<8x1xf32>
    %c30_i32 = arith.constant 30 : i32
    %62 = tpu.dynamic_rotate %0 by %c30_i32 dim 1 : vector<8x256xf32>, i32 -> vector<8x256xf32>
    %63 = vector.broadcast %61 : vector<8x1xf32> to vector<8x256xf32>
    %64 = arith.mulf %62, %63 : vector<8x256xf32>
    %cst_18 = arith.constant 0.000000e+00 : f32
    %65 = vector.broadcast %cst_18 : f32 to vector<8x256xf32>
    %66 = arith.select %30, %64, %65 : vector<8x256xi1>, vector<8x256xf32>
    %67 = arith.addf %59, %66 : vector<8x256xf32>
    %c2_i32_19 = arith.constant 2 : i32
    %68 = vector.broadcast %c2_i32_19 : i32 to vector<1x256xi32>
    %69 = arith.cmpi sge, %1, %68 : vector<1x256xi32>
    %c18_i32_20 = arith.constant 18 : i32
    %70 = vector.broadcast %c18_i32_20 : i32 to vector<1x256xi32>
    %71 = arith.cmpi slt, %1, %70 : vector<1x256xi32>
    %72 = arith.andi %69, %71 : vector<1x256xi1>
    %cst_21 = arith.constant 0.000000e+00 : f32
    %73 = vector.shape_cast %72 : vector<1x256xi1> to vector<1x256xi1>
    %74 = vector.broadcast %73 : vector<1x256xi1> to vector<8x256xi1>
    %75 = vector.broadcast %cst_21 : f32 to vector<8x256xf32>
    %76 = arith.select %74, %67, %75 : vector<8x256xi1>, vector<8x256xf32>
    %c5 = arith.constant 5 : index
    %c0_22 = arith.constant 0 : index
    %c0_23 = arith.constant 0 : index
    %77 = vector.load %arg4[%c5, %c0_22, %c0_23] : memref<25x8x1xf32, #tpu.memory_space<vmem>>, vector<1x8x1xf32>
    %78 = vector.shape_cast %77 : vector<1x8x1xf32> to vector<8x1xf32>
    %c18_i32_24 = arith.constant 18 : i32
    %79 = tpu.dynamic_rotate %0 by %c18_i32_24 dim 1 : vector<8x256xf32>, i32 -> vector<8x256xf32>
    %80 = vector.broadcast %78 : vector<8x1xf32> to vector<8x256xf32>
    %81 = arith.mulf %79, %80 : vector<8x256xf32>
    %cst_25 = arith.constant 0.000000e+00 : f32
    %82 = vector.broadcast %cst_25 : f32 to vector<8x256xf32>
    %83 = arith.select %9, %81, %82 : vector<8x256xi1>, vector<8x256xf32>
    %c6 = arith.constant 6 : index
    %c0_26 = arith.constant 0 : index
    %c0_27 = arith.constant 0 : index
    %84 = vector.load %arg4[%c6, %c0_26, %c0_27] : memref<25x8x1xf32, #tpu.memory_space<vmem>>, vector<1x8x1xf32>
    %85 = vector.shape_cast %84 : vector<1x8x1xf32> to vector<8x1xf32>
    %c17_i32_28 = arith.constant 17 : i32
    %86 = tpu.dynamic_rotate %0 by %c17_i32_28 dim 1 : vector<8x256xf32>, i32 -> vector<8x256xf32>
    %87 = vector.broadcast %85 : vector<8x1xf32> to vector<8x256xf32>
    %88 = arith.mulf %86, %87 : vector<8x256xf32>
    %cst_29 = arith.constant 0.000000e+00 : f32
    %89 = vector.broadcast %cst_29 : f32 to vector<8x256xf32>
    %90 = arith.select %16, %88, %89 : vector<8x256xi1>, vector<8x256xf32>
    %91 = arith.addf %83, %90 : vector<8x256xf32>
    %c7 = arith.constant 7 : index
    %c0_30 = arith.constant 0 : index
    %c0_31 = arith.constant 0 : index
    %92 = vector.load %arg4[%c7, %c0_30, %c0_31] : memref<25x8x1xf32, #tpu.memory_space<vmem>>, vector<1x8x1xf32>
    %93 = vector.shape_cast %92 : vector<1x8x1xf32> to vector<8x1xf32>
    %c16_i32 = arith.constant 16 : i32
    %94 = tpu.dynamic_rotate %0 by %c16_i32 dim 1 : vector<8x256xf32>, i32 -> vector<8x256xf32>
    %95 = vector.broadcast %93 : vector<8x1xf32> to vector<8x256xf32>
    %96 = arith.mulf %94, %95 : vector<8x256xf32>
    %97 = arith.addf %91, %96 : vector<8x256xf32>
    %c8 = arith.constant 8 : index
    %c0_32 = arith.constant 0 : index
    %c0_33 = arith.constant 0 : index
    %98 = vector.load %arg4[%c8, %c0_32, %c0_33] : memref<25x8x1xf32, #tpu.memory_space<vmem>>, vector<1x8x1xf32>
    %99 = vector.shape_cast %98 : vector<1x8x1xf32> to vector<8x1xf32>
    %c15_i32_34 = arith.constant 15 : i32
    %100 = tpu.dynamic_rotate %0 by %c15_i32_34 dim 1 : vector<8x256xf32>, i32 -> vector<8x256xf32>
    %101 = vector.broadcast %99 : vector<8x1xf32> to vector<8x256xf32>
    %102 = arith.mulf %100, %101 : vector<8x256xf32>
    %cst_35 = arith.constant 0.000000e+00 : f32
    %103 = vector.broadcast %cst_35 : f32 to vector<8x256xf32>
    %104 = arith.select %23, %102, %103 : vector<8x256xi1>, vector<8x256xf32>
    %105 = arith.addf %97, %104 : vector<8x256xf32>
    %c9 = arith.constant 9 : index
    %c0_36 = arith.constant 0 : index
    %c0_37 = arith.constant 0 : index
    %106 = vector.load %arg4[%c9, %c0_36, %c0_37] : memref<25x8x1xf32, #tpu.memory_space<vmem>>, vector<1x8x1xf32>
    %107 = vector.shape_cast %106 : vector<1x8x1xf32> to vector<8x1xf32>
    %c14_i32_38 = arith.constant 14 : i32
    %108 = tpu.dynamic_rotate %0 by %c14_i32_38 dim 1 : vector<8x256xf32>, i32 -> vector<8x256xf32>
    %109 = vector.broadcast %107 : vector<8x1xf32> to vector<8x256xf32>
    %110 = arith.mulf %108, %109 : vector<8x256xf32>
    %cst_39 = arith.constant 0.000000e+00 : f32
    %111 = vector.broadcast %cst_39 : f32 to vector<8x256xf32>
    %112 = arith.select %30, %110, %111 : vector<8x256xi1>, vector<8x256xf32>
    %113 = arith.addf %105, %112 : vector<8x256xf32>
    %c1_i32_40 = arith.constant 1 : i32
    %114 = vector.broadcast %c1_i32_40 : i32 to vector<1x256xi32>
    %115 = arith.cmpi sge, %1, %114 : vector<1x256xi32>
    %c17_i32_41 = arith.constant 17 : i32
    %116 = vector.broadcast %c17_i32_41 : i32 to vector<1x256xi32>
    %117 = arith.cmpi slt, %1, %116 : vector<1x256xi32>
    %118 = arith.andi %115, %117 : vector<1x256xi1>
    %cst_42 = arith.constant 0.000000e+00 : f32
    %119 = vector.shape_cast %118 : vector<1x256xi1> to vector<1x256xi1>
    %120 = vector.broadcast %119 : vector<1x256xi1> to vector<8x256xi1>
    %121 = vector.broadcast %cst_42 : f32 to vector<8x256xf32>
    %122 = arith.select %120, %113, %121 : vector<8x256xi1>, vector<8x256xf32>
    %123 = arith.addf %76, %122 : vector<8x256xf32>
    %c10 = arith.constant 10 : index
    %c0_43 = arith.constant 0 : index
    %c0_44 = arith.constant 0 : index
    %124 = vector.load %arg4[%c10, %c0_43, %c0_44] : memref<25x8x1xf32, #tpu.memory_space<vmem>>, vector<1x8x1xf32>
    %125 = vector.shape_cast %124 : vector<1x8x1xf32> to vector<8x1xf32>
    %c2_i32_45 = arith.constant 2 : i32
    %126 = tpu.dynamic_rotate %0 by %c2_i32_45 dim 1 : vector<8x256xf32>, i32 -> vector<8x256xf32>
    %127 = vector.broadcast %125 : vector<8x1xf32> to vector<8x256xf32>
    %128 = arith.mulf %126, %127 : vector<8x256xf32>
    %cst_46 = arith.constant 0.000000e+00 : f32
    %129 = vector.broadcast %cst_46 : f32 to vector<8x256xf32>
    %130 = arith.select %9, %128, %129 : vector<8x256xi1>, vector<8x256xf32>
    %c11 = arith.constant 11 : index
    %c0_47 = arith.constant 0 : index
    %c0_48 = arith.constant 0 : index
    %131 = vector.load %arg4[%c11, %c0_47, %c0_48] : memref<25x8x1xf32, #tpu.memory_space<vmem>>, vector<1x8x1xf32>
    %132 = vector.shape_cast %131 : vector<1x8x1xf32> to vector<8x1xf32>
    %c1_i32_49 = arith.constant 1 : i32
    %133 = tpu.dynamic_rotate %0 by %c1_i32_49 dim 1 : vector<8x256xf32>, i32 -> vector<8x256xf32>
    %134 = vector.broadcast %132 : vector<8x1xf32> to vector<8x256xf32>
    %135 = arith.mulf %133, %134 : vector<8x256xf32>
    %cst_50 = arith.constant 0.000000e+00 : f32
    %136 = vector.broadcast %cst_50 : f32 to vector<8x256xf32>
    %137 = arith.select %16, %135, %136 : vector<8x256xi1>, vector<8x256xf32>
    %138 = arith.addf %130, %137 : vector<8x256xf32>
    %c12 = arith.constant 12 : index
    %c0_51 = arith.constant 0 : index
    %c0_52 = arith.constant 0 : index
    %139 = vector.load %arg4[%c12, %c0_51, %c0_52] : memref<25x8x1xf32, #tpu.memory_space<vmem>>, vector<1x8x1xf32>
    %140 = vector.shape_cast %139 : vector<1x8x1xf32> to vector<8x1xf32>
    %141 = vector.broadcast %140 : vector<8x1xf32> to vector<8x256xf32>
    %142 = arith.mulf %0, %141 : vector<8x256xf32>
    %143 = arith.addf %138, %142 : vector<8x256xf32>
    %c13 = arith.constant 13 : index
    %c0_53 = arith.constant 0 : index
    %c0_54 = arith.constant 0 : index
    %144 = vector.load %arg4[%c13, %c0_53, %c0_54] : memref<25x8x1xf32, #tpu.memory_space<vmem>>, vector<1x8x1xf32>
    %145 = vector.shape_cast %144 : vector<1x8x1xf32> to vector<8x1xf32>
    %c255_i32 = arith.constant 255 : i32
    %146 = tpu.dynamic_rotate %0 by %c255_i32 dim 1 : vector<8x256xf32>, i32 -> vector<8x256xf32>
    %147 = vector.broadcast %145 : vector<8x1xf32> to vector<8x256xf32>
    %148 = arith.mulf %146, %147 : vector<8x256xf32>
    %cst_55 = arith.constant 0.000000e+00 : f32
    %149 = vector.broadcast %cst_55 : f32 to vector<8x256xf32>
    %150 = arith.select %23, %148, %149 : vector<8x256xi1>, vector<8x256xf32>
    %151 = arith.addf %143, %150 : vector<8x256xf32>
    %c14 = arith.constant 14 : index
    %c0_56 = arith.constant 0 : index
    %c0_57 = arith.constant 0 : index
    %152 = vector.load %arg4[%c14, %c0_56, %c0_57] : memref<25x8x1xf32, #tpu.memory_space<vmem>>, vector<1x8x1xf32>
    %153 = vector.shape_cast %152 : vector<1x8x1xf32> to vector<8x1xf32>
    %c254_i32 = arith.constant 254 : i32
    %154 = tpu.dynamic_rotate %0 by %c254_i32 dim 1 : vector<8x256xf32>, i32 -> vector<8x256xf32>
    %155 = vector.broadcast %153 : vector<8x1xf32> to vector<8x256xf32>
    %156 = arith.mulf %154, %155 : vector<8x256xf32>
    %cst_58 = arith.constant 0.000000e+00 : f32
    %157 = vector.broadcast %cst_58 : f32 to vector<8x256xf32>
    %158 = arith.select %30, %156, %157 : vector<8x256xi1>, vector<8x256xf32>
    %159 = arith.addf %151, %158 : vector<8x256xf32>
    %160 = arith.addf %123, %159 : vector<8x256xf32>
    %c15 = arith.constant 15 : index
    %c0_59 = arith.constant 0 : index
    %c0_60 = arith.constant 0 : index
    %161 = vector.load %arg4[%c15, %c0_59, %c0_60] : memref<25x8x1xf32, #tpu.memory_space<vmem>>, vector<1x8x1xf32>
    %162 = vector.shape_cast %161 : vector<1x8x1xf32> to vector<8x1xf32>
    %c242_i32 = arith.constant 242 : i32
    %163 = tpu.dynamic_rotate %0 by %c242_i32 dim 1 : vector<8x256xf32>, i32 -> vector<8x256xf32>
    %164 = vector.broadcast %162 : vector<8x1xf32> to vector<8x256xf32>
    %165 = arith.mulf %163, %164 : vector<8x256xf32>
    %cst_61 = arith.constant 0.000000e+00 : f32
    %166 = vector.broadcast %cst_61 : f32 to vector<8x256xf32>
    %167 = arith.select %9, %165, %166 : vector<8x256xi1>, vector<8x256xf32>
    %c16 = arith.constant 16 : index
    %c0_62 = arith.constant 0 : index
    %c0_63 = arith.constant 0 : index
    %168 = vector.load %arg4[%c16, %c0_62, %c0_63] : memref<25x8x1xf32, #tpu.memory_space<vmem>>, vector<1x8x1xf32>
    %169 = vector.shape_cast %168 : vector<1x8x1xf32> to vector<8x1xf32>
    %c241_i32 = arith.constant 241 : i32
    %170 = tpu.dynamic_rotate %0 by %c241_i32 dim 1 : vector<8x256xf32>, i32 -> vector<8x256xf32>
    %171 = vector.broadcast %169 : vector<8x1xf32> to vector<8x256xf32>
    %172 = arith.mulf %170, %171 : vector<8x256xf32>
    %cst_64 = arith.constant 0.000000e+00 : f32
    %173 = vector.broadcast %cst_64 : f32 to vector<8x256xf32>
    %174 = arith.select %16, %172, %173 : vector<8x256xi1>, vector<8x256xf32>
    %175 = arith.addf %167, %174 : vector<8x256xf32>
    %c17 = arith.constant 17 : index
    %c0_65 = arith.constant 0 : index
    %c0_66 = arith.constant 0 : index
    %176 = vector.load %arg4[%c17, %c0_65, %c0_66] : memref<25x8x1xf32, #tpu.memory_space<vmem>>, vector<1x8x1xf32>
    %177 = vector.shape_cast %176 : vector<1x8x1xf32> to vector<8x1xf32>
    %c240_i32 = arith.constant 240 : i32
    %178 = tpu.dynamic_rotate %0 by %c240_i32 dim 1 : vector<8x256xf32>, i32 -> vector<8x256xf32>
    %179 = vector.broadcast %177 : vector<8x1xf32> to vector<8x256xf32>
    %180 = arith.mulf %178, %179 : vector<8x256xf32>
    %181 = arith.addf %175, %180 : vector<8x256xf32>
    %c18 = arith.constant 18 : index
    %c0_67 = arith.constant 0 : index
    %c0_68 = arith.constant 0 : index
    %182 = vector.load %arg4[%c18, %c0_67, %c0_68] : memref<25x8x1xf32, #tpu.memory_space<vmem>>, vector<1x8x1xf32>
    %183 = vector.shape_cast %182 : vector<1x8x1xf32> to vector<8x1xf32>
    %c239_i32 = arith.constant 239 : i32
    %184 = tpu.dynamic_rotate %0 by %c239_i32 dim 1 : vector<8x256xf32>, i32 -> vector<8x256xf32>
    %185 = vector.broadcast %183 : vector<8x1xf32> to vector<8x256xf32>
    %186 = arith.mulf %184, %185 : vector<8x256xf32>
    %cst_69 = arith.constant 0.000000e+00 : f32
    %187 = vector.broadcast %cst_69 : f32 to vector<8x256xf32>
    %188 = arith.select %23, %186, %187 : vector<8x256xi1>, vector<8x256xf32>
    %189 = arith.addf %181, %188 : vector<8x256xf32>
    %c19 = arith.constant 19 : index
    %c0_70 = arith.constant 0 : index
    %c0_71 = arith.constant 0 : index
    %190 = vector.load %arg4[%c19, %c0_70, %c0_71] : memref<25x8x1xf32, #tpu.memory_space<vmem>>, vector<1x8x1xf32>
    %191 = vector.shape_cast %190 : vector<1x8x1xf32> to vector<8x1xf32>
    %c238_i32 = arith.constant 238 : i32
    %192 = tpu.dynamic_rotate %0 by %c238_i32 dim 1 : vector<8x256xf32>, i32 -> vector<8x256xf32>
    %193 = vector.broadcast %191 : vector<8x1xf32> to vector<8x256xf32>
    %194 = arith.mulf %192, %193 : vector<8x256xf32>
    %cst_72 = arith.constant 0.000000e+00 : f32
    %195 = vector.broadcast %cst_72 : f32 to vector<8x256xf32>
    %196 = arith.select %30, %194, %195 : vector<8x256xi1>, vector<8x256xf32>
    %197 = arith.addf %189, %196 : vector<8x256xf32>
    %c-1_i32_73 = arith.constant -1 : i32
    %198 = vector.broadcast %c-1_i32_73 : i32 to vector<1x256xi32>
    %199 = arith.cmpi sge, %1, %198 : vector<1x256xi32>
    %c15_i32_74 = arith.constant 15 : i32
    %200 = vector.broadcast %c15_i32_74 : i32 to vector<1x256xi32>
    %201 = arith.cmpi slt, %1, %200 : vector<1x256xi32>
    %202 = arith.andi %199, %201 : vector<1x256xi1>
    %cst_75 = arith.constant 0.000000e+00 : f32
    %203 = vector.shape_cast %202 : vector<1x256xi1> to vector<1x256xi1>
    %204 = vector.broadcast %203 : vector<1x256xi1> to vector<8x256xi1>
    %205 = vector.broadcast %cst_75 : f32 to vector<8x256xf32>
    %206 = arith.select %204, %197, %205 : vector<8x256xi1>, vector<8x256xf32>
    %207 = arith.addf %160, %206 : vector<8x256xf32>
    %c20 = arith.constant 20 : index
    %c0_76 = arith.constant 0 : index
    %c0_77 = arith.constant 0 : index
    %208 = vector.load %arg4[%c20, %c0_76, %c0_77] : memref<25x8x1xf32, #tpu.memory_space<vmem>>, vector<1x8x1xf32>
    %209 = vector.shape_cast %208 : vector<1x8x1xf32> to vector<8x1xf32>
    %c226_i32 = arith.constant 226 : i32
    %210 = tpu.dynamic_rotate %0 by %c226_i32 dim 1 : vector<8x256xf32>, i32 -> vector<8x256xf32>
    %211 = vector.broadcast %209 : vector<8x1xf32> to vector<8x256xf32>
    %212 = arith.mulf %210, %211 : vector<8x256xf32>
    %cst_78 = arith.constant 0.000000e+00 : f32
    %213 = vector.broadcast %cst_78 : f32 to vector<8x256xf32>
    %214 = arith.select %9, %212, %213 : vector<8x256xi1>, vector<8x256xf32>
    %c21 = arith.constant 21 : index
    %c0_79 = arith.constant 0 : index
    %c0_80 = arith.constant 0 : index
    %215 = vector.load %arg4[%c21, %c0_79, %c0_80] : memref<25x8x1xf32, #tpu.memory_space<vmem>>, vector<1x8x1xf32>
    %216 = vector.shape_cast %215 : vector<1x8x1xf32> to vector<8x1xf32>
    %c225_i32 = arith.constant 225 : i32
    %217 = tpu.dynamic_rotate %0 by %c225_i32 dim 1 : vector<8x256xf32>, i32 -> vector<8x256xf32>
    %218 = vector.broadcast %216 : vector<8x1xf32> to vector<8x256xf32>
    %219 = arith.mulf %217, %218 : vector<8x256xf32>
    %cst_81 = arith.constant 0.000000e+00 : f32
    %220 = vector.broadcast %cst_81 : f32 to vector<8x256xf32>
    %221 = arith.select %16, %219, %220 : vector<8x256xi1>, vector<8x256xf32>
    %222 = arith.addf %214, %221 : vector<8x256xf32>
    %c22 = arith.constant 22 : index
    %c0_82 = arith.constant 0 : index
    %c0_83 = arith.constant 0 : index
    %223 = vector.load %arg4[%c22, %c0_82, %c0_83] : memref<25x8x1xf32, #tpu.memory_space<vmem>>, vector<1x8x1xf32>
    %224 = vector.shape_cast %223 : vector<1x8x1xf32> to vector<8x1xf32>
    %c224_i32 = arith.constant 224 : i32
    %225 = tpu.dynamic_rotate %0 by %c224_i32 dim 1 : vector<8x256xf32>, i32 -> vector<8x256xf32>
    %226 = vector.broadcast %224 : vector<8x1xf32> to vector<8x256xf32>
    %227 = arith.mulf %225, %226 : vector<8x256xf32>
    %228 = arith.addf %222, %227 : vector<8x256xf32>
    %c23 = arith.constant 23 : index
    %c0_84 = arith.constant 0 : index
    %c0_85 = arith.constant 0 : index
    %229 = vector.load %arg4[%c23, %c0_84, %c0_85] : memref<25x8x1xf32, #tpu.memory_space<vmem>>, vector<1x8x1xf32>
    %230 = vector.shape_cast %229 : vector<1x8x1xf32> to vector<8x1xf32>
    %c223_i32 = arith.constant 223 : i32
    %231 = tpu.dynamic_rotate %0 by %c223_i32 dim 1 : vector<8x256xf32>, i32 -> vector<8x256xf32>
    %232 = vector.broadcast %230 : vector<8x1xf32> to vector<8x256xf32>
    %233 = arith.mulf %231, %232 : vector<8x256xf32>
    %cst_86 = arith.constant 0.000000e+00 : f32
    %234 = vector.broadcast %cst_86 : f32 to vector<8x256xf32>
    %235 = arith.select %23, %233, %234 : vector<8x256xi1>, vector<8x256xf32>
    %236 = arith.addf %228, %235 : vector<8x256xf32>
    %c24 = arith.constant 24 : index
    %c0_87 = arith.constant 0 : index
    %c0_88 = arith.constant 0 : index
    %237 = vector.load %arg4[%c24, %c0_87, %c0_88] : memref<25x8x1xf32, #tpu.memory_space<vmem>>, vector<1x8x1xf32>
    %238 = vector.shape_cast %237 : vector<1x8x1xf32> to vector<8x1xf32>
    %c222_i32 = arith.constant 222 : i32
    %239 = tpu.dynamic_rotate %0 by %c222_i32 dim 1 : vector<8x256xf32>, i32 -> vector<8x256xf32>
    %240 = vector.broadcast %238 : vector<8x1xf32> to vector<8x256xf32>
    %241 = arith.mulf %239, %240 : vector<8x256xf32>
    %cst_89 = arith.constant 0.000000e+00 : f32
    %242 = vector.broadcast %cst_89 : f32 to vector<8x256xf32>
    %243 = arith.select %30, %241, %242 : vector<8x256xi1>, vector<8x256xf32>
    %244 = arith.addf %236, %243 : vector<8x256xf32>
    %c-2_i32_90 = arith.constant -2 : i32
    %245 = vector.broadcast %c-2_i32_90 : i32 to vector<1x256xi32>
    %246 = arith.cmpi sge, %1, %245 : vector<1x256xi32>
    %c14_i32_91 = arith.constant 14 : i32
    %247 = vector.broadcast %c14_i32_91 : i32 to vector<1x256xi32>
    %248 = arith.cmpi slt, %1, %247 : vector<1x256xi32>
    %249 = arith.andi %246, %248 : vector<1x256xi1>
    %cst_92 = arith.constant 0.000000e+00 : f32
    %250 = vector.shape_cast %249 : vector<1x256xi1> to vector<1x256xi1>
    %251 = vector.broadcast %250 : vector<1x256xi1> to vector<8x256xi1>
    %252 = vector.broadcast %cst_92 : f32 to vector<8x256xf32>
    %253 = arith.select %251, %244, %252 : vector<8x256xi1>, vector<8x256xf32>
    %254 = arith.addf %207, %253 : vector<8x256xf32>
    %c0_93 = arith.constant 0 : index
    %c0_94 = arith.constant 0 : index
    %255 = vector.load %arg5[%c0_93, %c0_94] : memref<8x1xf32, #tpu.memory_space<vmem>>, vector<8x1xf32>
    %256 = vector.broadcast %255 : vector<8x1xf32> to vector<8x256xf32>
    %257 = arith.addf %254, %256 : vector<8x256xf32>
    %c9_i32 = arith.constant 9 : i32
    %258 = vector.broadcast %c9_i32 : i32 to vector<1x256xi32>
    %259 = arith.cmpi sge, %2, %258 : vector<1x256xi32>
    %c25_i32 = arith.constant 25 : i32
    %260 = vector.broadcast %c25_i32 : i32 to vector<1x256xi32>
    %261 = arith.cmpi slt, %2, %260 : vector<1x256xi32>
    %262 = arith.andi %259, %261 : vector<1x256xi1>
    %263 = vector.shape_cast %262 : vector<1x256xi1> to vector<1x256xi1>
    %264 = vector.broadcast %263 : vector<1x256xi1> to vector<8x256xi1>
    %c6_i32 = arith.constant 6 : i32
    %265 = vector.broadcast %c6_i32 : i32 to vector<1x256xi32>
    %266 = arith.cmpi sge, %2, %265 : vector<1x256xi32>
    %c22_i32 = arith.constant 22 : i32
    %267 = vector.broadcast %c22_i32 : i32 to vector<1x256xi32>
    %268 = arith.cmpi slt, %2, %267 : vector<1x256xi32>
    %269 = arith.andi %266, %268 : vector<1x256xi1>
    %270 = vector.shape_cast %269 : vector<1x256xi1> to vector<1x256xi1>
    %271 = vector.broadcast %270 : vector<1x256xi1> to vector<8x256xi1>
    %c3_i32 = arith.constant 3 : i32
    %272 = vector.broadcast %c3_i32 : i32 to vector<1x256xi32>
    %273 = arith.cmpi sge, %2, %272 : vector<1x256xi32>
    %c19_i32 = arith.constant 19 : i32
    %274 = vector.broadcast %c19_i32 : i32 to vector<1x256xi32>
    %275 = arith.cmpi slt, %2, %274 : vector<1x256xi32>
    %276 = arith.andi %273, %275 : vector<1x256xi1>
    %277 = vector.shape_cast %276 : vector<1x256xi1> to vector<1x256xi1>
    %278 = vector.broadcast %277 : vector<1x256xi1> to vector<8x256xi1>
    %c-3_i32 = arith.constant -3 : i32
    %279 = vector.broadcast %c-3_i32 : i32 to vector<1x256xi32>
    %280 = arith.cmpi sge, %2, %279 : vector<1x256xi32>
    %c13_i32 = arith.constant 13 : i32
    %281 = vector.broadcast %c13_i32 : i32 to vector<1x256xi32>
    %282 = arith.cmpi slt, %2, %281 : vector<1x256xi32>
    %283 = arith.andi %280, %282 : vector<1x256xi1>
    %284 = vector.shape_cast %283 : vector<1x256xi1> to vector<1x256xi1>
    %285 = vector.broadcast %284 : vector<1x256xi1> to vector<8x256xi1>
    %c-6_i32 = arith.constant -6 : i32
    %286 = vector.broadcast %c-6_i32 : i32 to vector<1x256xi32>
    %287 = arith.cmpi sge, %2, %286 : vector<1x256xi32>
    %c10_i32 = arith.constant 10 : i32
    %288 = vector.broadcast %c10_i32 : i32 to vector<1x256xi32>
    %289 = arith.cmpi slt, %2, %288 : vector<1x256xi32>
    %290 = arith.andi %287, %289 : vector<1x256xi1>
    %291 = vector.shape_cast %290 : vector<1x256xi1> to vector<1x256xi1>
    %292 = vector.broadcast %291 : vector<1x256xi1> to vector<8x256xi1>
    %c-9_i32 = arith.constant -9 : i32
    %293 = vector.broadcast %c-9_i32 : i32 to vector<1x256xi32>
    %294 = arith.cmpi sge, %2, %293 : vector<1x256xi32>
    %c7_i32 = arith.constant 7 : i32
    %295 = vector.broadcast %c7_i32 : i32 to vector<1x256xi32>
    %296 = arith.cmpi slt, %2, %295 : vector<1x256xi32>
    %297 = arith.andi %294, %296 : vector<1x256xi1>
    %298 = vector.shape_cast %297 : vector<1x256xi1> to vector<1x256xi1>
    %299 = vector.broadcast %298 : vector<1x256xi1> to vector<8x256xi1>
    %c0_95 = arith.constant 0 : index
    %c0_96 = arith.constant 0 : index
    %c0_97 = arith.constant 0 : index
    %300 = vector.load %arg6[%c0_95, %c0_96, %c0_97] : memref<49x8x1xf32, #tpu.memory_space<vmem>>, vector<1x8x1xf32>
    %301 = vector.shape_cast %300 : vector<1x8x1xf32> to vector<8x1xf32>
    %c153_i32 = arith.constant 153 : i32
    %302 = tpu.dynamic_rotate %257 by %c153_i32 dim 1 : vector<8x256xf32>, i32 -> vector<8x256xf32>
    %303 = vector.broadcast %301 : vector<8x1xf32> to vector<8x256xf32>
    %304 = arith.mulf %302, %303 : vector<8x256xf32>
    %cst_98 = arith.constant 0.000000e+00 : f32
    %305 = vector.broadcast %cst_98 : f32 to vector<8x256xf32>
    %306 = arith.select %264, %304, %305 : vector<8x256xi1>, vector<8x256xf32>
    %c1_99 = arith.constant 1 : index
    %c0_100 = arith.constant 0 : index
    %c0_101 = arith.constant 0 : index
    %307 = vector.load %arg6[%c1_99, %c0_100, %c0_101] : memref<49x8x1xf32, #tpu.memory_space<vmem>>, vector<1x8x1xf32>
    %308 = vector.shape_cast %307 : vector<1x8x1xf32> to vector<8x1xf32>
    %c150_i32 = arith.constant 150 : i32
    %309 = tpu.dynamic_rotate %257 by %c150_i32 dim 1 : vector<8x256xf32>, i32 -> vector<8x256xf32>
    %310 = vector.broadcast %308 : vector<8x1xf32> to vector<8x256xf32>
    %311 = arith.mulf %309, %310 : vector<8x256xf32>
    %cst_102 = arith.constant 0.000000e+00 : f32
    %312 = vector.broadcast %cst_102 : f32 to vector<8x256xf32>
    %313 = arith.select %271, %311, %312 : vector<8x256xi1>, vector<8x256xf32>
    %314 = arith.addf %306, %313 : vector<8x256xf32>
    %c2_103 = arith.constant 2 : index
    %c0_104 = arith.constant 0 : index
    %c0_105 = arith.constant 0 : index
    %315 = vector.load %arg6[%c2_103, %c0_104, %c0_105] : memref<49x8x1xf32, #tpu.memory_space<vmem>>, vector<1x8x1xf32>
    %316 = vector.shape_cast %315 : vector<1x8x1xf32> to vector<8x1xf32>
    %c147_i32 = arith.constant 147 : i32
    %317 = tpu.dynamic_rotate %257 by %c147_i32 dim 1 : vector<8x256xf32>, i32 -> vector<8x256xf32>
    %318 = vector.broadcast %316 : vector<8x1xf32> to vector<8x256xf32>
    %319 = arith.mulf %317, %318 : vector<8x256xf32>
    %cst_106 = arith.constant 0.000000e+00 : f32
    %320 = vector.broadcast %cst_106 : f32 to vector<8x256xf32>
    %321 = arith.select %278, %319, %320 : vector<8x256xi1>, vector<8x256xf32>
    %322 = arith.addf %314, %321 : vector<8x256xf32>
    %c3_107 = arith.constant 3 : index
    %c0_108 = arith.constant 0 : index
    %c0_109 = arith.constant 0 : index
    %323 = vector.load %arg6[%c3_107, %c0_108, %c0_109] : memref<49x8x1xf32, #tpu.memory_space<vmem>>, vector<1x8x1xf32>
    %324 = vector.shape_cast %323 : vector<1x8x1xf32> to vector<8x1xf32>
    %c144_i32 = arith.constant 144 : i32
    %325 = tpu.dynamic_rotate %257 by %c144_i32 dim 1 : vector<8x256xf32>, i32 -> vector<8x256xf32>
    %326 = vector.broadcast %324 : vector<8x1xf32> to vector<8x256xf32>
    %327 = arith.mulf %325, %326 : vector<8x256xf32>
    %328 = arith.addf %322, %327 : vector<8x256xf32>
    %c4_110 = arith.constant 4 : index
    %c0_111 = arith.constant 0 : index
    %c0_112 = arith.constant 0 : index
    %329 = vector.load %arg6[%c4_110, %c0_111, %c0_112] : memref<49x8x1xf32, #tpu.memory_space<vmem>>, vector<1x8x1xf32>
    %330 = vector.shape_cast %329 : vector<1x8x1xf32> to vector<8x1xf32>
    %c141_i32 = arith.constant 141 : i32
    %331 = tpu.dynamic_rotate %257 by %c141_i32 dim 1 : vector<8x256xf32>, i32 -> vector<8x256xf32>
    %332 = vector.broadcast %330 : vector<8x1xf32> to vector<8x256xf32>
    %333 = arith.mulf %331, %332 : vector<8x256xf32>
    %cst_113 = arith.constant 0.000000e+00 : f32
    %334 = vector.broadcast %cst_113 : f32 to vector<8x256xf32>
    %335 = arith.select %285, %333, %334 : vector<8x256xi1>, vector<8x256xf32>
    %336 = arith.addf %328, %335 : vector<8x256xf32>
    %c5_114 = arith.constant 5 : index
    %c0_115 = arith.constant 0 : index
    %c0_116 = arith.constant 0 : index
    %337 = vector.load %arg6[%c5_114, %c0_115, %c0_116] : memref<49x8x1xf32, #tpu.memory_space<vmem>>, vector<1x8x1xf32>
    %338 = vector.shape_cast %337 : vector<1x8x1xf32> to vector<8x1xf32>
    %c138_i32 = arith.constant 138 : i32
    %339 = tpu.dynamic_rotate %257 by %c138_i32 dim 1 : vector<8x256xf32>, i32 -> vector<8x256xf32>
    %340 = vector.broadcast %338 : vector<8x1xf32> to vector<8x256xf32>
    %341 = arith.mulf %339, %340 : vector<8x256xf32>
    %cst_117 = arith.constant 0.000000e+00 : f32
    %342 = vector.broadcast %cst_117 : f32 to vector<8x256xf32>
    %343 = arith.select %292, %341, %342 : vector<8x256xi1>, vector<8x256xf32>
    %344 = arith.addf %336, %343 : vector<8x256xf32>
    %c6_118 = arith.constant 6 : index
    %c0_119 = arith.constant 0 : index
    %c0_120 = arith.constant 0 : index
    %345 = vector.load %arg6[%c6_118, %c0_119, %c0_120] : memref<49x8x1xf32, #tpu.memory_space<vmem>>, vector<1x8x1xf32>
    %346 = vector.shape_cast %345 : vector<1x8x1xf32> to vector<8x1xf32>
    %c135_i32 = arith.constant 135 : i32
    %347 = tpu.dynamic_rotate %257 by %c135_i32 dim 1 : vector<8x256xf32>, i32 -> vector<8x256xf32>
    %348 = vector.broadcast %346 : vector<8x1xf32> to vector<8x256xf32>
    %349 = arith.mulf %347, %348 : vector<8x256xf32>
    %cst_121 = arith.constant 0.000000e+00 : f32
    %350 = vector.broadcast %cst_121 : f32 to vector<8x256xf32>
    %351 = arith.select %299, %349, %350 : vector<8x256xi1>, vector<8x256xf32>
    %352 = arith.addf %344, %351 : vector<8x256xf32>
    %c9_i32_122 = arith.constant 9 : i32
    %353 = vector.broadcast %c9_i32_122 : i32 to vector<1x256xi32>
    %354 = arith.cmpi sge, %1, %353 : vector<1x256xi32>
    %c25_i32_123 = arith.constant 25 : i32
    %355 = vector.broadcast %c25_i32_123 : i32 to vector<1x256xi32>
    %356 = arith.cmpi slt, %1, %355 : vector<1x256xi32>
    %357 = arith.andi %354, %356 : vector<1x256xi1>
    %cst_124 = arith.constant 0.000000e+00 : f32
    %358 = vector.shape_cast %357 : vector<1x256xi1> to vector<1x256xi1>
    %359 = vector.broadcast %358 : vector<1x256xi1> to vector<8x256xi1>
    %360 = vector.broadcast %cst_124 : f32 to vector<8x256xf32>
    %361 = arith.select %359, %352, %360 : vector<8x256xi1>, vector<8x256xf32>
    %c7_125 = arith.constant 7 : index
    %c0_126 = arith.constant 0 : index
    %c0_127 = arith.constant 0 : index
    %362 = vector.load %arg6[%c7_125, %c0_126, %c0_127] : memref<49x8x1xf32, #tpu.memory_space<vmem>>, vector<1x8x1xf32>
    %363 = vector.shape_cast %362 : vector<1x8x1xf32> to vector<8x1xf32>
    %c105_i32 = arith.constant 105 : i32
    %364 = tpu.dynamic_rotate %257 by %c105_i32 dim 1 : vector<8x256xf32>, i32 -> vector<8x256xf32>
    %365 = vector.broadcast %363 : vector<8x1xf32> to vector<8x256xf32>
    %366 = arith.mulf %364, %365 : vector<8x256xf32>
    %cst_128 = arith.constant 0.000000e+00 : f32
    %367 = vector.broadcast %cst_128 : f32 to vector<8x256xf32>
    %368 = arith.select %264, %366, %367 : vector<8x256xi1>, vector<8x256xf32>
    %c8_129 = arith.constant 8 : index
    %c0_130 = arith.constant 0 : index
    %c0_131 = arith.constant 0 : index
    %369 = vector.load %arg6[%c8_129, %c0_130, %c0_131] : memref<49x8x1xf32, #tpu.memory_space<vmem>>, vector<1x8x1xf32>
    %370 = vector.shape_cast %369 : vector<1x8x1xf32> to vector<8x1xf32>
    %c102_i32 = arith.constant 102 : i32
    %371 = tpu.dynamic_rotate %257 by %c102_i32 dim 1 : vector<8x256xf32>, i32 -> vector<8x256xf32>
    %372 = vector.broadcast %370 : vector<8x1xf32> to vector<8x256xf32>
    %373 = arith.mulf %371, %372 : vector<8x256xf32>
    %cst_132 = arith.constant 0.000000e+00 : f32
    %374 = vector.broadcast %cst_132 : f32 to vector<8x256xf32>
    %375 = arith.select %271, %373, %374 : vector<8x256xi1>, vector<8x256xf32>
    %376 = arith.addf %368, %375 : vector<8x256xf32>
    %c9_133 = arith.constant 9 : index
    %c0_134 = arith.constant 0 : index
    %c0_135 = arith.constant 0 : index
    %377 = vector.load %arg6[%c9_133, %c0_134, %c0_135] : memref<49x8x1xf32, #tpu.memory_space<vmem>>, vector<1x8x1xf32>
    %378 = vector.shape_cast %377 : vector<1x8x1xf32> to vector<8x1xf32>
    %c99_i32 = arith.constant 99 : i32
    %379 = tpu.dynamic_rotate %257 by %c99_i32 dim 1 : vector<8x256xf32>, i32 -> vector<8x256xf32>
    %380 = vector.broadcast %378 : vector<8x1xf32> to vector<8x256xf32>
    %381 = arith.mulf %379, %380 : vector<8x256xf32>
    %cst_136 = arith.constant 0.000000e+00 : f32
    %382 = vector.broadcast %cst_136 : f32 to vector<8x256xf32>
    %383 = arith.select %278, %381, %382 : vector<8x256xi1>, vector<8x256xf32>
    %384 = arith.addf %376, %383 : vector<8x256xf32>
    %c10_137 = arith.constant 10 : index
    %c0_138 = arith.constant 0 : index
    %c0_139 = arith.constant 0 : index
    %385 = vector.load %arg6[%c10_137, %c0_138, %c0_139] : memref<49x8x1xf32, #tpu.memory_space<vmem>>, vector<1x8x1xf32>
    %386 = vector.shape_cast %385 : vector<1x8x1xf32> to vector<8x1xf32>
    %c96_i32 = arith.constant 96 : i32
    %387 = tpu.dynamic_rotate %257 by %c96_i32 dim 1 : vector<8x256xf32>, i32 -> vector<8x256xf32>
    %388 = vector.broadcast %386 : vector<8x1xf32> to vector<8x256xf32>
    %389 = arith.mulf %387, %388 : vector<8x256xf32>
    %390 = arith.addf %384, %389 : vector<8x256xf32>
    %c11_140 = arith.constant 11 : index
    %c0_141 = arith.constant 0 : index
    %c0_142 = arith.constant 0 : index
    %391 = vector.load %arg6[%c11_140, %c0_141, %c0_142] : memref<49x8x1xf32, #tpu.memory_space<vmem>>, vector<1x8x1xf32>
    %392 = vector.shape_cast %391 : vector<1x8x1xf32> to vector<8x1xf32>
    %c93_i32 = arith.constant 93 : i32
    %393 = tpu.dynamic_rotate %257 by %c93_i32 dim 1 : vector<8x256xf32>, i32 -> vector<8x256xf32>
    %394 = vector.broadcast %392 : vector<8x1xf32> to vector<8x256xf32>
    %395 = arith.mulf %393, %394 : vector<8x256xf32>
    %cst_143 = arith.constant 0.000000e+00 : f32
    %396 = vector.broadcast %cst_143 : f32 to vector<8x256xf32>
    %397 = arith.select %285, %395, %396 : vector<8x256xi1>, vector<8x256xf32>
    %398 = arith.addf %390, %397 : vector<8x256xf32>
    %c12_144 = arith.constant 12 : index
    %c0_145 = arith.constant 0 : index
    %c0_146 = arith.constant 0 : index
    %399 = vector.load %arg6[%c12_144, %c0_145, %c0_146] : memref<49x8x1xf32, #tpu.memory_space<vmem>>, vector<1x8x1xf32>
    %400 = vector.shape_cast %399 : vector<1x8x1xf32> to vector<8x1xf32>
    %c90_i32 = arith.constant 90 : i32
    %401 = tpu.dynamic_rotate %257 by %c90_i32 dim 1 : vector<8x256xf32>, i32 -> vector<8x256xf32>
    %402 = vector.broadcast %400 : vector<8x1xf32> to vector<8x256xf32>
    %403 = arith.mulf %401, %402 : vector<8x256xf32>
    %cst_147 = arith.constant 0.000000e+00 : f32
    %404 = vector.broadcast %cst_147 : f32 to vector<8x256xf32>
    %405 = arith.select %292, %403, %404 : vector<8x256xi1>, vector<8x256xf32>
    %406 = arith.addf %398, %405 : vector<8x256xf32>
    %c13_148 = arith.constant 13 : index
    %c0_149 = arith.constant 0 : index
    %c0_150 = arith.constant 0 : index
    %407 = vector.load %arg6[%c13_148, %c0_149, %c0_150] : memref<49x8x1xf32, #tpu.memory_space<vmem>>, vector<1x8x1xf32>
    %408 = vector.shape_cast %407 : vector<1x8x1xf32> to vector<8x1xf32>
    %c87_i32 = arith.constant 87 : i32
    %409 = tpu.dynamic_rotate %257 by %c87_i32 dim 1 : vector<8x256xf32>, i32 -> vector<8x256xf32>
    %410 = vector.broadcast %408 : vector<8x1xf32> to vector<8x256xf32>
    %411 = arith.mulf %409, %410 : vector<8x256xf32>
    %cst_151 = arith.constant 0.000000e+00 : f32
    %412 = vector.broadcast %cst_151 : f32 to vector<8x256xf32>
    %413 = arith.select %299, %411, %412 : vector<8x256xi1>, vector<8x256xf32>
    %414 = arith.addf %406, %413 : vector<8x256xf32>
    %c6_i32_152 = arith.constant 6 : i32
    %415 = vector.broadcast %c6_i32_152 : i32 to vector<1x256xi32>
    %416 = arith.cmpi sge, %1, %415 : vector<1x256xi32>
    %c22_i32_153 = arith.constant 22 : i32
    %417 = vector.broadcast %c22_i32_153 : i32 to vector<1x256xi32>
    %418 = arith.cmpi slt, %1, %417 : vector<1x256xi32>
    %419 = arith.andi %416, %418 : vector<1x256xi1>
    %cst_154 = arith.constant 0.000000e+00 : f32
    %420 = vector.shape_cast %419 : vector<1x256xi1> to vector<1x256xi1>
    %421 = vector.broadcast %420 : vector<1x256xi1> to vector<8x256xi1>
    %422 = vector.broadcast %cst_154 : f32 to vector<8x256xf32>
    %423 = arith.select %421, %414, %422 : vector<8x256xi1>, vector<8x256xf32>
    %424 = arith.addf %361, %423 : vector<8x256xf32>
    %c14_155 = arith.constant 14 : index
    %c0_156 = arith.constant 0 : index
    %c0_157 = arith.constant 0 : index
    %425 = vector.load %arg6[%c14_155, %c0_156, %c0_157] : memref<49x8x1xf32, #tpu.memory_space<vmem>>, vector<1x8x1xf32>
    %426 = vector.shape_cast %425 : vector<1x8x1xf32> to vector<8x1xf32>
    %c57_i32 = arith.constant 57 : i32
    %427 = tpu.dynamic_rotate %257 by %c57_i32 dim 1 : vector<8x256xf32>, i32 -> vector<8x256xf32>
    %428 = vector.broadcast %426 : vector<8x1xf32> to vector<8x256xf32>
    %429 = arith.mulf %427, %428 : vector<8x256xf32>
    %cst_158 = arith.constant 0.000000e+00 : f32
    %430 = vector.broadcast %cst_158 : f32 to vector<8x256xf32>
    %431 = arith.select %264, %429, %430 : vector<8x256xi1>, vector<8x256xf32>
    %c15_159 = arith.constant 15 : index
    %c0_160 = arith.constant 0 : index
    %c0_161 = arith.constant 0 : index
    %432 = vector.load %arg6[%c15_159, %c0_160, %c0_161] : memref<49x8x1xf32, #tpu.memory_space<vmem>>, vector<1x8x1xf32>
    %433 = vector.shape_cast %432 : vector<1x8x1xf32> to vector<8x1xf32>
    %c54_i32 = arith.constant 54 : i32
    %434 = tpu.dynamic_rotate %257 by %c54_i32 dim 1 : vector<8x256xf32>, i32 -> vector<8x256xf32>
    %435 = vector.broadcast %433 : vector<8x1xf32> to vector<8x256xf32>
    %436 = arith.mulf %434, %435 : vector<8x256xf32>
    %cst_162 = arith.constant 0.000000e+00 : f32
    %437 = vector.broadcast %cst_162 : f32 to vector<8x256xf32>
    %438 = arith.select %271, %436, %437 : vector<8x256xi1>, vector<8x256xf32>
    %439 = arith.addf %431, %438 : vector<8x256xf32>
    %c16_163 = arith.constant 16 : index
    %c0_164 = arith.constant 0 : index
    %c0_165 = arith.constant 0 : index
    %440 = vector.load %arg6[%c16_163, %c0_164, %c0_165] : memref<49x8x1xf32, #tpu.memory_space<vmem>>, vector<1x8x1xf32>
    %441 = vector.shape_cast %440 : vector<1x8x1xf32> to vector<8x1xf32>
    %c51_i32 = arith.constant 51 : i32
    %442 = tpu.dynamic_rotate %257 by %c51_i32 dim 1 : vector<8x256xf32>, i32 -> vector<8x256xf32>
    %443 = vector.broadcast %441 : vector<8x1xf32> to vector<8x256xf32>
    %444 = arith.mulf %442, %443 : vector<8x256xf32>
    %cst_166 = arith.constant 0.000000e+00 : f32
    %445 = vector.broadcast %cst_166 : f32 to vector<8x256xf32>
    %446 = arith.select %278, %444, %445 : vector<8x256xi1>, vector<8x256xf32>
    %447 = arith.addf %439, %446 : vector<8x256xf32>
    %c17_167 = arith.constant 17 : index
    %c0_168 = arith.constant 0 : index
    %c0_169 = arith.constant 0 : index
    %448 = vector.load %arg6[%c17_167, %c0_168, %c0_169] : memref<49x8x1xf32, #tpu.memory_space<vmem>>, vector<1x8x1xf32>
    %449 = vector.shape_cast %448 : vector<1x8x1xf32> to vector<8x1xf32>
    %c48_i32 = arith.constant 48 : i32
    %450 = tpu.dynamic_rotate %257 by %c48_i32 dim 1 : vector<8x256xf32>, i32 -> vector<8x256xf32>
    %451 = vector.broadcast %449 : vector<8x1xf32> to vector<8x256xf32>
    %452 = arith.mulf %450, %451 : vector<8x256xf32>
    %453 = arith.addf %447, %452 : vector<8x256xf32>
    %c18_170 = arith.constant 18 : index
    %c0_171 = arith.constant 0 : index
    %c0_172 = arith.constant 0 : index
    %454 = vector.load %arg6[%c18_170, %c0_171, %c0_172] : memref<49x8x1xf32, #tpu.memory_space<vmem>>, vector<1x8x1xf32>
    %455 = vector.shape_cast %454 : vector<1x8x1xf32> to vector<8x1xf32>
    %c45_i32 = arith.constant 45 : i32
    %456 = tpu.dynamic_rotate %257 by %c45_i32 dim 1 : vector<8x256xf32>, i32 -> vector<8x256xf32>
    %457 = vector.broadcast %455 : vector<8x1xf32> to vector<8x256xf32>
    %458 = arith.mulf %456, %457 : vector<8x256xf32>
    %cst_173 = arith.constant 0.000000e+00 : f32
    %459 = vector.broadcast %cst_173 : f32 to vector<8x256xf32>
    %460 = arith.select %285, %458, %459 : vector<8x256xi1>, vector<8x256xf32>
    %461 = arith.addf %453, %460 : vector<8x256xf32>
    %c19_174 = arith.constant 19 : index
    %c0_175 = arith.constant 0 : index
    %c0_176 = arith.constant 0 : index
    %462 = vector.load %arg6[%c19_174, %c0_175, %c0_176] : memref<49x8x1xf32, #tpu.memory_space<vmem>>, vector<1x8x1xf32>
    %463 = vector.shape_cast %462 : vector<1x8x1xf32> to vector<8x1xf32>
    %c42_i32 = arith.constant 42 : i32
    %464 = tpu.dynamic_rotate %257 by %c42_i32 dim 1 : vector<8x256xf32>, i32 -> vector<8x256xf32>
    %465 = vector.broadcast %463 : vector<8x1xf32> to vector<8x256xf32>
    %466 = arith.mulf %464, %465 : vector<8x256xf32>
    %cst_177 = arith.constant 0.000000e+00 : f32
    %467 = vector.broadcast %cst_177 : f32 to vector<8x256xf32>
    %468 = arith.select %292, %466, %467 : vector<8x256xi1>, vector<8x256xf32>
    %469 = arith.addf %461, %468 : vector<8x256xf32>
    %c20_178 = arith.constant 20 : index
    %c0_179 = arith.constant 0 : index
    %c0_180 = arith.constant 0 : index
    %470 = vector.load %arg6[%c20_178, %c0_179, %c0_180] : memref<49x8x1xf32, #tpu.memory_space<vmem>>, vector<1x8x1xf32>
    %471 = vector.shape_cast %470 : vector<1x8x1xf32> to vector<8x1xf32>
    %c39_i32 = arith.constant 39 : i32
    %472 = tpu.dynamic_rotate %257 by %c39_i32 dim 1 : vector<8x256xf32>, i32 -> vector<8x256xf32>
    %473 = vector.broadcast %471 : vector<8x1xf32> to vector<8x256xf32>
    %474 = arith.mulf %472, %473 : vector<8x256xf32>
    %cst_181 = arith.constant 0.000000e+00 : f32
    %475 = vector.broadcast %cst_181 : f32 to vector<8x256xf32>
    %476 = arith.select %299, %474, %475 : vector<8x256xi1>, vector<8x256xf32>
    %477 = arith.addf %469, %476 : vector<8x256xf32>
    %c3_i32_182 = arith.constant 3 : i32
    %478 = vector.broadcast %c3_i32_182 : i32 to vector<1x256xi32>
    %479 = arith.cmpi sge, %1, %478 : vector<1x256xi32>
    %c19_i32_183 = arith.constant 19 : i32
    %480 = vector.broadcast %c19_i32_183 : i32 to vector<1x256xi32>
    %481 = arith.cmpi slt, %1, %480 : vector<1x256xi32>
    %482 = arith.andi %479, %481 : vector<1x256xi1>
    %cst_184 = arith.constant 0.000000e+00 : f32
    %483 = vector.shape_cast %482 : vector<1x256xi1> to vector<1x256xi1>
    %484 = vector.broadcast %483 : vector<1x256xi1> to vector<8x256xi1>
    %485 = vector.broadcast %cst_184 : f32 to vector<8x256xf32>
    %486 = arith.select %484, %477, %485 : vector<8x256xi1>, vector<8x256xf32>
    %487 = arith.addf %424, %486 : vector<8x256xf32>
    %c21_185 = arith.constant 21 : index
    %c0_186 = arith.constant 0 : index
    %c0_187 = arith.constant 0 : index
    %488 = vector.load %arg6[%c21_185, %c0_186, %c0_187] : memref<49x8x1xf32, #tpu.memory_space<vmem>>, vector<1x8x1xf32>
    %489 = vector.shape_cast %488 : vector<1x8x1xf32> to vector<8x1xf32>
    %c9_i32_188 = arith.constant 9 : i32
    %490 = tpu.dynamic_rotate %257 by %c9_i32_188 dim 1 : vector<8x256xf32>, i32 -> vector<8x256xf32>
    %491 = vector.broadcast %489 : vector<8x1xf32> to vector<8x256xf32>
    %492 = arith.mulf %490, %491 : vector<8x256xf32>
    %cst_189 = arith.constant 0.000000e+00 : f32
    %493 = vector.broadcast %cst_189 : f32 to vector<8x256xf32>
    %494 = arith.select %264, %492, %493 : vector<8x256xi1>, vector<8x256xf32>
    %c22_190 = arith.constant 22 : index
    %c0_191 = arith.constant 0 : index
    %c0_192 = arith.constant 0 : index
    %495 = vector.load %arg6[%c22_190, %c0_191, %c0_192] : memref<49x8x1xf32, #tpu.memory_space<vmem>>, vector<1x8x1xf32>
    %496 = vector.shape_cast %495 : vector<1x8x1xf32> to vector<8x1xf32>
    %c6_i32_193 = arith.constant 6 : i32
    %497 = tpu.dynamic_rotate %257 by %c6_i32_193 dim 1 : vector<8x256xf32>, i32 -> vector<8x256xf32>
    %498 = vector.broadcast %496 : vector<8x1xf32> to vector<8x256xf32>
    %499 = arith.mulf %497, %498 : vector<8x256xf32>
    %cst_194 = arith.constant 0.000000e+00 : f32
    %500 = vector.broadcast %cst_194 : f32 to vector<8x256xf32>
    %501 = arith.select %271, %499, %500 : vector<8x256xi1>, vector<8x256xf32>
    %502 = arith.addf %494, %501 : vector<8x256xf32>
    %c23_195 = arith.constant 23 : index
    %c0_196 = arith.constant 0 : index
    %c0_197 = arith.constant 0 : index
    %503 = vector.load %arg6[%c23_195, %c0_196, %c0_197] : memref<49x8x1xf32, #tpu.memory_space<vmem>>, vector<1x8x1xf32>
    %504 = vector.shape_cast %503 : vector<1x8x1xf32> to vector<8x1xf32>
    %c3_i32_198 = arith.constant 3 : i32
    %505 = tpu.dynamic_rotate %257 by %c3_i32_198 dim 1 : vector<8x256xf32>, i32 -> vector<8x256xf32>
    %506 = vector.broadcast %504 : vector<8x1xf32> to vector<8x256xf32>
    %507 = arith.mulf %505, %506 : vector<8x256xf32>
    %cst_199 = arith.constant 0.000000e+00 : f32
    %508 = vector.broadcast %cst_199 : f32 to vector<8x256xf32>
    %509 = arith.select %278, %507, %508 : vector<8x256xi1>, vector<8x256xf32>
    %510 = arith.addf %502, %509 : vector<8x256xf32>
    %c24_200 = arith.constant 24 : index
    %c0_201 = arith.constant 0 : index
    %c0_202 = arith.constant 0 : index
    %511 = vector.load %arg6[%c24_200, %c0_201, %c0_202] : memref<49x8x1xf32, #tpu.memory_space<vmem>>, vector<1x8x1xf32>
    %512 = vector.shape_cast %511 : vector<1x8x1xf32> to vector<8x1xf32>
    %513 = vector.broadcast %512 : vector<8x1xf32> to vector<8x256xf32>
    %514 = arith.mulf %257, %513 : vector<8x256xf32>
    %515 = arith.addf %510, %514 : vector<8x256xf32>
    %c25 = arith.constant 25 : index
    %c0_203 = arith.constant 0 : index
    %c0_204 = arith.constant 0 : index
    %516 = vector.load %arg6[%c25, %c0_203, %c0_204] : memref<49x8x1xf32, #tpu.memory_space<vmem>>, vector<1x8x1xf32>
    %517 = vector.shape_cast %516 : vector<1x8x1xf32> to vector<8x1xf32>
    %c253_i32 = arith.constant 253 : i32
    %518 = tpu.dynamic_rotate %257 by %c253_i32 dim 1 : vector<8x256xf32>, i32 -> vector<8x256xf32>
    %519 = vector.broadcast %517 : vector<8x1xf32> to vector<8x256xf32>
    %520 = arith.mulf %518, %519 : vector<8x256xf32>
    %cst_205 = arith.constant 0.000000e+00 : f32
    %521 = vector.broadcast %cst_205 : f32 to vector<8x256xf32>
    %522 = arith.select %285, %520, %521 : vector<8x256xi1>, vector<8x256xf32>
    %523 = arith.addf %515, %522 : vector<8x256xf32>
    %c26 = arith.constant 26 : index
    %c0_206 = arith.constant 0 : index
    %c0_207 = arith.constant 0 : index
    %524 = vector.load %arg6[%c26, %c0_206, %c0_207] : memref<49x8x1xf32, #tpu.memory_space<vmem>>, vector<1x8x1xf32>
    %525 = vector.shape_cast %524 : vector<1x8x1xf32> to vector<8x1xf32>
    %c250_i32 = arith.constant 250 : i32
    %526 = tpu.dynamic_rotate %257 by %c250_i32 dim 1 : vector<8x256xf32>, i32 -> vector<8x256xf32>
    %527 = vector.broadcast %525 : vector<8x1xf32> to vector<8x256xf32>
    %528 = arith.mulf %526, %527 : vector<8x256xf32>
    %cst_208 = arith.constant 0.000000e+00 : f32
    %529 = vector.broadcast %cst_208 : f32 to vector<8x256xf32>
    %530 = arith.select %292, %528, %529 : vector<8x256xi1>, vector<8x256xf32>
    %531 = arith.addf %523, %530 : vector<8x256xf32>
    %c27 = arith.constant 27 : index
    %c0_209 = arith.constant 0 : index
    %c0_210 = arith.constant 0 : index
    %532 = vector.load %arg6[%c27, %c0_209, %c0_210] : memref<49x8x1xf32, #tpu.memory_space<vmem>>, vector<1x8x1xf32>
    %533 = vector.shape_cast %532 : vector<1x8x1xf32> to vector<8x1xf32>
    %c247_i32 = arith.constant 247 : i32
    %534 = tpu.dynamic_rotate %257 by %c247_i32 dim 1 : vector<8x256xf32>, i32 -> vector<8x256xf32>
    %535 = vector.broadcast %533 : vector<8x1xf32> to vector<8x256xf32>
    %536 = arith.mulf %534, %535 : vector<8x256xf32>
    %cst_211 = arith.constant 0.000000e+00 : f32
    %537 = vector.broadcast %cst_211 : f32 to vector<8x256xf32>
    %538 = arith.select %299, %536, %537 : vector<8x256xi1>, vector<8x256xf32>
    %539 = arith.addf %531, %538 : vector<8x256xf32>
    %540 = arith.addf %487, %539 : vector<8x256xf32>
    %c28 = arith.constant 28 : index
    %c0_212 = arith.constant 0 : index
    %c0_213 = arith.constant 0 : index
    %541 = vector.load %arg6[%c28, %c0_212, %c0_213] : memref<49x8x1xf32, #tpu.memory_space<vmem>>, vector<1x8x1xf32>
    %542 = vector.shape_cast %541 : vector<1x8x1xf32> to vector<8x1xf32>
    %c217_i32 = arith.constant 217 : i32
    %543 = tpu.dynamic_rotate %257 by %c217_i32 dim 1 : vector<8x256xf32>, i32 -> vector<8x256xf32>
    %544 = vector.broadcast %542 : vector<8x1xf32> to vector<8x256xf32>
    %545 = arith.mulf %543, %544 : vector<8x256xf32>
    %cst_214 = arith.constant 0.000000e+00 : f32
    %546 = vector.broadcast %cst_214 : f32 to vector<8x256xf32>
    %547 = arith.select %264, %545, %546 : vector<8x256xi1>, vector<8x256xf32>
    %c29 = arith.constant 29 : index
    %c0_215 = arith.constant 0 : index
    %c0_216 = arith.constant 0 : index
    %548 = vector.load %arg6[%c29, %c0_215, %c0_216] : memref<49x8x1xf32, #tpu.memory_space<vmem>>, vector<1x8x1xf32>
    %549 = vector.shape_cast %548 : vector<1x8x1xf32> to vector<8x1xf32>
    %c214_i32 = arith.constant 214 : i32
    %550 = tpu.dynamic_rotate %257 by %c214_i32 dim 1 : vector<8x256xf32>, i32 -> vector<8x256xf32>
    %551 = vector.broadcast %549 : vector<8x1xf32> to vector<8x256xf32>
    %552 = arith.mulf %550, %551 : vector<8x256xf32>
    %cst_217 = arith.constant 0.000000e+00 : f32
    %553 = vector.broadcast %cst_217 : f32 to vector<8x256xf32>
    %554 = arith.select %271, %552, %553 : vector<8x256xi1>, vector<8x256xf32>
    %555 = arith.addf %547, %554 : vector<8x256xf32>
    %c30 = arith.constant 30 : index
    %c0_218 = arith.constant 0 : index
    %c0_219 = arith.constant 0 : index
    %556 = vector.load %arg6[%c30, %c0_218, %c0_219] : memref<49x8x1xf32, #tpu.memory_space<vmem>>, vector<1x8x1xf32>
    %557 = vector.shape_cast %556 : vector<1x8x1xf32> to vector<8x1xf32>
    %c211_i32 = arith.constant 211 : i32
    %558 = tpu.dynamic_rotate %257 by %c211_i32 dim 1 : vector<8x256xf32>, i32 -> vector<8x256xf32>
    %559 = vector.broadcast %557 : vector<8x1xf32> to vector<8x256xf32>
    %560 = arith.mulf %558, %559 : vector<8x256xf32>
    %cst_220 = arith.constant 0.000000e+00 : f32
    %561 = vector.broadcast %cst_220 : f32 to vector<8x256xf32>
    %562 = arith.select %278, %560, %561 : vector<8x256xi1>, vector<8x256xf32>
    %563 = arith.addf %555, %562 : vector<8x256xf32>
    %c31 = arith.constant 31 : index
    %c0_221 = arith.constant 0 : index
    %c0_222 = arith.constant 0 : index
    %564 = vector.load %arg6[%c31, %c0_221, %c0_222] : memref<49x8x1xf32, #tpu.memory_space<vmem>>, vector<1x8x1xf32>
    %565 = vector.shape_cast %564 : vector<1x8x1xf32> to vector<8x1xf32>
    %c208_i32 = arith.constant 208 : i32
    %566 = tpu.dynamic_rotate %257 by %c208_i32 dim 1 : vector<8x256xf32>, i32 -> vector<8x256xf32>
    %567 = vector.broadcast %565 : vector<8x1xf32> to vector<8x256xf32>
    %568 = arith.mulf %566, %567 : vector<8x256xf32>
    %569 = arith.addf %563, %568 : vector<8x256xf32>
    %c32 = arith.constant 32 : index
    %c0_223 = arith.constant 0 : index
    %c0_224 = arith.constant 0 : index
    %570 = vector.load %arg6[%c32, %c0_223, %c0_224] : memref<49x8x1xf32, #tpu.memory_space<vmem>>, vector<1x8x1xf32>
    %571 = vector.shape_cast %570 : vector<1x8x1xf32> to vector<8x1xf32>
    %c205_i32 = arith.constant 205 : i32
    %572 = tpu.dynamic_rotate %257 by %c205_i32 dim 1 : vector<8x256xf32>, i32 -> vector<8x256xf32>
    %573 = vector.broadcast %571 : vector<8x1xf32> to vector<8x256xf32>
    %574 = arith.mulf %572, %573 : vector<8x256xf32>
    %cst_225 = arith.constant 0.000000e+00 : f32
    %575 = vector.broadcast %cst_225 : f32 to vector<8x256xf32>
    %576 = arith.select %285, %574, %575 : vector<8x256xi1>, vector<8x256xf32>
    %577 = arith.addf %569, %576 : vector<8x256xf32>
    %c33 = arith.constant 33 : index
    %c0_226 = arith.constant 0 : index
    %c0_227 = arith.constant 0 : index
    %578 = vector.load %arg6[%c33, %c0_226, %c0_227] : memref<49x8x1xf32, #tpu.memory_space<vmem>>, vector<1x8x1xf32>
    %579 = vector.shape_cast %578 : vector<1x8x1xf32> to vector<8x1xf32>
    %c202_i32 = arith.constant 202 : i32
    %580 = tpu.dynamic_rotate %257 by %c202_i32 dim 1 : vector<8x256xf32>, i32 -> vector<8x256xf32>
    %581 = vector.broadcast %579 : vector<8x1xf32> to vector<8x256xf32>
    %582 = arith.mulf %580, %581 : vector<8x256xf32>
    %cst_228 = arith.constant 0.000000e+00 : f32
    %583 = vector.broadcast %cst_228 : f32 to vector<8x256xf32>
    %584 = arith.select %292, %582, %583 : vector<8x256xi1>, vector<8x256xf32>
    %585 = arith.addf %577, %584 : vector<8x256xf32>
    %c34 = arith.constant 34 : index
    %c0_229 = arith.constant 0 : index
    %c0_230 = arith.constant 0 : index
    %586 = vector.load %arg6[%c34, %c0_229, %c0_230] : memref<49x8x1xf32, #tpu.memory_space<vmem>>, vector<1x8x1xf32>
    %587 = vector.shape_cast %586 : vector<1x8x1xf32> to vector<8x1xf32>
    %c199_i32 = arith.constant 199 : i32
    %588 = tpu.dynamic_rotate %257 by %c199_i32 dim 1 : vector<8x256xf32>, i32 -> vector<8x256xf32>
    %589 = vector.broadcast %587 : vector<8x1xf32> to vector<8x256xf32>
    %590 = arith.mulf %588, %589 : vector<8x256xf32>
    %cst_231 = arith.constant 0.000000e+00 : f32
    %591 = vector.broadcast %cst_231 : f32 to vector<8x256xf32>
    %592 = arith.select %299, %590, %591 : vector<8x256xi1>, vector<8x256xf32>
    %593 = arith.addf %585, %592 : vector<8x256xf32>
    %c-3_i32_232 = arith.constant -3 : i32
    %594 = vector.broadcast %c-3_i32_232 : i32 to vector<1x256xi32>
    %595 = arith.cmpi sge, %1, %594 : vector<1x256xi32>
    %c13_i32_233 = arith.constant 13 : i32
    %596 = vector.broadcast %c13_i32_233 : i32 to vector<1x256xi32>
    %597 = arith.cmpi slt, %1, %596 : vector<1x256xi32>
    %598 = arith.andi %595, %597 : vector<1x256xi1>
    %cst_234 = arith.constant 0.000000e+00 : f32
    %599 = vector.shape_cast %598 : vector<1x256xi1> to vector<1x256xi1>
    %600 = vector.broadcast %599 : vector<1x256xi1> to vector<8x256xi1>
    %601 = vector.broadcast %cst_234 : f32 to vector<8x256xf32>
    %602 = arith.select %600, %593, %601 : vector<8x256xi1>, vector<8x256xf32>
    %603 = arith.addf %540, %602 : vector<8x256xf32>
    %c35 = arith.constant 35 : index
    %c0_235 = arith.constant 0 : index
    %c0_236 = arith.constant 0 : index
    %604 = vector.load %arg6[%c35, %c0_235, %c0_236] : memref<49x8x1xf32, #tpu.memory_space<vmem>>, vector<1x8x1xf32>
    %605 = vector.shape_cast %604 : vector<1x8x1xf32> to vector<8x1xf32>
    %c169_i32 = arith.constant 169 : i32
    %606 = tpu.dynamic_rotate %257 by %c169_i32 dim 1 : vector<8x256xf32>, i32 -> vector<8x256xf32>
    %607 = vector.broadcast %605 : vector<8x1xf32> to vector<8x256xf32>
    %608 = arith.mulf %606, %607 : vector<8x256xf32>
    %cst_237 = arith.constant 0.000000e+00 : f32
    %609 = vector.broadcast %cst_237 : f32 to vector<8x256xf32>
    %610 = arith.select %264, %608, %609 : vector<8x256xi1>, vector<8x256xf32>
    %c36 = arith.constant 36 : index
    %c0_238 = arith.constant 0 : index
    %c0_239 = arith.constant 0 : index
    %611 = vector.load %arg6[%c36, %c0_238, %c0_239] : memref<49x8x1xf32, #tpu.memory_space<vmem>>, vector<1x8x1xf32>
    %612 = vector.shape_cast %611 : vector<1x8x1xf32> to vector<8x1xf32>
    %c166_i32 = arith.constant 166 : i32
    %613 = tpu.dynamic_rotate %257 by %c166_i32 dim 1 : vector<8x256xf32>, i32 -> vector<8x256xf32>
    %614 = vector.broadcast %612 : vector<8x1xf32> to vector<8x256xf32>
    %615 = arith.mulf %613, %614 : vector<8x256xf32>
    %cst_240 = arith.constant 0.000000e+00 : f32
    %616 = vector.broadcast %cst_240 : f32 to vector<8x256xf32>
    %617 = arith.select %271, %615, %616 : vector<8x256xi1>, vector<8x256xf32>
    %618 = arith.addf %610, %617 : vector<8x256xf32>
    %c37 = arith.constant 37 : index
    %c0_241 = arith.constant 0 : index
    %c0_242 = arith.constant 0 : index
    %619 = vector.load %arg6[%c37, %c0_241, %c0_242] : memref<49x8x1xf32, #tpu.memory_space<vmem>>, vector<1x8x1xf32>
    %620 = vector.shape_cast %619 : vector<1x8x1xf32> to vector<8x1xf32>
    %c163_i32 = arith.constant 163 : i32
    %621 = tpu.dynamic_rotate %257 by %c163_i32 dim 1 : vector<8x256xf32>, i32 -> vector<8x256xf32>
    %622 = vector.broadcast %620 : vector<8x1xf32> to vector<8x256xf32>
    %623 = arith.mulf %621, %622 : vector<8x256xf32>
    %cst_243 = arith.constant 0.000000e+00 : f32
    %624 = vector.broadcast %cst_243 : f32 to vector<8x256xf32>
    %625 = arith.select %278, %623, %624 : vector<8x256xi1>, vector<8x256xf32>
    %626 = arith.addf %618, %625 : vector<8x256xf32>
    %c38 = arith.constant 38 : index
    %c0_244 = arith.constant 0 : index
    %c0_245 = arith.constant 0 : index
    %627 = vector.load %arg6[%c38, %c0_244, %c0_245] : memref<49x8x1xf32, #tpu.memory_space<vmem>>, vector<1x8x1xf32>
    %628 = vector.shape_cast %627 : vector<1x8x1xf32> to vector<8x1xf32>
    %c160_i32 = arith.constant 160 : i32
    %629 = tpu.dynamic_rotate %257 by %c160_i32 dim 1 : vector<8x256xf32>, i32 -> vector<8x256xf32>
    %630 = vector.broadcast %628 : vector<8x1xf32> to vector<8x256xf32>
    %631 = arith.mulf %629, %630 : vector<8x256xf32>
    %632 = arith.addf %626, %631 : vector<8x256xf32>
    %c39 = arith.constant 39 : index
    %c0_246 = arith.constant 0 : index
    %c0_247 = arith.constant 0 : index
    %633 = vector.load %arg6[%c39, %c0_246, %c0_247] : memref<49x8x1xf32, #tpu.memory_space<vmem>>, vector<1x8x1xf32>
    %634 = vector.shape_cast %633 : vector<1x8x1xf32> to vector<8x1xf32>
    %c157_i32 = arith.constant 157 : i32
    %635 = tpu.dynamic_rotate %257 by %c157_i32 dim 1 : vector<8x256xf32>, i32 -> vector<8x256xf32>
    %636 = vector.broadcast %634 : vector<8x1xf32> to vector<8x256xf32>
    %637 = arith.mulf %635, %636 : vector<8x256xf32>
    %cst_248 = arith.constant 0.000000e+00 : f32
    %638 = vector.broadcast %cst_248 : f32 to vector<8x256xf32>
    %639 = arith.select %285, %637, %638 : vector<8x256xi1>, vector<8x256xf32>
    %640 = arith.addf %632, %639 : vector<8x256xf32>
    %c40 = arith.constant 40 : index
    %c0_249 = arith.constant 0 : index
    %c0_250 = arith.constant 0 : index
    %641 = vector.load %arg6[%c40, %c0_249, %c0_250] : memref<49x8x1xf32, #tpu.memory_space<vmem>>, vector<1x8x1xf32>
    %642 = vector.shape_cast %641 : vector<1x8x1xf32> to vector<8x1xf32>
    %c154_i32 = arith.constant 154 : i32
    %643 = tpu.dynamic_rotate %257 by %c154_i32 dim 1 : vector<8x256xf32>, i32 -> vector<8x256xf32>
    %644 = vector.broadcast %642 : vector<8x1xf32> to vector<8x256xf32>
    %645 = arith.mulf %643, %644 : vector<8x256xf32>
    %cst_251 = arith.constant 0.000000e+00 : f32
    %646 = vector.broadcast %cst_251 : f32 to vector<8x256xf32>
    %647 = arith.select %292, %645, %646 : vector<8x256xi1>, vector<8x256xf32>
    %648 = arith.addf %640, %647 : vector<8x256xf32>
    %c41 = arith.constant 41 : index
    %c0_252 = arith.constant 0 : index
    %c0_253 = arith.constant 0 : index
    %649 = vector.load %arg6[%c41, %c0_252, %c0_253] : memref<49x8x1xf32, #tpu.memory_space<vmem>>, vector<1x8x1xf32>
    %650 = vector.shape_cast %649 : vector<1x8x1xf32> to vector<8x1xf32>
    %c151_i32 = arith.constant 151 : i32
    %651 = tpu.dynamic_rotate %257 by %c151_i32 dim 1 : vector<8x256xf32>, i32 -> vector<8x256xf32>
    %652 = vector.broadcast %650 : vector<8x1xf32> to vector<8x256xf32>
    %653 = arith.mulf %651, %652 : vector<8x256xf32>
    %cst_254 = arith.constant 0.000000e+00 : f32
    %654 = vector.broadcast %cst_254 : f32 to vector<8x256xf32>
    %655 = arith.select %299, %653, %654 : vector<8x256xi1>, vector<8x256xf32>
    %656 = arith.addf %648, %655 : vector<8x256xf32>
    %c-6_i32_255 = arith.constant -6 : i32
    %657 = vector.broadcast %c-6_i32_255 : i32 to vector<1x256xi32>
    %658 = arith.cmpi sge, %1, %657 : vector<1x256xi32>
    %c10_i32_256 = arith.constant 10 : i32
    %659 = vector.broadcast %c10_i32_256 : i32 to vector<1x256xi32>
    %660 = arith.cmpi slt, %1, %659 : vector<1x256xi32>
    %661 = arith.andi %658, %660 : vector<1x256xi1>
    %cst_257 = arith.constant 0.000000e+00 : f32
    %662 = vector.shape_cast %661 : vector<1x256xi1> to vector<1x256xi1>
    %663 = vector.broadcast %662 : vector<1x256xi1> to vector<8x256xi1>
    %664 = vector.broadcast %cst_257 : f32 to vector<8x256xf32>
    %665 = arith.select %663, %656, %664 : vector<8x256xi1>, vector<8x256xf32>
    %666 = arith.addf %603, %665 : vector<8x256xf32>
    %c42 = arith.constant 42 : index
    %c0_258 = arith.constant 0 : index
    %c0_259 = arith.constant 0 : index
    %667 = vector.load %arg6[%c42, %c0_258, %c0_259] : memref<49x8x1xf32, #tpu.memory_space<vmem>>, vector<1x8x1xf32>
    %668 = vector.shape_cast %667 : vector<1x8x1xf32> to vector<8x1xf32>
    %c121_i32 = arith.constant 121 : i32
    %669 = tpu.dynamic_rotate %257 by %c121_i32 dim 1 : vector<8x256xf32>, i32 -> vector<8x256xf32>
    %670 = vector.broadcast %668 : vector<8x1xf32> to vector<8x256xf32>
    %671 = arith.mulf %669, %670 : vector<8x256xf32>
    %cst_260 = arith.constant 0.000000e+00 : f32
    %672 = vector.broadcast %cst_260 : f32 to vector<8x256xf32>
    %673 = arith.select %264, %671, %672 : vector<8x256xi1>, vector<8x256xf32>
    %c43 = arith.constant 43 : index
    %c0_261 = arith.constant 0 : index
    %c0_262 = arith.constant 0 : index
    %674 = vector.load %arg6[%c43, %c0_261, %c0_262] : memref<49x8x1xf32, #tpu.memory_space<vmem>>, vector<1x8x1xf32>
    %675 = vector.shape_cast %674 : vector<1x8x1xf32> to vector<8x1xf32>
    %c118_i32 = arith.constant 118 : i32
    %676 = tpu.dynamic_rotate %257 by %c118_i32 dim 1 : vector<8x256xf32>, i32 -> vector<8x256xf32>
    %677 = vector.broadcast %675 : vector<8x1xf32> to vector<8x256xf32>
    %678 = arith.mulf %676, %677 : vector<8x256xf32>
    %cst_263 = arith.constant 0.000000e+00 : f32
    %679 = vector.broadcast %cst_263 : f32 to vector<8x256xf32>
    %680 = arith.select %271, %678, %679 : vector<8x256xi1>, vector<8x256xf32>
    %681 = arith.addf %673, %680 : vector<8x256xf32>
    %c44 = arith.constant 44 : index
    %c0_264 = arith.constant 0 : index
    %c0_265 = arith.constant 0 : index
    %682 = vector.load %arg6[%c44, %c0_264, %c0_265] : memref<49x8x1xf32, #tpu.memory_space<vmem>>, vector<1x8x1xf32>
    %683 = vector.shape_cast %682 : vector<1x8x1xf32> to vector<8x1xf32>
    %c115_i32 = arith.constant 115 : i32
    %684 = tpu.dynamic_rotate %257 by %c115_i32 dim 1 : vector<8x256xf32>, i32 -> vector<8x256xf32>
    %685 = vector.broadcast %683 : vector<8x1xf32> to vector<8x256xf32>
    %686 = arith.mulf %684, %685 : vector<8x256xf32>
    %cst_266 = arith.constant 0.000000e+00 : f32
    %687 = vector.broadcast %cst_266 : f32 to vector<8x256xf32>
    %688 = arith.select %278, %686, %687 : vector<8x256xi1>, vector<8x256xf32>
    %689 = arith.addf %681, %688 : vector<8x256xf32>
    %c45 = arith.constant 45 : index
    %c0_267 = arith.constant 0 : index
    %c0_268 = arith.constant 0 : index
    %690 = vector.load %arg6[%c45, %c0_267, %c0_268] : memref<49x8x1xf32, #tpu.memory_space<vmem>>, vector<1x8x1xf32>
    %691 = vector.shape_cast %690 : vector<1x8x1xf32> to vector<8x1xf32>
    %c112_i32 = arith.constant 112 : i32
    %692 = tpu.dynamic_rotate %257 by %c112_i32 dim 1 : vector<8x256xf32>, i32 -> vector<8x256xf32>
    %693 = vector.broadcast %691 : vector<8x1xf32> to vector<8x256xf32>
    %694 = arith.mulf %692, %693 : vector<8x256xf32>
    %695 = arith.addf %689, %694 : vector<8x256xf32>
    %c46 = arith.constant 46 : index
    %c0_269 = arith.constant 0 : index
    %c0_270 = arith.constant 0 : index
    %696 = vector.load %arg6[%c46, %c0_269, %c0_270] : memref<49x8x1xf32, #tpu.memory_space<vmem>>, vector<1x8x1xf32>
    %697 = vector.shape_cast %696 : vector<1x8x1xf32> to vector<8x1xf32>
    %c109_i32 = arith.constant 109 : i32
    %698 = tpu.dynamic_rotate %257 by %c109_i32 dim 1 : vector<8x256xf32>, i32 -> vector<8x256xf32>
    %699 = vector.broadcast %697 : vector<8x1xf32> to vector<8x256xf32>
    %700 = arith.mulf %698, %699 : vector<8x256xf32>
    %cst_271 = arith.constant 0.000000e+00 : f32
    %701 = vector.broadcast %cst_271 : f32 to vector<8x256xf32>
    %702 = arith.select %285, %700, %701 : vector<8x256xi1>, vector<8x256xf32>
    %703 = arith.addf %695, %702 : vector<8x256xf32>
    %c47 = arith.constant 47 : index
    %c0_272 = arith.constant 0 : index
    %c0_273 = arith.constant 0 : index
    %704 = vector.load %arg6[%c47, %c0_272, %c0_273] : memref<49x8x1xf32, #tpu.memory_space<vmem>>, vector<1x8x1xf32>
    %705 = vector.shape_cast %704 : vector<1x8x1xf32> to vector<8x1xf32>
    %c106_i32 = arith.constant 106 : i32
    %706 = tpu.dynamic_rotate %257 by %c106_i32 dim 1 : vector<8x256xf32>, i32 -> vector<8x256xf32>
    %707 = vector.broadcast %705 : vector<8x1xf32> to vector<8x256xf32>
    %708 = arith.mulf %706, %707 : vector<8x256xf32>
    %cst_274 = arith.constant 0.000000e+00 : f32
    %709 = vector.broadcast %cst_274 : f32 to vector<8x256xf32>
    %710 = arith.select %292, %708, %709 : vector<8x256xi1>, vector<8x256xf32>
    %711 = arith.addf %703, %710 : vector<8x256xf32>
    %c48 = arith.constant 48 : index
    %c0_275 = arith.constant 0 : index
    %c0_276 = arith.constant 0 : index
    %712 = vector.load %arg6[%c48, %c0_275, %c0_276] : memref<49x8x1xf32, #tpu.memory_space<vmem>>, vector<1x8x1xf32>
    %713 = vector.shape_cast %712 : vector<1x8x1xf32> to vector<8x1xf32>
    %c103_i32 = arith.constant 103 : i32
    %714 = tpu.dynamic_rotate %257 by %c103_i32 dim 1 : vector<8x256xf32>, i32 -> vector<8x256xf32>
    %715 = vector.broadcast %713 : vector<8x1xf32> to vector<8x256xf32>
    %716 = arith.mulf %714, %715 : vector<8x256xf32>
    %cst_277 = arith.constant 0.000000e+00 : f32
    %717 = vector.broadcast %cst_277 : f32 to vector<8x256xf32>
    %718 = arith.select %299, %716, %717 : vector<8x256xi1>, vector<8x256xf32>
    %719 = arith.addf %711, %718 : vector<8x256xf32>
    %c-9_i32_278 = arith.constant -9 : i32
    %720 = vector.broadcast %c-9_i32_278 : i32 to vector<1x256xi32>
    %721 = arith.cmpi sge, %1, %720 : vector<1x256xi32>
    %c7_i32_279 = arith.constant 7 : i32
    %722 = vector.broadcast %c7_i32_279 : i32 to vector<1x256xi32>
    %723 = arith.cmpi slt, %1, %722 : vector<1x256xi32>
    %724 = arith.andi %721, %723 : vector<1x256xi1>
    %cst_280 = arith.constant 0.000000e+00 : f32
    %725 = vector.shape_cast %724 : vector<1x256xi1> to vector<1x256xi1>
    %726 = vector.broadcast %725 : vector<1x256xi1> to vector<8x256xi1>
    %727 = vector.broadcast %cst_280 : f32 to vector<8x256xf32>
    %728 = arith.select %726, %719, %727 : vector<8x256xi1>, vector<8x256xf32>
    %729 = arith.addf %666, %728 : vector<8x256xf32>
    %c0_281 = arith.constant 0 : index
    %c0_282 = arith.constant 0 : index
    %730 = vector.load %arg7[%c0_281, %c0_282] : memref<8x1xf32, #tpu.memory_space<vmem>>, vector<8x1xf32>
    %731 = vector.broadcast %730 : vector<8x1xf32> to vector<8x256xf32>
    %732 = arith.addf %729, %731 : vector<8x256xf32>
    %c0_283 = arith.constant 0 : index
    %c0_284 = arith.constant 0 : index
    %c0_285 = arith.constant 0 : index
    %733 = vector.load %arg8[%c0_283, %c0_284, %c0_285] : memref<4x8x1xf32, #tpu.memory_space<vmem>>, vector<1x8x1xf32>
    %734 = vector.shape_cast %733 : vector<1x8x1xf32> to vector<8x1xf32>
    %735 = vector.broadcast %734 : vector<8x1xf32> to vector<8x256xf32>
    %736 = arith.mulf %732, %735 : vector<8x256xf32>
    %c0_286 = arith.constant 0 : index
    %c0_287 = arith.constant 0 : index
    %737 = vector.load %arg10[%c0_286, %c0_287] : memref<8x1xf32, #tpu.memory_space<vmem>>, vector<8x1xf32>
    %738 = vector.broadcast %737 : vector<8x1xf32> to vector<8x256xf32>
    %739 = arith.addf %736, %738 : vector<8x256xf32>
    %c7_i32_288 = arith.constant 7 : i32
    %740 = tpu.dynamic_rotate %732 by %c7_i32_288 dim 0 : vector<8x256xf32>, i32 -> vector<8x256xf32>
    %c3_i32_289 = arith.constant 3 : i32
    %741 = tpu.dynamic_rotate %732 by %c3_i32_289 dim 0 : vector<8x256xf32>, i32 -> vector<8x256xf32>
    %c1_290 = arith.constant 1 : index
    %c0_291 = arith.constant 0 : index
    %c0_292 = arith.constant 0 : index
    %742 = vector.load %arg8[%c1_290, %c0_291, %c0_292] : memref<4x8x1xf32, #tpu.memory_space<vmem>>, vector<1x8x1xf32>
    %743 = vector.shape_cast %742 : vector<1x8x1xf32> to vector<8x1xf32>
    %744 = vector.broadcast %743 : vector<8x1xf32> to vector<8x256xf32>
    %745 = arith.mulf %740, %744 : vector<8x256xf32>
    %746 = arith.addf %739, %745 : vector<8x256xf32>
    %c1_293 = arith.constant 1 : index
    %c0_294 = arith.constant 0 : index
    %c0_295 = arith.constant 0 : index
    %747 = vector.load %arg9[%c1_293, %c0_294, %c0_295] : memref<4x8x1xf32, #tpu.memory_space<vmem>>, vector<1x8x1xf32>
    %748 = vector.shape_cast %747 : vector<1x8x1xf32> to vector<8x1xf32>
    %749 = vector.broadcast %748 : vector<8x1xf32> to vector<8x256xf32>
    %750 = arith.mulf %741, %749 : vector<8x256xf32>
    %751 = arith.addf %746, %750 : vector<8x256xf32>
    %c6_i32_296 = arith.constant 6 : i32
    %752 = tpu.dynamic_rotate %732 by %c6_i32_296 dim 0 : vector<8x256xf32>, i32 -> vector<8x256xf32>
    %c2_i32_297 = arith.constant 2 : i32
    %753 = tpu.dynamic_rotate %732 by %c2_i32_297 dim 0 : vector<8x256xf32>, i32 -> vector<8x256xf32>
    %c2_298 = arith.constant 2 : index
    %c0_299 = arith.constant 0 : index
    %c0_300 = arith.constant 0 : index
    %754 = vector.load %arg8[%c2_298, %c0_299, %c0_300] : memref<4x8x1xf32, #tpu.memory_space<vmem>>, vector<1x8x1xf32>
    %755 = vector.shape_cast %754 : vector<1x8x1xf32> to vector<8x1xf32>
    %756 = vector.broadcast %755 : vector<8x1xf32> to vector<8x256xf32>
    %757 = arith.mulf %752, %756 : vector<8x256xf32>
    %758 = arith.addf %751, %757 : vector<8x256xf32>
    %c2_301 = arith.constant 2 : index
    %c0_302 = arith.constant 0 : index
    %c0_303 = arith.constant 0 : index
    %759 = vector.load %arg9[%c2_301, %c0_302, %c0_303] : memref<4x8x1xf32, #tpu.memory_space<vmem>>, vector<1x8x1xf32>
    %760 = vector.shape_cast %759 : vector<1x8x1xf32> to vector<8x1xf32>
    %761 = vector.broadcast %760 : vector<8x1xf32> to vector<8x256xf32>
    %762 = arith.mulf %753, %761 : vector<8x256xf32>
    %763 = arith.addf %758, %762 : vector<8x256xf32>
    %c5_i32 = arith.constant 5 : i32
    %764 = tpu.dynamic_rotate %732 by %c5_i32 dim 0 : vector<8x256xf32>, i32 -> vector<8x256xf32>
    %c1_i32_304 = arith.constant 1 : i32
    %765 = tpu.dynamic_rotate %732 by %c1_i32_304 dim 0 : vector<8x256xf32>, i32 -> vector<8x256xf32>
    %c3_305 = arith.constant 3 : index
    %c0_306 = arith.constant 0 : index
    %c0_307 = arith.constant 0 : index
    %766 = vector.load %arg8[%c3_305, %c0_306, %c0_307] : memref<4x8x1xf32, #tpu.memory_space<vmem>>, vector<1x8x1xf32>
    %767 = vector.shape_cast %766 : vector<1x8x1xf32> to vector<8x1xf32>
    %768 = vector.broadcast %767 : vector<8x1xf32> to vector<8x256xf32>
    %769 = arith.mulf %764, %768 : vector<8x256xf32>
    %770 = arith.addf %763, %769 : vector<8x256xf32>
    %c3_308 = arith.constant 3 : index
    %c0_309 = arith.constant 0 : index
    %c0_310 = arith.constant 0 : index
    %771 = vector.load %arg9[%c3_308, %c0_309, %c0_310] : memref<4x8x1xf32, #tpu.memory_space<vmem>>, vector<1x8x1xf32>
    %772 = vector.shape_cast %771 : vector<1x8x1xf32> to vector<8x1xf32>
    %773 = vector.broadcast %772 : vector<8x1xf32> to vector<8x256xf32>
    %774 = arith.mulf %765, %773 : vector<8x256xf32>
    %775 = arith.addf %770, %774 : vector<8x256xf32>
    %776 = arith.mulf %0, %775 : vector<8x256xf32>
    %c0_311 = arith.constant 0 : index
    %c0_312 = arith.constant 0 : index
    %777 = vector.load %arg11[%c0_311, %c0_312] : memref<8x256xf32, #tpu.memory_space<vmem>>, vector<8x256xf32>
    tpu.vector_store %arg11[%c0_311, %c0_312], %776 {strides = array<i32>} : memref<8x256xf32, #tpu.memory_space<vmem>>, vector<8x256xf32>,
    return
  }
  func.func @transform_0(%arg0: i32) -> (i32, i32) {
    %c0_i32 = arith.constant 0 : i32
    %c0_i32_0 = arith.constant 0 : i32
    return %arg0, %c0_i32 : i32, i32
  }
  func.func @transform_1(%arg0: i32) -> (i32, i32) {
    %c0_i32 = arith.constant 0 : i32
    %c0_i32_0 = arith.constant 0 : i32
    %c0_i32_1 = arith.constant 0 : i32
    return %c0_i32, %c0_i32_0 : i32, i32
  }
  func.func @transform_2(%arg0: i32) -> (i32, i32) {
    %c0_i32 = arith.constant 0 : i32
    %c0_i32_0 = arith.constant 0 : i32
    %c0_i32_1 = arith.constant 0 : i32
    return %c0_i32, %c0_i32_0 : i32, i32
  }
  func.func @transform_3(%arg0: i32) -> (i32, i32, i32) {
    %c0_i32 = arith.constant 0 : i32
    %c0_i32_0 = arith.constant 0 : i32
    %c0_i32_1 = arith.constant 0 : i32
    %c0_i32_2 = arith.constant 0 : i32
    return %c0_i32, %c0_i32_0, %c0_i32_1 : i32, i32, i32
  }
  func.func @transform_4(%arg0: i32) -> (i32, i32) {
    %c0_i32 = arith.constant 0 : i32
    %c0_i32_0 = arith.constant 0 : i32
    %c0_i32_1 = arith.constant 0 : i32
    return %c0_i32, %c0_i32_0 : i32, i32
  }
  func.func @transform_5(%arg0: i32) -> (i32, i32, i32) {
    %c0_i32 = arith.constant 0 : i32
    %c0_i32_0 = arith.constant 0 : i32
    %c0_i32_1 = arith.constant 0 : i32
    %c0_i32_2 = arith.constant 0 : i32
    return %c0_i32, %c0_i32_0, %c0_i32_1 : i32, i32, i32
  }
  func.func @transform_6(%arg0: i32) -> (i32, i32) {
    %c0_i32 = arith.constant 0 : i32
    %c0_i32_0 = arith.constant 0 : i32
    %c0_i32_1 = arith.constant 0 : i32
    return %c0_i32, %c0_i32_0 : i32, i32
  }
  func.func @transform_7(%arg0: i32) -> (i32, i32, i32) {
    %c0_i32 = arith.constant 0 : i32
    %c0_i32_0 = arith.constant 0 : i32
    %c0_i32_1 = arith.constant 0 : i32
    %c0_i32_2 = arith.constant 0 : i32
    return %c0_i32, %c0_i32_0, %c0_i32_1 : i32, i32, i32
  }
  func.func @transform_8(%arg0: i32) -> (i32, i32, i32) {
    %c0_i32 = arith.constant 0 : i32
    %c0_i32_0 = arith.constant 0 : i32
    %c0_i32_1 = arith.constant 0 : i32
    %c0_i32_2 = arith.constant 0 : i32
    return %c0_i32, %c0_i32_0, %c0_i32_1 : i32, i32, i32
  }
  func.func @transform_9(%arg0: i32) -> (i32, i32) {
    %c0_i32 = arith.constant 0 : i32
    %c0_i32_0 = arith.constant 0 : i32
    %c0_i32_1 = arith.constant 0 : i32
    return %c0_i32, %c0_i32_0 : i32, i32
  }
  func.func @transform_10(%arg0: i32) -> (i32, i32) {
    %c0_i32 = arith.constant 0 : i32
    %c0_i32_0 = arith.constant 0 : i32
    return %arg0, %c0_i32 : i32, i32
  }
}

</mosaic_0001>

<bundles_post_ra>
// kernel: tpu_custom_call.1
= control target key start
LH: loop header
LB: loop body
LE: loop exit
PB: predicated region body
PF: predicated region fallthrough
CT: control target
= control target key end

     0   :  { %v3696_v3 = vmov 0   ;;  %s1967_s19 = smov 33   ;;  %s1968_s20 = smov 34   ;;  %s3682_s0 = inlined_call_operand.vmem [shape: f32[8,256], index: 0, kind: input, shape index: {}]   ;;  %s3683_s1 = inlined_call_operand.vmem [shape: s32[1,256], index: 1, kind: input, shape index: {}]   ;;  %s3684_s2 = inlined_call_operand.vmem [shape: s32[1,256], index: 2, kind: input, shape index: {}]   ;;  %s3685_s3 = inlined_call_operand.vmem [shape: f32[25,8,1], index: 3, kind: input, shape index: {}]   ;;  %s3686_s4 = inlined_call_operand.vmem [shape: f32[8,1], index: 4, kind: input, shape index: {}]   ;;  %s3687_s5 = inlined_call_operand.vmem [shape: f32[49,8,1], index: 5, kind: input, shape index: {}]   ;;  %s3688_s6 = inlined_call_operand.vmem [shape: f32[8,1], index: 6, kind: input, shape index: {}]   ;;  %s3689_s7 = inlined_call_operand.vmem [shape: f32[4,8,1], index: 7, kind: input, shape index: {}]   ;;  %s3690_s8 = inlined_call_operand.vmem [shape: f32[4,8,1], index: 8, kind: input, shape index: {}]   ;;  %s3691_s9 = inlined_call_operand.vmem [shape: f32[8,1], index: 9, kind: input, shape index: {}]   ;;  %s3692_s10 = inlined_call_operand.hbm [shape: f32[8,256], index: 10, kind: output, shape index: {}]  }
   0x1   :  { %v2094_v0 = vld [vmem:[%s3682_s0 + $0x8] sm:$0xff]  ;;  %v2099_v1 = vld [vmem:[%s3682_s0] sm:$0xff]  ;;  %1932 = vset.pattern.permute.xlu1 %v3696_v3 }
   0x2   :  { %v72_v2 = vld [vmem:[%s3685_s3] sm:$0xff]  ;;  %95 = vrot.lane.b32.xlu2 %v2094_v0, %s1967_s19  ;;  %73 = vrot.lane.b32.xlu0 %v2099_v1, %s1968_s20 }
   0x3   :  { %84 = vperm.xlu1 %1932, %v72_v2  }
   0x4   :  { %15 = vsyncpa [#allocation3], 0  ;;  %1933 = vset.pattern.permute.xlu2 %v3696_v3  ;;  %1934 = vset.pattern.permute.xlu0 %v3696_v3  ;;  %v1784_v4 = vld [vmem:[%s3685_s3 + $0x8] sm:$0xff]  ;;  %v1785_v5 = vld [vmem:[%s3685_s3 + $0x10] sm:$0xff]  ;;  %s1969_s25 = smov 32   ;;  %s1970_s28 = smov 31  }
   0x5   :  { %v1786_v6 = vld [vmem:[%s3685_s3 + $0x18] sm:$0xff]  ;;  %v1787_v7 = vld [vmem:[%s3685_s3 + $0x20] sm:$0xff]  ;;  %s1971_s11 = smov 30   ;;  %v1788_v8 = vld [vmem:[%s3685_s3 + $0x28] sm:$0xff]  ;;  %s1972_s14 = smov 18  }
   0x6   :  { %v1789_v9 = vld [vmem:[%s3685_s3 + $0x30] sm:$0xff]  ;;  %s1973_s17 = smov 17   ;;  %v1790_v10 = vld [vmem:[%s3685_s3 + $0x38] sm:$0xff]  ;;  %v1791_v11 = vld [vmem:[%s3685_s3 + $0x40] sm:$0xff]  ;;  %s1975_s23 = smov 15  }
   0x7   :  { %v1792_v12 = vld [vmem:[%s3685_s3 + $0x48] sm:$0xff]  ;;  %s1976_s27 = smov 14   ;;  %v1793_v13 = vld [vmem:[%s3685_s3 + $0x50] sm:$0xff]  ;;  %s1977_s30 = smov 2   ;;  %v1794_v14 = vld [vmem:[%s3685_s3 + $0x58] sm:$0xff] }
   0x8   :  { %s1978_s13 = smov 1   ;;  %v1795_v16 = vld [vmem:[%s3685_s3 + $0x60] sm:$0xff]  ;;  %s1979_s16 = smov 127   ;;  %v1796_v18 = vld [vmem:[%s3685_s3 + $0x68] sm:$0xff]  ;;  %v1797_v20 = vld [vmem:[%s3685_s3 + $0x70] sm:$0xff] }
   0x9   :  { %v1798_v24 = vld [vmem:[%s3685_s3 + $0x78] sm:$0xff]  ;;  %v1799_v28 = vld [vmem:[%s3685_s3 + $0x80] sm:$0xff]  ;;  %v1800_v32 = vld [vmem:[%s3685_s3 + $0x88] sm:$0xff]  ;;  %s1993_s24 = smov 19   ;;  %s1994_s12 = smov 13  }
   0xa   :  { %102 = vperm.xlu2 %1933, %v1784_v4   ;;  %75 = vrot.lane.b32.xlu0 %v2094_v0, %s1968_s20  ;;  %s1974_s20 = smov 16   ;;  %v1801_v36 = vld [vmem:[%s3685_s3 + $0x90] sm:$0xff]  ;;  %v1802_v40 = vld [vmem:[%s3685_s3 + $0x98] sm:$0xff]  ;;  %v1803_v44 = vld [vmem:[%s3685_s3 + $0xa0] sm:$0xff]  ;;  %s1997_s21 = smov 105  }
   0xb   :  { %93 = vrot.lane.b32.xlu1 %v2099_v1, %s1967_s19  ;;  %s1980_s19 = smov 126   ;;  %v1804_v48 = vld [vmem:[%s3685_s3 + $0xa8] sm:$0xff]  ;;  %v1805_v52 = vld [vmem:[%s3685_s3 + $0xb0] sm:$0xff]  ;;  %v1806_v55 = vld [vmem:[%s3685_s3 + $0xb8] sm:$0xff]  ;;  %s1998_s22 = smov 102  }
   0xc   :  { %v594_v59 = vld [vmem:[%s3686_s4] sm:$0xff]  ;;  %s1992_s4 = smov 22   ;;  %s2001_s26 = smov 122  }
   0xd   :  { %v1807_v60 = vld [vmem:[%s3685_s3 + $0xc0] sm:$0xff]  ;;  %s2003_s29 = smov 119   ;;  %s2010_s15 = smov 54  }
   0xe   :  { %v650_v2 = vld [vmem:[%s3687_s5] sm:$0xff]  ;;  %s2013_s18 = smov 77   ;;  %s2016_s3 = smov 45  }
  0x12   :  { %122 = vperm.xlu2 %1933, %v1785_v5   ;;  %113 = vrot.lane.b32.xlu0 %v2099_v1, %s1969_s25 }
  0x13   :  { %115 = vrot.lane.b32.xlu1 %v2094_v0, %s1969_s25 }
  0x1a   :  { %140 = vperm.xlu2 %1933, %v1786_v6   ;;  %131 = vrot.lane.b32.xlu0 %v2099_v1, %s1970_s28 }
  0x1b   :  { %133 = vrot.lane.b32.xlu1 %v2094_v0, %s1970_s28  ;;  %s2002_s28 = smov 93  }
  0x22   :  { %160 = vperm.xlu2 %1933, %v1787_v7   ;;  %151 = vrot.lane.b32.xlu0 %v2099_v1, %s1971_s11  ;;  %v1808_v7 = vld [vmem:[%s3687_s5 + $0x8] sm:$0xff] }
  0x23   :  { %153 = vrot.lane.b32.xlu1 %v2094_v0, %s1971_s11  ;;  %s1989_s11 = smov 95  }
  0x2a   :  { %190 = vperm.xlu2 %1933, %v1788_v8   ;;  %181 = vrot.lane.b32.xlu0 %v2099_v1, %s1972_s14 }
  0x2b   :  { %183 = vrot.lane.b32.xlu1 %v2094_v0, %s1972_s14  ;;  %s1990_s14 = smov 94  }
  0x32   :  { %208 = vperm.xlu2 %1933, %v1789_v9   ;;  %199 = vrot.lane.b32.xlu0 %v2099_v1, %s1973_s17 }
  0x33   :  { %201 = vrot.lane.b32.xlu1 %v2094_v0, %s1973_s17  ;;  %s1996_s17 = smov 7  }
  0x3a   :  { %228 = vperm.xlu2 %1933, %v1790_v10   ;;  %219 = vrot.lane.b32.xlu0 %v2099_v1, %s1974_s20  ;;  %v1809_v10 = vld [vmem:[%s3687_s5 + $0x10] sm:$0xff] }
  0x3b   :  { %221 = vrot.lane.b32.xlu1 %v2094_v0, %s1974_s20 }
  0x42   :  { %246 = vperm.xlu2 %1933, %v1791_v11   ;;  %237 = vrot.lane.b32.xlu0 %v2099_v1, %s1975_s23 }
  0x43   :  { %239 = vrot.lane.b32.xlu1 %v2094_v0, %s1975_s23  ;;  %s1981_s23 = smov 114  }
  0x4a   :  { %266 = vperm.xlu2 %1933, %v1792_v12   ;;  %257 = vrot.lane.b32.xlu0 %v2099_v1, %s1976_s27 }
  0x4b   :  { %259 = vrot.lane.b32.xlu1 %v2094_v0, %s1976_s27  ;;  %s1982_s27 = smov 113  }
  0x52   :  { %298 = vperm.xlu2 %1933, %v1793_v13   ;;  %289 = vrot.lane.b32.xlu0 %v2099_v1, %s1977_s30 }
  0x53   :  { %291 = vrot.lane.b32.xlu1 %v2094_v0, %s1977_s30  ;;  %s1983_s30 = smov 112  }
  0x5a   :  { %316 = vperm.xlu2 %1933, %v1794_v14   ;;  %307 = vrot.lane.b32.xlu0 %v2099_v1, %s1978_s13  ;;  %v1810_v14 = vld [vmem:[%s3687_s5 + $0x18] sm:$0xff] }
  0x5b   :  { %309 = vrot.lane.b32.xlu1 %v2094_v0, %s1978_s13  ;;  %s1984_s13 = smov 111  }
  0x5c   :  { %v2168_v15 = vpop.permute.xlu2 %95 }
  0x62   :  { %340 = vrot.lane.b32.xlu2 %v2094_v0, %s1979_s16  ;;  %329 = vperm.xlu0 %1934, %v1795_v16  }
  0x63   :  { %338 = vrot.lane.b32.xlu1 %v2099_v1, %s1979_s16  ;;  %s1985_s16 = smov 110  }
  0x64   :  { %v2175_v17 = vpop.permute.xlu2 %102 }
  0x6a   :  { %358 = vrot.lane.b32.xlu2 %v2099_v1, %s1980_s19  ;;  %360 = vrot.lane.b32.xlu0 %v2094_v0, %s1980_s19  ;;  %s1986_s19 = smov 98  }
  0x6b   :  { %347 = vperm.xlu1 %1932, %v1796_v18  }
  0x6c   :  { %v2182_v19 = vpop.permute.xlu2 %122 }
  0x72   :  { %380 = vrot.lane.b32.xlu2 %v2099_v1, %s1981_s23  ;;  %382 = vrot.lane.b32.xlu0 %v2094_v0, %s1981_s23  ;;  %s1987_s23 = smov 97  }
  0x73   :  { %367 = vperm.xlu1 %1932, %v1797_v20  }
  0x74   :  { %v2189_v21 = vpop.permute.xlu2 %140  ;;  %v2191_v22 = vpop.permute.xlu0 %73 }
  0x75   :  { %v2193_v23 = vpop.permute.xlu1 %84 }
  0x7a   :  { %398 = vrot.lane.b32.xlu2 %v2099_v1, %s1982_s27  ;;  %400 = vrot.lane.b32.xlu0 %v2094_v0, %s1982_s27  ;;  %s1988_s27 = smov 96  }
  0x7b   :  { %389 = vperm.xlu1 %1932, %v1798_v24   ;;  %v1811_v24 = vld [vmem:[%s3687_s5 + $0x20] sm:$0xff] }
  0x7c   :  { %v2200_v25 = vpop.permute.xlu2 %160  ;;  %v2202_v26 = vpop.permute.xlu0 %75 }
  0x7d   :  { %v2204_v27 = vpop.permute.xlu1 %93 }
  0x82   :  { %418 = vrot.lane.b32.xlu2 %v2099_v1, %s1983_s30  ;;  %420 = vrot.lane.b32.xlu0 %v2094_v0, %s1983_s30 }
  0x83   :  { %407 = vperm.xlu1 %1932, %v1799_v28   ;;  %v2348_v28 = vld [vmem:[%s3684_s2] sm:$0x3] }
  0x84   :  { %v2213_v29 = vpop.permute.xlu2 %190  ;;  %v2215_v30 = vpop.permute.xlu0 %113  ;;  %3723 = vst [vmem:[#allocation9_spill] sm:$0xff] %v2348_v28  ;;  %vm40_vm0 = vcmp.ge.s32.totalorder %v2348_v28, 2  ;;  %vm41_vm1 = vcmp.lt.s32.totalorder %v2348_v28, 18  ;;  %vm48_vm2 = vcmp.ge.s32.totalorder %v2348_v28, 1  ;;  %vm49_vm3 = vcmp.lt.s32.totalorder %v2348_v28, 17 }
  0x85   :  { %v2217_v31 = vpop.permute.xlu1 %115  ;;  %vm42_vm4 = vmand %vm40_vm0, %vm41_vm1  ;;  %vm56_vm5 = vcmp.ge.s32.totalorder %v2348_v28, 4294967295  ;;  %vm57_vm6 = vcmp.lt.s32.totalorder %v2348_v28, 15  ;;  %vm64_vm10 = vcmp.ge.s32.totalorder %v2348_v28, 4294967294  ;;  %vm65_vm11 = vcmp.lt.s32.totalorder %v2348_v28, 14 }
  0x86   :  { %vm50_vm7 = vmand %vm48_vm2, %vm49_vm3 }
  0x87   :  { %vm58_vm8 = vmand %vm56_vm5, %vm57_vm6 }
  0x88   :  { %vm66_vm13 = vmand %vm64_vm10, %vm65_vm11 }
  0x8a   :  { %436 = vrot.lane.b32.xlu2 %v2099_v1, %s1984_s13  ;;  %438 = vrot.lane.b32.xlu0 %v2094_v0, %s1984_s13  ;;  %s2007_s13 = smov 86  }
  0x8b   :  { %427 = vperm.xlu1 %1932, %v1800_v32  }
  0x8c   :  { %v2224_v33 = vpop.permute.xlu2 %208  ;;  %v2226_v34 = vpop.permute.xlu0 %131 }
  0x8d   :  { %v2228_v35 = vpop.permute.xlu1 %133 }
  0x92   :  { %456 = vrot.lane.b32.xlu2 %v2099_v1, %s1985_s16  ;;  %458 = vrot.lane.b32.xlu0 %v2094_v0, %s1985_s16  ;;  %s2011_s16 = smov 80  }
  0x93   :  { %445 = vperm.xlu1 %1932, %v1801_v36  }
  0x94   :  { %v2235_v37 = vpop.permute.xlu2 %228  ;;  %v2237_v38 = vpop.permute.xlu0 %151 }
  0x95   :  { %v2239_v39 = vpop.permute.xlu1 %153 }
  0x9a   :  { %488 = vrot.lane.b32.xlu2 %v2099_v1, %s1986_s19  ;;  %490 = vrot.lane.b32.xlu0 %v2094_v0, %s1986_s19  ;;  %s1991_s19 = smov 25  }
  0x9b   :  { %465 = vperm.xlu1 %1932, %v1802_v40  }
  0x9c   :  { %v2246_v41 = vpop.permute.xlu2 %246  ;;  %v2248_v42 = vpop.permute.xlu0 %181 }
  0x9d   :  { %v2250_v43 = vpop.permute.xlu1 %183 }
  0xa2   :  { %506 = vrot.lane.b32.xlu2 %v2099_v1, %s1987_s23  ;;  %508 = vrot.lane.b32.xlu0 %v2094_v0, %s1987_s23  ;;  %s1999_s23 = smov 99  }
  0xa3   :  { %497 = vperm.xlu1 %1932, %v1803_v44   ;;  %v77_v44 = vlaneseq }
  0xa4   :  { %v2257_v45 = vpop.permute.xlu0 %199  ;;  %v2261_v47 = vpop.permute.xlu2 %266 }
  0xa5   :  { %v2259_v46 = vpop.permute.xlu1 %201 }
  0xaa   :  { %526 = vrot.lane.b32.xlu2 %v2099_v1, %s1988_s27  ;;  %528 = vrot.lane.b32.xlu0 %v2094_v0, %s1988_s27 }
  0xab   :  { %515 = vperm.xlu1 %1932, %v1804_v48   ;;  %v1812_v48 = vld [vmem:[%s3687_s5 + $0x28] sm:$0xff] }
  0xac   :  { %v2270_v49 = vpop.permute.xlu0 %219  ;;  %v2274_v51 = vpop.permute.xlu2 %298 }
  0xad   :  { %v2272_v50 = vpop.permute.xlu1 %221 }
  0xb2   :  { %544 = vrot.lane.b32.xlu2 %v2099_v1, %s1989_s11  ;;  %546 = vrot.lane.b32.xlu0 %v2094_v0, %s1989_s11  ;;  %s2004_s11 = smov 90  }
  0xb3   :  { %535 = vperm.xlu1 %1932, %v1805_v52   ;;  %v2365_v52 = vand.u32 127, %v77_v44 }
  0xb4   :  { %v2281_v53 = vpop.permute.xlu0 %237  ;;  %v2288_v56 = vpop.permute.xlu2 %316 }
  0xb5   :  { %v2283_v54 = vpop.permute.xlu1 %239  ;;  %vm79_vm9 = vcmp.lt.s32.totalorder %v2365_v52, 34  ;;  %vm97_vm12 = vcmp.lt.s32.totalorder %v2365_v52, 33  ;;  %vm3710_vm1 = vcmp.lt.s32.totalorder %v2365_v52, 32  ;;  %vm135_vm3 = vcmp.lt.s32.totalorder %v2365_v52, 31 }
  0xb6   :  { %v99_v28 = vsel %vm97_vm12, %v2168_v15, %v2204_v27  ;;  %vm203_vm10 = vcmp.lt.s32.totalorder %v2365_v52, 17  ;;  %vm185_vm11 = vcmp.lt.s32.totalorder %v2365_v52, 18 }
  0xba   :  { %564 = vrot.lane.b32.xlu2 %v2099_v1, %s1990_s14  ;;  %566 = vrot.lane.b32.xlu0 %v2094_v0, %s1990_s14  ;;  %s2008_s14 = smov 57  }
  0xbb   :  { %553 = vperm.xlu1 %1932, %v1806_v55  }
  0xbc   :  { %v2292_v57 = vpop.permute.xlu0 %257  ;;  %v2302_v61 = vpop.permute.xlu2 %340 }
  0xbd   :  { %v2294_v58 = vpop.permute.xlu1 %259 }
  0xc2   :  { %597 = vperm.xlu2 %1933, %v594_v59  }
  0xc3   :  { %573 = vperm.xlu1 %1932, %v1807_v60   ;;  %v43_v60 = vsel %vm42_vm4, 1, %v3696_v3 }
  0xc4   :  { %v2304_v62 = vpop.permute.xlu0 %289  ;;  %v2315_v6 = vpop.permute.xlu2 %358  ;;  %v44_v44 = vperm.slane %v43_v60, 0 }
  0xc5   :  { %v2306_v63 = vpop.permute.xlu1 %291 }
  0xc6   :  { %vm2402_vm0 = vcmp.eq.s32.totalorder %v44_v44, 1 }
  0xca   :  { %660 = vperm.xlu2 %1933, %v650_v2   ;;  %v51_v2 = vsel %vm50_vm7, 1, %v3696_v3 }
  0xcc   :  { %v2311_v4 = vpop.permute.xlu0 %307  ;;  %v2327_v11 = vpop.permute.xlu2 %380 }
  0xcd   :  { %v2313_v5 = vpop.permute.xlu1 %309  ;;  %3719 = vst [vmem:[#allocation5_spill] sm:$0xff] %v2327_v11 }
  0xd2   :  { %678 = vperm.xlu2 %1933, %v1808_v7  }
  0xd4   :  { %v2320_v8 = vpop.permute.xlu0 %329  ;;  %v2336_v16 = vpop.permute.xlu2 %398 }
  0xd5   :  { %v2322_v9 = vpop.permute.xlu1 %338  ;;  %3720 = vst [vmem:[#allocation6_spill] sm:$0xff] %v2336_v16 }
  0xda   :  { %698 = vperm.xlu2 %1933, %v1809_v10   ;;  %v2379_v10 = vld [vmem:[%s3683_s1] sm:$0x3] }
  0xdb   :  { %vm169_vm14 = vcmp.ge.s32.totalorder %v2379_v10, 2  ;;  %vm170_vm15 = vcmp.lt.s32.totalorder %v2379_v10, 18 }
  0xdc   :  { %v2331_v13 = vpop.permute.xlu0 %360  ;;  %v2350_v32 = vpop.permute.xlu2 %418  ;;  %vm171_vm2 = vmand %vm169_vm14, %vm170_vm15  ;;  %vm223_vm14 = vcmp.lt.s32.totalorder %v2365_v52, 16  ;;  %vm261_vm15 = vcmp.lt.s32.totalorder %v2365_v52, 14 }
  0xdd   :  { %v2329_v12 = vpop.permute.xlu1 %347  ;;  %3724 = vst [vmem:[#allocation10_spill] sm:$0xff] %v2350_v32  ;;  %v81_v32 = vsel %vm79_vm9, %v2202_v26, %v2191_v22 }
  0xde   :  { %v87_v16 = vmul.f32 %v2193_v23, %v81_v32 }
  0xe2   :  { %717 = vperm.xlu2 %1933, %v1810_v14   ;;  %v1813_v14 = vld [vmem:[%s3687_s5 + $0x30] sm:$0xff] }
  0xe4   :  { %v2340_v20 = vpop.permute.xlu0 %382  ;;  %v2373_v7 = vpop.permute.xlu2 %436 }
  0xe5   :  { %v2338_v18 = vpop.permute.xlu1 %367  ;;  %3722 = vst [vmem:[#allocation8_spill] sm:$0xff] %v2340_v20 }
  0xe6   :  { %3721 = vst [vmem:[#allocation7_spill] sm:$0xff] %v2338_v18  ;;  %v1822_v18 = vld [vmem:[%s3687_s5 + $0x78] sm:$0xff] }
  0xe7   :  { %3729 = vst [vmem:[#allocation15_spill] sm:$0xff] %v2373_v7  ;;  %v52_v7 = vperm.slane %v51_v2, 0 }
  0xe9   :  { %vm2421_vm5 = vcmp.eq.s32.totalorder %v52_v7, 1 }
  0xea   :  { %735 = vperm.xlu2 %1933, %v1811_v24   ;;  %v59_v24 = vsel %vm58_vm8, 1, %v3696_v3  ;;  %v80_v3 = vsel %vm79_vm9, %v2191_v22, %v2202_v26  ;;  %vm155_vm9 = vcmp.lt.s32.totalorder %v2365_v52, 30 }
  0xeb   :  { %v88_v11 = vmul.f32 %v2193_v23, %v80_v3 }
  0xec   :  { %v2354_v40 = vpop.permute.xlu0 %400  ;;  %v2444_v7 = vpop.permute.xlu2 %456 }
  0xed   :  { %v2352_v36 = vpop.permute.xlu1 %389  ;;  %3726 = vst [vmem:[#allocation12_spill] sm:$0xff] %v2354_v40 }
  0xee   :  { %3725 = vst [vmem:[#allocation11_spill] sm:$0xff] %v2352_v36  ;;  %v61_v36 = vperm.slane %v59_v24, 1 }
  0xef   :  { %3745 = vst [vmem:[#allocation18_spill] sm:$0xff] %v2444_v7 }
  0xf0   :  { %vm2436_vm8 = vcmp.eq.s32.totalorder %v61_v36, 1  ;;  %v137_v36 = vsel %vm135_vm3, %v2228_v35, %v2226_v34 }
  0xf2   :  { %755 = vperm.xlu2 %1933, %v1812_v48   ;;  %v45_v48 = vperm.slane %v43_v60, 1  ;;  %v98_v60 = vsel %vm97_vm12, %v2204_v27, %v2168_v15  ;;  %v105_v15 = vmul.f32 %v2175_v17, %v99_v28 }
  0xf3   :  { %v106_v27 = vmul.f32 %v2175_v17, %v98_v60  ;;  %v1814_v17 = vld [vmem:[%s3687_s5 + $0x38] sm:$0xff] }
  0xf4   :  { %v2369_v59 = vpop.permute.xlu0 %420  ;;  %vm2417_vm4 = vcmp.eq.s32.totalorder %v45_v48, 1  ;;  %v119_v48 = vsel %vm3710_vm1, %v2217_v31, %v2215_v30  ;;  %v107_v7 = vsel %vm2421_vm5, %v105_v15, 0.0 }
  0xf5   :  { %v2367_v55 = vpop.permute.xlu1 %407  ;;  %3728 = vst [vmem:[#allocation14_spill] sm:$0xff] %v2369_v59  ;;  %v53_v59 = vperm.slane %v51_v2, 1  ;;  %v90_v60 = vsel %vm2417_vm4, %v88_v11, 0.0  ;;  %v125_v15 = vmul.f32 %v2182_v19, %v119_v48 }
  0xf6   :  { %3727 = vst [vmem:[#allocation13_spill] sm:$0xff] %v2367_v55  ;;  %v60_v55 = vperm.slane %v59_v24, 0 }
  0xf7   :  { %vm2425_vm6 = vcmp.eq.s32.totalorder %v53_v59, 1 }
  0xf8   :  { %vm2429_vm7 = vcmp.eq.s32.totalorder %v60_v55, 1  ;;  %v89_v55 = vsel %vm2402_vm0, %v87_v16, 0.0  ;;  %v108_v16 = vsel %vm2425_vm6, %v106_v27, 0.0  ;;  %v143_v27 = vmul.f32 %v2189_v21, %v137_v36 }
  0xf9   :  { %v187_v36 = vsel %vm185_vm11, %v2250_v43, %v2248_v42 }
  0xfa   :  { %775 = vperm.xlu2 %1933, %v1813_v14   ;;  %v3732_v14 = vmov 0  }
  0xfb   :  { %v67_v40 = vsel %vm66_vm13, 1, %v3732_v14  ;;  %v2442_v59 = vsel %vm171_vm2, 1, %v3732_v14  ;;  %vm241_vm13 = vcmp.lt.s32.totalorder %v2365_v52, 15 }
  0xfc   :  { %v2411_v26 = vpop.permute.xlu0 %438  ;;  %v68_v28 = vperm.slane %v67_v40, 0  ;;  %v69_v20 = vperm.slane %v67_v40, 1  ;;  %v173_v11 = vperm.slane %v2442_v59, 0 }
  0xfd   :  { %v2409_v22 = vpop.permute.xlu1 %427  ;;  %3734 = vst [vmem:[#allocation17_spill] sm:$0xff] %v2411_v26  ;;  %v136_v26 = vsel %vm135_vm3, %v2226_v34, %v2228_v35  ;;  %v109_v34 = vadd.f32 %v107_v7, %v89_v55  ;;  %v110_v35 = vadd.f32 %v108_v16, %v90_v60  ;;  %vm275_vm3 = vcmp.ge.s32.totalorder %v2379_v10, 1  ;;  %v1823_v7 = vld [vmem:[%s3687_s5 + $0x80] sm:$0xff] }
  0xfe   :  { %3733 = vst [vmem:[#allocation16_spill] sm:$0xff] %v2409_v22  ;;  %v118_v22 = vsel %vm3710_vm1, %v2215_v30, %v2217_v31  ;;  %vm2475_vm12 = vcmp.eq.s32.totalorder %v68_v28, 1  ;;  %v174_v30 = vperm.slane %v2442_v59, 1  ;;  %v205_v31 = vsel %vm203_vm10, %v2259_v46, %v2257_v45 }
  0xff   :  { %v126_v40 = vmul.f32 %v2182_v19, %v118_v22  ;;  %v144_v28 = vmul.f32 %v2189_v21, %v136_v26  ;;  %vm2497_vm2 = vcmp.eq.s32.totalorder %v69_v20, 1  ;;  %v204_v19 = vsel %vm203_vm10, %v2257_v45, %v2259_v46  ;;  %v1815_v22 = vld [vmem:[%s3687_s5 + $0x40] sm:$0xff] }
 0x100   :  { %v211_v21 = vmul.f32 %v2224_v33, %v205_v31  ;;  %vm276_vm1 = vcmp.lt.s32.totalorder %v2379_v10, 17  ;;  %v127_v26 = vadd.f32 %v125_v15, %v109_v34  ;;  %v145_v20 = vsel %vm2429_vm7, %v143_v27, 0.0 }
 0x101   :  { %v157_v55 = vsel %vm155_vm9, %v2239_v39, %v2237_v38  ;;  %v243_v45 = vsel %vm241_vm13, %v2283_v54, %v2281_v53  ;;  %v128_v46 = vadd.f32 %v126_v40, %v110_v35  ;;  %v186_v60 = vsel %vm185_vm11, %v2248_v42, %v2250_v43  ;;  %vm277_vm10 = vmand %vm275_vm3, %vm276_vm1  ;;  %v2541_v43 = vpop.permute.xlu2 %488 }
 0x102   :  { %805 = vperm.xlu2 %1933, %v1814_v17   ;;  %v193_v16 = vmul.f32 %v2213_v29, %v187_v36  ;;  %v225_v15 = vsel %vm223_vm14, %v2272_v50, %v2270_v49  ;;  %v146_v27 = vsel %vm2436_vm8, %v144_v28, 0.0  ;;  %v156_v31 = vsel %vm155_vm9, %v2237_v38, %v2239_v39 }
 0x103   :  { %v212_v34 = vmul.f32 %v2224_v33, %v204_v19  ;;  %v263_v42 = vsel %vm261_vm15, %v2294_v58, %v2292_v57  ;;  %v147_v35 = vadd.f32 %v145_v20, %v127_v26  ;;  %v163_v40 = vmul.f32 %v2200_v25, %v157_v55 }
 0x104   :  { %v2488_v48 = vpop.permute.xlu0 %458  ;;  %v213_v28 = vsel %vm2421_vm5, %v211_v21, 0.0  ;;  %v249_v36 = vmul.f32 %v2246_v41, %v243_v45  ;;  %vm2547_vm9 = vcmp.eq.s32.totalorder %v173_v11, 1  ;;  %v194_v33 = vmul.f32 %v2213_v29, %v186_v60 }
 0x105   :  { %v2486_v17 = vpop.permute.xlu1 %445  ;;  %v224_v39 = vsel %vm223_vm14, %v2270_v49, %v2272_v50  ;;  %v231_v19 = vmul.f32 %v2235_v37, %v225_v15  ;;  %v242_v21 = vsel %vm241_vm13, %v2281_v53, %v2283_v54  ;;  %v195_v11 = vsel %vm2402_vm0, %v193_v16, 0.0  ;;  %v1816_v16 = vld [vmem:[%s3687_s5 + $0x48] sm:$0xff] }
 0x106   :  { %v278_v26 = vsel %vm277_vm10, 1, %v3732_v14  ;;  %v269_v29 = vmul.f32 %v2261_v47, %v263_v42  ;;  %v214_v49 = vsel %vm2425_vm6, %v212_v34, 0.0  ;;  %v215_v50 = vadd.f32 %v213_v28, %v195_v11 }
 0x107   :  { %vm311_vm1 = vcmp.lt.s32.totalorder %v2365_v52, 1  ;;  %v165_v53 = vsel %vm2475_vm12, %v163_v40, 0.0  ;;  %v232_v54 = vmul.f32 %v2235_v37, %v224_v39  ;;  %v250_v45 = vmul.f32 %v2246_v41, %v242_v21 }
 0x108   :  { %v251_v60 = vsel %vm2429_vm7, %v249_v36, 0.0  ;;  %v196_v15 = vsel %vm2417_vm4, %v194_v33, 0.0  ;;  %vm293_vm11 = vcmp.lt.s32.totalorder %v2365_v52, 2  ;;  %v271_v37 = vsel %vm2475_vm12, %v269_v29, 0.0 }
 0x109   :  { %v313_v41 = vsel %vm311_vm1, %v2313_v5, %v2311_v4  ;;  %v148_v42 = vadd.f32 %v146_v27, %v128_v46  ;;  %v312_v36 = vsel %vm311_vm1, %v2311_v4, %v2313_v5  ;;  %v252_v39 = vsel %vm2436_vm8, %v250_v45, 0.0  ;;  %v2617_v27 = vpop.permute.xlu2 %506 }
 0x10a   :  { %823 = vperm.xlu2 %1933, %v1815_v22   ;;  %v164_v22 = vmul.f32 %v2200_v25, %v156_v31  ;;  %v262_v25 = vsel %vm261_vm15, %v2292_v57, %v2294_v58  ;;  %v233_v57 = vadd.f32 %v231_v19, %v215_v50  ;;  %v279_v58 = vperm.slane %v278_v26, 0 }
 0x10b   :  { %v216_v31 = vadd.f32 %v214_v49, %v196_v15  ;;  %v270_v34 = vmul.f32 %v2261_v47, %v262_v25  ;;  %v2602_v47 = vadd.f32 %v165_v53, %v147_v35  ;;  %v280_v19 = vperm.slane %v278_v26, 1  ;;  %v1817_v25 = vld [vmem:[%s3687_s5 + $0x50] sm:$0xff] }
 0x10c   :  { %v2568_v55 = vpop.permute.xlu0 %490  ;;  %v166_v40 = vsel %vm2497_vm2, %v164_v22, 0.0  ;;  %v253_v28 = vadd.f32 %v251_v60, %v233_v57  ;;  %v294_v46 = vsel %vm293_vm11, %v2304_v62, %v2306_v63  ;;  %v295_v4 = vsel %vm293_vm11, %v2306_v63, %v2304_v62 }
 0x10d   :  { %v2566_v20 = vpop.permute.xlu1 %465  ;;  %v234_v33 = vadd.f32 %v232_v54, %v216_v31  ;;  %v319_v5 = vmul.f32 %v2288_v56, %v313_v41  ;;  %vm2619_vm13 = vcmp.eq.s32.totalorder %v279_v58, 1  ;;  %v272_v22 = vsel %vm2497_vm2, %v270_v34, 0.0  ;;  %v3758_v41 = vld [vmem:[#allocation7_spill] sm:$0xff] }
 0x10e   :  { %v2606_v21 = vadd.f32 %v271_v37, %v253_v28  ;;  %v320_v11 = vmul.f32 %v2288_v56, %v312_v36  ;;  %vm2632_vm15 = vcmp.eq.s32.totalorder %v174_v30, 1  ;;  %v168_v63 = vadd.f32 %v166_v40, %v148_v42  ;;  %v3759_v42 = vld [vmem:[#allocation8_spill] sm:$0xff]  ;;  %v3760_v40 = vld [vmem:[#allocation5_spill] sm:$0xff] }
 0x10f   :  { %v254_v49 = vadd.f32 %v252_v39, %v234_v33  ;;  %vm342_vm3 = vcmp.lt.s32.totalorder %v2365_v52, 127  ;;  %vm362_vm10 = vcmp.lt.s32.totalorder %v2365_v52, 126  ;;  %v177_v56 = vsel %vm2547_vm9, %v2602_v47, 0.0  ;;  %v3761_v36 = vld [vmem:[#allocation12_spill] sm:$0xff]  ;;  %v3762_v47 = vld [vmem:[#allocation6_spill] sm:$0xff] }
 0x110   :  { %vm2641_vm1 = vcmp.eq.s32.totalorder %v280_v19, 1  ;;  %v301_v59 = vmul.f32 %v2274_v51, %v295_v4  ;;  %v302_v30 = vmul.f32 %v2274_v51, %v294_v46  ;;  %v283_v54 = vsel %vm2619_vm13, %v2606_v21, 0.0 }
 0x111   :  { %v274_v53 = vadd.f32 %v272_v22, %v254_v49  ;;  %v321_v38 = vsel %vm2421_vm5, %v319_v5, 0.0  ;;  %vm384_vm9 = vcmp.lt.s32.totalorder %v2365_v52, 114  ;;  %v322_v45 = vsel %vm2425_vm6, %v320_v11, 0.0  ;;  %v2705_v46 = vpop.permute.xlu2 %526  ;;  %v1818_v22 = vld [vmem:[%s3687_s5 + $0x58] sm:$0xff]  ;;  %v3763_v49 = vld [vmem:[#allocation11_spill] sm:$0xff] }
 0x112   :  { %843 = vperm.xlu2 %1933, %v1816_v16   ;;  %v343_v51 = vsel %vm342_vm3, %v2322_v9, %v2302_v61  ;;  %v363_v60 = vsel %vm362_vm10, %v2315_v6, %v2331_v13  ;;  %v364_v16 = vsel %vm362_vm10, %v2331_v13, %v2315_v6  ;;  %v332_v15 = vmul.f32 %v2320_v8, %v2099_v1 }
 0x113   :  { %v344_v57 = vsel %vm342_vm3, %v2302_v61, %v2322_v9  ;;  %v350_v58 = vmul.f32 %v2329_v12, %v343_v51  ;;  %vm402_vm11 = vcmp.lt.s32.totalorder %v2365_v52, 113  ;;  %v303_v31 = vsel %vm2402_vm0, %v301_v59, 0.0  ;;  %v3764_v59 = vld [vmem:[#allocation13_spill] sm:$0xff] }
 0x114   :  { %v2628_v29 = vpop.permute.xlu0 %508  ;;  %v304_v34 = vsel %vm2417_vm4, %v302_v30, 0.0  ;;  %v333_v6 = vmul.f32 %v2320_v8, %v2094_v0  ;;  %v351_v1 = vmul.f32 %v2329_v12, %v344_v57  ;;  %v323_v13 = vadd.f32 %v321_v38, %v303_v31  ;;  %v3766_v57 = vld [vmem:[#allocation10_spill] sm:$0xff] }
 0x115   :  { %v2626_v26 = vpop.permute.xlu1 %497  ;;  %v324_v37 = vadd.f32 %v322_v45, %v304_v34  ;;  %v370_v61 = vmul.f32 %v3758_v41, %v363_v60  ;;  %v371_v9 = vmul.f32 %v3758_v41, %v364_v16  ;;  %v385_v28 = vsel %vm384_vm9, %v3760_v40, %v3759_v42  ;;  %v3768_v34 = vld [vmem:[#allocation15_spill] sm:$0xff] }
 0x116   :  { %v403_v33 = vsel %vm402_vm11, %v3762_v47, %v3761_v36  ;;  %vm474_vm13 = vcmp.ge.s32.totalorder %v2379_v10, 4294967295  ;;  %vm475_vm3 = vcmp.lt.s32.totalorder %v2379_v10, 15  ;;  %v284_v12 = vsel %vm2641_vm1, %v274_v53, 0.0 }
 0x117   :  { %v334_v39 = vadd.f32 %v332_v15, %v323_v13  ;;  %v352_v19 = vsel %vm2429_vm7, %v350_v58, 0.0  ;;  %v404_v21 = vsel %vm402_vm11, %v3761_v36, %v3762_v47  ;;  %v335_v4 = vadd.f32 %v333_v6, %v324_v37  ;;  %v3765_v15 = vld [vmem:[#allocation14_spill] sm:$0xff] }
 0x118   :  { %v353_v5 = vsel %vm2436_vm8, %v351_v1, 0.0  ;;  %v386_v35 = vsel %vm384_vm9, %v3759_v42, %v3760_v40  ;;  %vm3711_vm10 = vcmp.lt.s32.totalorder %v2365_v52, 112  ;;  %v372_v11 = vsel %vm2475_vm12, %v370_v61, 0.0  ;;  %vm476_vm9 = vmand %vm474_vm13, %vm475_vm3  ;;  %v3769_v61 = vld [vmem:[#allocation16_spill] sm:$0xff] }
 0x119   :  { %v392_v50 = vmul.f32 %v3763_v49, %v385_v28  ;;  %v410_v30 = vmul.f32 %v3764_v59, %v403_v33  ;;  %vm440_vm1 = vcmp.lt.s32.totalorder %v2365_v52, 111  ;;  %v354_v53 = vadd.f32 %v352_v19, %v334_v39  ;;  %v3770_v39 = vld [vmem:[#allocation18_spill] sm:$0xff] }
 0x11a   :  { %862 = vperm.xlu2 %1933, %v1817_v25   ;;  %v178_v25 = vsel %vm2632_vm15, %v168_v63, 0.0  ;;  %v373_v38 = vsel %vm2497_vm2, %v371_v9, 0.0  ;;  %v411_v45 = vmul.f32 %v3764_v59, %v404_v21  ;;  %v355_v51 = vadd.f32 %v353_v5, %v335_v4  ;;  %v3767_v63 = vld [vmem:[#allocation17_spill] sm:$0xff]  ;;  %v1819_v5 = vld [vmem:[%s3687_s5 + $0x60] sm:$0xff] }
 0x11b   :  { %v2731_v60 = vadd.f32 %v283_v54, %v177_v56  ;;  %v393_v16 = vmul.f32 %v3763_v49, %v386_v35  ;;  %v423_v58 = vsel %vm3711_vm10, %v3766_v57, %v3765_v15  ;;  %v2738_v31 = vadd.f32 %v284_v12, %v178_v25  ;;  %v545_v49 = vpop.permute.xlu2 %544 }
 0x11c   :  { %v2695_v8 = vpop.permute.xlu0 %528  ;;  %v2740_v62 = vadd.f32 %v372_v11, %v354_v53  ;;  %v441_v6 = vsel %vm440_vm1, %v3768_v34, %v3767_v63  ;;  %v477_v56 = vsel %vm476_vm9, 1, %v3732_v14  ;;  %v2747_v54 = vadd.f32 %v373_v38, %v355_v51 }
 0x11d   :  { %v2693_v0 = vpop.permute.xlu1 %515  ;;  %v394_v1 = vsel %vm2402_vm0, %v392_v50, 0.0  ;;  %v412_v13 = vsel %vm2421_vm5, %v410_v30, 0.0  ;;  %vm460_vm15 = vcmp.lt.s32.totalorder %v2365_v52, 110  ;;  %v413_v37 = vsel %vm2425_vm6, %v411_v45, 0.0 }
 0x11e   :  { %v424_v41 = vsel %vm3711_vm10, %v3765_v15, %v3766_v57  ;;  %v430_v9 = vmul.f32 %v3769_v61, %v423_v58  ;;  %v442_v42 = vsel %vm440_vm1, %v3767_v63, %v3768_v34  ;;  %v395_v28 = vsel %vm2417_vm4, %v393_v16, 0.0 }
 0x11f   :  { %v448_v36 = vmul.f32 %v2486_v17, %v441_v6  ;;  %v478_v47 = vperm.slane %v477_v56, 0  ;;  %vm510_vm11 = vcmp.lt.s32.totalorder %v2365_v52, 97  ;;  %v414_v12 = vadd.f32 %v412_v13, %v394_v1 }
 0x120   :  { %v461_v19 = vsel %vm460_vm15, %v3770_v39, %v2488_v48  ;;  %v462_v21 = vsel %vm460_vm15, %v2488_v48, %v3770_v39  ;;  %v479_v4 = vperm.slane %v477_v56, 1  ;;  %v415_v35 = vadd.f32 %v413_v37, %v395_v28  ;;  %v1820_v56 = vld [vmem:[%s3687_s5 + $0x68] sm:$0xff] }
 0x121   :  { %v449_v11 = vmul.f32 %v2486_v17, %v442_v42  ;;  %vm492_vm13 = vcmp.lt.s32.totalorder %v2365_v52, 98  ;;  %v432_v50 = vadd.f32 %v430_v9, %v414_v12  ;;  %v511_v59 = vsel %vm510_vm11, %v2617_v27, %v2628_v29 }
 0x122   :  { %880 = vperm.xlu2 %1933, %v1818_v22   ;;  %v431_v22 = vmul.f32 %v3769_v61, %v424_v41  ;;  %v512_v48 = vsel %vm510_vm11, %v2628_v29, %v2617_v27  ;;  %vm530_vm3 = vcmp.lt.s32.totalorder %v2365_v52, 96  ;;  %v450_v30 = vsel %vm2429_vm7, %v448_v36, 0.0 }
 0x123   :  { %v468_v25 = vmul.f32 %v2566_v20, %v461_v19  ;;  %v469_v53 = vmul.f32 %v2566_v20, %v462_v21  ;;  %vm548_vm1 = vcmp.lt.s32.totalorder %v2365_v52, 95  ;;  %v493_v17 = vsel %vm492_vm13, %v2541_v43, %v2568_v55  ;;  %v565_v36 = vpop.permute.xlu2 %564 }
 0x124   :  { %v547_v33 = vpop.permute.xlu0 %546  ;;  %v494_v38 = vsel %vm492_vm13, %v2568_v55, %v2541_v43  ;;  %vm582_vm9 = vcmp.ge.s32.totalorder %v2379_v10, 4294967294  ;;  %vm583_vm15 = vcmp.lt.s32.totalorder %v2379_v10, 14  ;;  %v451_v27 = vsel %vm2436_vm8, %v449_v11, 0.0 }
 0x125   :  { %v536_v40 = vpop.permute.xlu1 %535  ;;  %vm2797_vm11 = vcmp.eq.s32.totalorder %v478_v47, 1  ;;  %v518_v20 = vmul.f32 %v2693_v0, %v511_v59  ;;  %v519_v45 = vmul.f32 %v2693_v0, %v512_v48  ;;  %v433_v51 = vadd.f32 %v431_v22, %v415_v35  ;;  %vm584_vm13 = vmand %vm582_vm9, %vm583_vm15  ;;  %v1821_v48 = vld [vmem:[%s3687_s5 + $0x70] sm:$0xff] }
 0x126   :  { %v452_v16 = vadd.f32 %v450_v30, %v432_v50  ;;  %v549_v15 = vsel %vm548_vm1, %v545_v49, %v547_v33  ;;  %v550_v57 = vsel %vm548_vm1, %v547_v33, %v545_v49  ;;  %v500_v55 = vmul.f32 %v2626_v26, %v493_v17 }
 0x127   :  { %v501_v58 = vmul.f32 %v2626_v26, %v494_v38  ;;  %v531_v63 = vsel %vm530_vm3, %v2705_v46, %v2695_v8  ;;  %v532_v34 = vsel %vm530_vm3, %v2695_v8, %v2705_v46  ;;  %v453_v0 = vadd.f32 %v451_v27, %v433_v51  ;;  %v1824_v51 = vld [vmem:[%s3687_s5 + $0x88] sm:$0xff] }
 0x128   :  { %v470_v6 = vsel %vm2475_vm12, %v468_v25, 0.0  ;;  %v471_v26 = vsel %vm2497_vm2, %v469_v53, 0.0  ;;  %vm568_vm1 = vcmp.lt.s32.totalorder %v2365_v52, 94  ;;  %v520_v1 = vsel %vm2421_vm5, %v518_v20, 0.0 }
 0x129   :  { %v521_v10 = vsel %vm2425_vm6, %v519_v45, 0.0  ;;  %vm2827_vm9 = vcmp.eq.s32.totalorder %v479_v4, 1  ;;  %v538_v41 = vmul.f32 %v536_v40, %v531_v63  ;;  %v539_v61 = vmul.f32 %v536_v40, %v532_v34  ;;  %v1828_v63 = vld [vmem:[%s3687_s5 + $0xa8] sm:$0xff] }
 0x12a   :  { %900 = vperm.xlu2 %1933, %v1819_v5   ;;  %v585_v9 = vsel %vm584_vm13, 1, %v3732_v14  ;;  %v472_v42 = vadd.f32 %v470_v6, %v452_v16  ;;  %v473_v28 = vadd.f32 %v471_v26, %v453_v0  ;;  %v502_v32 = vsel %vm2402_vm0, %v500_v55, 0.0  ;;  %v1829_v0 = vld [vmem:[%s3687_s5 + $0xb0] sm:$0xff]  ;;  %v1830_v26 = vld [vmem:[%s3687_s5 + $0xb8] sm:$0xff] }
 0x12b   :  { %v503_v44 = vsel %vm2417_vm4, %v501_v58, 0.0  ;;  %v522_v47 = vadd.f32 %v520_v1, %v502_v32  ;;  %v586_v2 = vperm.slane %v585_v9, 0  ;;  %v587_v21 = vperm.slane %v585_v9, 1  ;;  %v598_v29 = vpop.permute.xlu2 %597  ;;  %v1827_v58 = vld [vmem:[%s3687_s5 + $0xa0] sm:$0xff] }
 0x12c   :  { %v567_v13 = vpop.permute.xlu0 %566  ;;  %v523_v33 = vadd.f32 %v521_v10, %v503_v44  ;;  %v376_v35 = vadd.f32 %v2740_v62, %v2731_v60  ;;  %v377_v22 = vadd.f32 %v2747_v54, %v2738_v31  ;;  %v482_v3 = vsel %vm2797_vm11, %v472_v42, 0.0 }
 0x12d   :  { %v554_v43 = vpop.permute.xlu1 %553  ;;  %v569_v12 = vsel %vm568_vm1, %v565_v36, %v567_v13  ;;  %v570_v40 = vsel %vm568_vm1, %v567_v13, %v565_v36  ;;  %v540_v4 = vadd.f32 %v538_v41, %v522_v47  ;;  %v483_v23 = vsel %vm2827_vm9, %v473_v28, 0.0  ;;  %v3775_v41 = vld [vmem:[#allocation9_spill] sm:$0xff] }
 0x12e   :  { %v556_v8 = vmul.f32 %v554_v43, %v549_v15  ;;  %v557_v46 = vmul.f32 %v554_v43, %v550_v57  ;;  %v541_v24 = vadd.f32 %v539_v61, %v523_v33  ;;  %vm588_vm0 = vcmp.eq.s32.totalorder %v586_v2, 1  ;;  %v1825_v15 = vld [vmem:[%s3687_s5 + $0x90] sm:$0xff]  ;;  %v1826_v43 = vld [vmem:[%s3687_s5 + $0x98] sm:$0xff] }
 0x12f   :  { %vm589_vm4 = vcmp.eq.s32.totalorder %v587_v21, 1  ;;  %v484_v30 = vadd.f32 %v482_v3, %v376_v35  ;;  %v485_v25 = vadd.f32 %v483_v23, %v377_v22  ;;  %vm610_vm5 = vcmp.ge.s32.totalorder %v3775_v41, 6 }
 0x130   :  { %v558_v39 = vsel %vm2429_vm7, %v556_v8, 0.0  ;;  %v559_v19 = vsel %vm2436_vm8, %v557_v46, 0.0  ;;  %vm611_vm6 = vcmp.lt.s32.totalorder %v3775_v41, 22  ;;  %vm602_vm7 = vcmp.ge.s32.totalorder %v3775_v41, 9 }
 0x131   :  { %v560_v50 = vadd.f32 %v558_v39, %v540_v4  ;;  %v561_v59 = vadd.f32 %v559_v19, %v541_v24  ;;  %vm603_vm8 = vcmp.lt.s32.totalorder %v3775_v41, 25  ;;  %vm619_vm15 = vcmp.lt.s32.totalorder %v3775_v41, 19 }
 0x132   :  { %920 = vperm.xlu2 %1933, %v1820_v56   ;;  %vm604_vm11 = vmand %vm602_vm7, %vm603_vm8  ;;  %vm673_vm1 = vcmp.lt.s32.totalorder %v2365_v52, 22  ;;  %vm655_vm9 = vcmp.lt.s32.totalorder %v2365_v52, 25  ;;  %vm627_vm7 = vcmp.lt.s32.totalorder %v3775_v41, 13 }
 0x133   :  { %v2878_v16 = vpop.permute.xlu2 %660  ;;  %v605_v36 = vsel %vm604_vm11, 1, %v3732_v14 }
 0x134   :  { %v606_v39 = vperm.slane %v605_v36, 0  ;;  %v607_v19 = vperm.slane %v605_v36, 1 }
 0x135   :  { %v574_v5 = vpop.permute.xlu1 %573 }
 0x136   :  { %v576_v11 = vmul.f32 %v574_v5, %v569_v12  ;;  %v577_v49 = vmul.f32 %v574_v5, %v570_v40  ;;  %vm2996_vm8 = vcmp.eq.s32.totalorder %v606_v39, 1 }
 0x138   :  { %v578_v60 = vsel %vm2475_vm12, %v576_v11, 0.0  ;;  %v579_v31 = vsel %vm2497_vm2, %v577_v49, 0.0  ;;  %vm612_vm12 = vmand %vm610_vm5, %vm611_vm6  ;;  %vm618_vm2 = vcmp.ge.s32.totalorder %v3775_v41, 3  ;;  %vm626_vm6 = vcmp.ge.s32.totalorder %v3775_v41, 4294967293 }
 0x139   :  { %v580_v62 = vadd.f32 %v578_v60, %v560_v50  ;;  %v581_v54 = vadd.f32 %v579_v31, %v561_v59  ;;  %v613_v28 = vsel %vm612_vm12, 1, %v3732_v14  ;;  %vm620_vm13 = vmand %vm618_vm2, %vm619_vm15  ;;  %vm3000_vm12 = vcmp.eq.s32.totalorder %v607_v19, 1 }
 0x13a   :  { %952 = vperm.xlu2 %1933, %v1821_v48   ;;  %v614_v32 = vperm.slane %v613_v28, 0  ;;  %v621_v44 = vsel %vm620_vm13, 1, %v3732_v14  ;;  %v615_v47 = vperm.slane %v613_v28, 1  ;;  %vm628_vm11 = vmand %vm626_vm6, %vm627_vm7  ;;  %vm634_vm13 = vcmp.ge.s32.totalorder %v3775_v41, 4294967290 }
 0x13b   :  { %v590_v53 = vsel %vm588_vm0, %v580_v62, 0.0  ;;  %v591_v17 = vsel %vm589_vm4, %v581_v54, 0.0  ;;  %v2887_v57 = vpop.permute.xlu2 %678  ;;  %vm693_vm0 = vcmp.lt.s32.totalorder %v2365_v52, 19  ;;  %v622_v24 = vperm.slane %v621_v44, 0 }
 0x13c   :  { %v592_v38 = vadd.f32 %v590_v53, %v484_v30  ;;  %v593_v27 = vadd.f32 %v591_v17, %v485_v25  ;;  %v623_v5 = vperm.slane %v621_v44, 1  ;;  %vm2982_vm4 = vcmp.eq.s32.totalorder %v614_v32, 1 }
 0x13d   :  { %vm2986_vm5 = vcmp.eq.s32.totalorder %v615_v47, 1  ;;  %vm3004_vm2 = vcmp.eq.s32.totalorder %v622_v24, 1  ;;  %v3786_v25 = vmov 0  ;;  %v3788_v32 = vmov 0 }
 0x13e   :  { %v2859_v20 = vadd.f32 %v598_v29, %v592_v38  ;;  %v2861_v45 = vadd.f32 %v598_v29, %v593_v27  ;;  %vm3008_vm15 = vcmp.eq.s32.totalorder %v623_v5, 1 }
 0x13f   :  { %v3787_v25 = vsel %vm3008_vm15, 4294967295, %v3786_v25 }
 0x140   :  { %653 = vrot.lane.b32.xlu1 %v2861_v45, %s1991_s19  ;;  %651 = vrot.lane.b32.xlu0 %v2859_v20, %s1991_s19  ;;  %s2014_s19 = smov 48  }
 0x142   :  { %970 = vperm.xlu2 %1933, %v1822_v18  }
 0x143   :  { %v2894_v55 = vpop.permute.xlu2 %698 }
 0x148   :  { %671 = vrot.lane.b32.xlu1 %v2861_v45, %s1992_s4  ;;  %669 = vrot.lane.b32.xlu0 %v2859_v20, %s1992_s4  ;;  %s2017_s4 = smov 71  }
 0x14a   :  { %990 = vperm.xlu2 %1933, %v1823_v7  }
 0x14b   :  { %v2906_v34 = vpop.permute.xlu2 %717 }
 0x150   :  { %691 = vrot.lane.b32.xlu1 %v2861_v45, %s1993_s24  ;;  %689 = vrot.lane.b32.xlu0 %v2859_v20, %s1993_s24  ;;  %s2000_s24 = smov 125  }
 0x152   :  { %1010 = vperm.xlu2 %1933, %v1824_v51  }
 0x153   :  { %v2913_v6 = vpop.permute.xlu2 %735 }
 0x158   :  { %711 = vrot.lane.b32.xlu1 %v2861_v45, %s1974_s20  ;;  %709 = vrot.lane.b32.xlu0 %v2859_v20, %s1974_s20  ;;  %s1995_s20 = smov 10  }
 0x15a   :  { %1028 = vperm.xlu2 %1933, %v1825_v15  }
 0x15b   :  { %v2920_v56 = vpop.permute.xlu2 %755 }
 0x160   :  { %728 = vrot.lane.b32.xlu1 %v2861_v45, %s1994_s12  ;;  %726 = vrot.lane.b32.xlu0 %v2859_v20, %s1994_s12  ;;  %s2006_s12 = smov 87  }
 0x162   :  { %1048 = vperm.xlu2 %1933, %v1826_v43  }
 0x163   :  { %v2926_v1 = vpop.permute.xlu2 %775 }
 0x168   :  { %748 = vrot.lane.b32.xlu1 %v2861_v45, %s1995_s20  ;;  %746 = vrot.lane.b32.xlu0 %v2859_v20, %s1995_s20  ;;  %s2009_s20 = smov 83  }
 0x16a   :  { %1068 = vperm.xlu2 %1933, %v1827_v58   ;;  %v629_v58 = vsel %vm628_vm11, 1, %v3732_v14 }
 0x16b   :  { %v2936_v10 = vpop.permute.xlu2 %805  ;;  %v631_v28 = vperm.slane %v629_v58, 1 }
 0x16d   :  { %vm3050_vm6 = vcmp.eq.s32.totalorder %v631_v28, 1 }
 0x170   :  { %768 = vrot.lane.b32.xlu1 %v2861_v45, %s1996_s17  ;;  %766 = vrot.lane.b32.xlu0 %v2859_v20, %s1996_s17  ;;  %s2012_s17 = smov 51  }
 0x172   :  { %1100 = vperm.xlu2 %1933, %v1828_v63  }
 0x173   :  { %v2944_v8 = vpop.permute.xlu2 %823 }
 0x178   :  { %798 = vrot.lane.b32.xlu1 %v2861_v45, %s1997_s21  ;;  %796 = vrot.lane.b32.xlu0 %v2859_v20, %s1997_s21  ;;  %s2015_s21 = smov 74  }
 0x17a   :  { %1118 = vperm.xlu2 %1933, %v1829_v0  }
 0x17b   :  { %v2950_v46 = vpop.permute.xlu2 %843 }
 0x180   :  { %816 = vrot.lane.b32.xlu1 %v2861_v45, %s1998_s22  ;;  %814 = vrot.lane.b32.xlu0 %v2859_v20, %s1998_s22 }
 0x182   :  { %1138 = vperm.xlu2 %1933, %v1830_v26  }
 0x183   :  { %v2958_v61 = vpop.permute.xlu2 %862 }
 0x188   :  { %836 = vrot.lane.b32.xlu1 %v2861_v45, %s1999_s23  ;;  %834 = vrot.lane.b32.xlu0 %v2859_v20, %s1999_s23  ;;  %s2029_s23 = smov 121  }
 0x18a   :  { %1162 = vrot.lane.b32.xlu2 %v2861_v45, %s2000_s24 }
 0x18b   :  { %v2976_v40 = vpop.permute.xlu2 %880 }
 0x190   :  { %856 = vrot.lane.b32.xlu1 %v2861_v45, %s1988_s27  ;;  %854 = vrot.lane.b32.xlu0 %v2859_v20, %s1988_s27  ;;  %s2005_s27 = smov 89  }
 0x192   :  { %1182 = vrot.lane.b32.xlu2 %v2861_v45, %s2001_s26 }
 0x198   :  { %873 = vrot.lane.b32.xlu1 %v2861_v45, %s2002_s28  ;;  %871 = vrot.lane.b32.xlu0 %v2859_v20, %s2002_s28  ;;  %s2018_s28 = smov 42  }
 0x19a   :  { %1202 = vrot.lane.b32.xlu2 %v2861_v45, %s2003_s29 }
 0x1a0   :  { %893 = vrot.lane.b32.xlu1 %v2861_v45, %s2004_s11  ;;  %891 = vrot.lane.b32.xlu0 %v2859_v20, %s2004_s11  ;;  %s2019_s11 = smov 41  }
 0x1a2   :  { %1224 = vrot.lane.b32.xlu2 %v2861_v45, %s2005_s27 }
 0x1a8   :  { %913 = vrot.lane.b32.xlu1 %v2861_v45, %s2006_s12  ;;  %911 = vrot.lane.b32.xlu0 %v2859_v20, %s2006_s12  ;;  %s2021_s12 = smov 38  }
 0x1aa   :  { %1242 = vrot.lane.b32.xlu2 %v2861_v45, %s2007_s13 }
 0x1b0   :  { %945 = vrot.lane.b32.xlu1 %v2861_v45, %s2008_s14  ;;  %943 = vrot.lane.b32.xlu0 %v2859_v20, %s2008_s14  ;;  %s2022_s14 = smov 9  }
 0x1b2   :  { %1262 = vrot.lane.b32.xlu2 %v2861_v45, %s2009_s20  ;;  %v654_v13 = vpop.permute.xlu1 %653  ;;  %v652_v37 = vpop.permute.xlu0 %651 }
 0x1b3   :  { %v656_v2 = vsel %vm655_vm9, %v652_v37, %v654_v13  ;;  %v657_v21 = vsel %vm655_vm9, %v654_v13, %v652_v37 }
 0x1b4   :  { %v663_v59 = vmul.f32 %v2878_v16, %v656_v2  ;;  %v664_v48 = vmul.f32 %v2878_v16, %v657_v21 }
 0x1b6   :  { %v665_v38 = vsel %vm2996_vm8, %v663_v59, 0.0  ;;  %v666_v27 = vsel %vm3000_vm12, %v664_v48, 0.0 }
 0x1b8   :  { %963 = vrot.lane.b32.xlu1 %v2861_v45, %s2010_s15  ;;  %961 = vrot.lane.b32.xlu0 %v2859_v20, %s2010_s15  ;;  %s2023_s15 = smov 35  }
 0x1ba   :  { %1282 = vrot.lane.b32.xlu2 %v2861_v45, %s2011_s16  ;;  %v672_v9 = vpop.permute.xlu1 %671  ;;  %v670_v42 = vpop.permute.xlu0 %669 }
 0x1bb   :  { %v674_v33 = vsel %vm673_vm1, %v670_v42, %v672_v9  ;;  %v675_v12 = vsel %vm673_vm1, %v672_v9, %v670_v42  ;;  %vm635_vm1 = vcmp.lt.s32.totalorder %v3775_v41, 10  ;;  %v630_v42 = vperm.slane %v629_v58, 0 }
 0x1bc   :  { %v681_v22 = vmul.f32 %v2887_v57, %v674_v33  ;;  %v682_v11 = vmul.f32 %v2887_v57, %v675_v12  ;;  %v3030_v57 = vpop.permute.xlu2 %900  ;;  %vm636_vm9 = vmand %vm634_vm13, %vm635_vm1  ;;  %v3790_v41 = vmov 0  ;;  %vm750_vm13 = vcmp.lt.s32.totalorder %v2365_v52, 10 }
 0x1bd   :  { %v3791_v41 = vsel %vm3050_vm6, 4294967295, %v3790_v41  ;;  %v637_v39 = vsel %vm636_vm9, 1, %v3732_v14 }
 0x1be   :  { %v683_v53 = vsel %vm2982_vm4, %v681_v22, 0.0  ;;  %v684_v17 = vsel %vm2986_vm5, %v682_v11, 0.0 }
 0x1bf   :  { %v685_v7 = vadd.f32 %v683_v53, %v665_v38  ;;  %v686_v51 = vadd.f32 %v684_v17, %v666_v27 }
 0x1c0   :  { %983 = vrot.lane.b32.xlu1 %v2861_v45, %s2012_s17  ;;  %981 = vrot.lane.b32.xlu0 %v2859_v20, %s2012_s17  ;;  %s2024_s17 = smov 6  }
 0x1c2   :  { %1300 = vrot.lane.b32.xlu2 %v2861_v45, %s2013_s18  ;;  %v692_v4 = vpop.permute.xlu1 %691  ;;  %v690_v35 = vpop.permute.xlu0 %689 }
 0x1c3   :  { %v694_v49 = vsel %vm693_vm0, %v690_v35, %v692_v4  ;;  %v695_v3 = vsel %vm693_vm0, %v692_v4, %v690_v35  ;;  %vm3046_vm0 = vcmp.eq.s32.totalorder %v630_v42, 1  ;;  %v1935_v4 = vld [vmem:[%s3684_s2] sm:$0x3]  ;;  %v638_v35 = vperm.slane %v637_v39, 0  ;;  %s2020_s2 = smov 39  }
 0x1c4   :  { %v701_v60 = vmul.f32 %v2894_v55, %v694_v49  ;;  %v702_v31 = vmul.f32 %v2894_v55, %v695_v3  ;;  %v3789_v32 = vsel %vm3046_vm0, 4294967295, %v3788_v32  ;;  %v3057_v19 = vpop.permute.xlu2 %920  ;;  %vm642_vm7 = vcmp.ge.s32.totalorder %v1935_v4, 4294967287 }
 0x1c5   :  { %vm643_vm11 = vcmp.lt.s32.totalorder %v1935_v4, 7 }
 0x1c6   :  { %v703_v29 = vsel %vm3004_vm2, %v701_v60, 0.0  ;;  %v704_v18 = vsel %vm3008_vm15, %v702_v31, 0.0  ;;  %vm644_vm1 = vmand %vm642_vm7, %vm643_vm11  ;;  %vm770_vm7 = vcmp.lt.s32.totalorder %v2365_v52, 7 }
 0x1c7   :  { %v705_v63 = vadd.f32 %v703_v29, %v685_v7  ;;  %v706_v0 = vadd.f32 %v704_v18, %v686_v51  ;;  %v645_v53 = vsel %vm644_vm1, 1, %v3732_v14  ;;  %vm800_vm1 = vcmp.lt.s32.totalorder %v2365_v52, 105 }
 0x1c8   :  { %1003 = vrot.lane.b32.xlu1 %v2861_v45, %s2014_s19  ;;  %1001 = vrot.lane.b32.xlu0 %v2859_v20, %s2014_s19  ;;  %v646_v7 = vperm.slane %v645_v53, 0  ;;  %v647_v51 = vperm.slane %v645_v53, 1  ;;  %s2025_s19 = smov 3  }
 0x1ca   :  { %1320 = vrot.lane.b32.xlu2 %v2861_v45, %s2015_s21  ;;  %v712_v16 = vpop.permute.xlu1 %711  ;;  %v710_v15 = vpop.permute.xlu0 %709  ;;  %vm3093_vm11 = vcmp.eq.s32.totalorder %v646_v7, 1 }
 0x1cb   :  { %v713_v43 = vsel %vm223_vm14, %v710_v15, %v712_v16  ;;  %v714_v55 = vsel %vm223_vm14, %v712_v16, %v710_v15  ;;  %vm730_vm14 = vcmp.lt.s32.totalorder %v2365_v52, 13 }
 0x1cc   :  { %v720_v26 = vmul.f32 %v2906_v34, %v713_v43  ;;  %v721_v13 = vmul.f32 %v2906_v34, %v714_v55  ;;  %v3086_v27 = vpop.permute.xlu2 %952 }
 0x1ce   :  { %v722_v37 = vadd.f32 %v720_v26, %v705_v63  ;;  %v723_v9 = vadd.f32 %v721_v13, %v706_v0 }
 0x1d0   :  { %1021 = vrot.lane.b32.xlu1 %v2861_v45, %s2016_s3  ;;  %1019 = vrot.lane.b32.xlu0 %v2859_v20, %s2016_s3  ;;  %s2026_s3 = smov 29  }
 0x1d2   :  { %1340 = vrot.lane.b32.xlu2 %v2861_v45, %s2017_s4  ;;  %v729_v34 = vpop.permute.xlu1 %728  ;;  %v727_v36 = vpop.permute.xlu0 %726 }
 0x1d3   :  { %v731_v44 = vsel %vm730_vm14, %v727_v36, %v729_v34  ;;  %v732_v47 = vsel %vm730_vm14, %v729_v34, %v727_v36  ;;  %vm3071_vm14 = vcmp.eq.s32.totalorder %v638_v35, 1 }
 0x1d4   :  { %v738_v33 = vmul.f32 %v2913_v6, %v731_v44  ;;  %v739_v12 = vmul.f32 %v2913_v6, %v732_v47  ;;  %v639_v6 = vperm.slane %v637_v39, 1  ;;  %v3114_v42 = vpop.permute.xlu2 %970 }
 0x1d6   :  { %v740_v2 = vsel %vm3046_vm0, %v738_v33, 0.0  ;;  %v741_v21 = vsel %vm3050_vm6, %v739_v12, 0.0  ;;  %vm3075_vm9 = vcmp.eq.s32.totalorder %v639_v6, 1 }
 0x1d7   :  { %v742_v24 = vadd.f32 %v740_v2, %v722_v37  ;;  %v743_v5 = vadd.f32 %v741_v21, %v723_v9 }
 0x1d8   :  { %1041 = vrot.lane.b32.xlu1 %v2861_v45, %s2018_s28  ;;  %1039 = vrot.lane.b32.xlu0 %v2859_v20, %s2018_s28  ;;  %s2027_s28 = smov 26  }
 0x1da   :  { %1372 = vrot.lane.b32.xlu2 %v2861_v45, %s2019_s11  ;;  %v749_v22 = vpop.permute.xlu1 %748  ;;  %v747_v11 = vpop.permute.xlu0 %746 }
 0x1db   :  { %v751_v59 = vsel %vm750_vm13, %v747_v11, %v749_v22  ;;  %v752_v48 = vsel %vm750_vm13, %v749_v22, %v747_v11  ;;  %vm3097_vm13 = vcmp.eq.s32.totalorder %v647_v51, 1 }
 0x1dc   :  { %v758_v60 = vmul.f32 %v2920_v56, %v751_v59  ;;  %v759_v31 = vmul.f32 %v2920_v56, %v752_v48  ;;  %v3125_v39 = vpop.permute.xlu2 %990 }
 0x1de   :  { %v760_v17 = vsel %vm3071_vm14, %v758_v60, 0.0  ;;  %v761_v38 = vsel %vm3075_vm9, %v759_v31, 0.0 }
 0x1df   :  { %v762_v29 = vadd.f32 %v760_v17, %v742_v24  ;;  %v763_v18 = vadd.f32 %v761_v38, %v743_v5  ;;  %v1831_v38 = vld [vmem:[%s3687_s5 + $0xc0] sm:$0xff] }
 0x1e0   :  { %1061 = vrot.lane.b32.xlu1 %v2861_v45, %s2020_s2  ;;  %1059 = vrot.lane.b32.xlu0 %v2859_v20, %s2020_s2 }
 0x1e2   :  { %1390 = vrot.lane.b32.xlu2 %v2861_v45, %s2021_s12  ;;  %v769_v56 = vpop.permute.xlu1 %768  ;;  %v767_v16 = vpop.permute.xlu0 %766 }
 0x1e3   :  { %v771_v55 = vsel %vm770_vm7, %v767_v16, %v769_v56  ;;  %v772_v58 = vsel %vm770_vm7, %v769_v56, %v767_v16  ;;  %vm818_vm7 = vcmp.lt.s32.totalorder %v2365_v52, 102 }
 0x1e4   :  { %v778_v63 = vmul.f32 %v2926_v1, %v771_v55  ;;  %v779_v0 = vmul.f32 %v2926_v1, %v772_v58  ;;  %v3144_v17 = vpop.permute.xlu2 %1010 }
 0x1e6   :  { %v780_v26 = vsel %vm3093_vm11, %v778_v63, 0.0  ;;  %v781_v13 = vsel %vm3097_vm13, %v779_v0, 0.0  ;;  %v1832_v0 = vld [vmem:[%s3687_s5 + $0xc8] sm:$0xff] }
 0x1e7   :  { %v3107_v37 = vadd.f32 %v780_v26, %v762_v29  ;;  %v3109_v9 = vadd.f32 %v781_v13, %v763_v18 }
 0x1e8   :  { %1093 = vrot.lane.b32.xlu1 %v2861_v45, %s2022_s14  ;;  %1091 = vrot.lane.b32.xlu0 %v2859_v20, %s2022_s14  ;;  %s2030_s14 = smov 118  }
 0x1ea   :  { %1410 = vrot.lane.b32.xlu2 %v2861_v45, %s2023_s15  ;;  %v799_v1 = vpop.permute.xlu1 %798  ;;  %v797_v28 = vpop.permute.xlu0 %796 }
 0x1eb   :  { %v801_v34 = vsel %vm800_vm1, %v797_v28, %v799_v1  ;;  %v802_v36 = vsel %vm800_vm1, %v799_v1, %v797_v28  ;;  %vm838_vm1 = vcmp.lt.s32.totalorder %v2365_v52, 99 }
 0x1ec   :  { %v808_v44 = vmul.f32 %v2936_v10, %v802_v36  ;;  %v809_v47 = vmul.f32 %v2936_v10, %v801_v34  ;;  %v3166_v1 = vpop.permute.xlu2 %1028 }
 0x1ee   :  { %v810_v5 = vsel %vm2996_vm8, %v808_v44, 0.0  ;;  %v811_v35 = vsel %vm3000_vm12, %v809_v47, 0.0 }
 0x1f0   :  { %1111 = vrot.lane.b32.xlu1 %v2861_v45, %s2024_s17  ;;  %1109 = vrot.lane.b32.xlu0 %v2859_v20, %s2024_s17 }
 0x1f2   :  { %1430 = vrot.lane.b32.xlu2 %v2861_v45, %s1969_s25  ;;  %v817_v33 = vpop.permute.xlu1 %816  ;;  %v815_v12 = vpop.permute.xlu0 %814 }
 0x1f3   :  { %v819_v2 = vsel %vm818_vm7, %v815_v12, %v817_v33  ;;  %v820_v21 = vsel %vm818_vm7, %v817_v33, %v815_v12  ;;  %vm875_vm7 = vcmp.lt.s32.totalorder %v2365_v52, 93  ;;  %v1833_v33 = vld [vmem:[%s3687_s5 + $0xd0] sm:$0xff] }
 0x1f4   :  { %v826_v4 = vmul.f32 %v2944_v8, %v820_v21  ;;  %v827_v24 = vmul.f32 %v2944_v8, %v819_v2 }
 0x1f6   :  { %v828_v10 = vsel %vm2982_vm4, %v826_v4, 0.0  ;;  %v829_v6 = vsel %vm2986_vm5, %v827_v24, 0.0  ;;  %v3185_v24 = vld [vmem:[%s3683_s1] sm:$0x3] }
 0x1f7   :  { %v830_v22 = vadd.f32 %v828_v10, %v810_v5  ;;  %v831_v11 = vadd.f32 %v829_v6, %v811_v35  ;;  %vm929_vm10 = vcmp.ge.s32.totalorder %v3185_v24, 6 }
 0x1f8   :  { %1131 = vrot.lane.b32.xlu1 %v2861_v45, %s2025_s19  ;;  %1129 = vrot.lane.b32.xlu0 %v2859_v20, %s2025_s19  ;;  %s2031_s19 = smov 115  }
 0x1fa   :  { %1447 = vrot.lane.b32.xlu2 %v2861_v45, %s2026_s3  ;;  %v837_v8 = vpop.permute.xlu1 %836  ;;  %v835_v59 = vpop.permute.xlu0 %834 }
 0x1fb   :  { %v839_v48 = vsel %vm838_vm1, %v835_v59, %v837_v8  ;;  %v840_v60 = vsel %vm838_vm1, %v837_v8, %v835_v59  ;;  %vm785_vm1 = vcmp.lt.s32.totalorder %v3185_v24, 25  ;;  %v1834_v8 = vld [vmem:[%s3687_s5 + $0xd8] sm:$0xff] }
 0x1fc   :  { %v846_v31 = vmul.f32 %v2950_v46, %v840_v60  ;;  %v847_v53 = vmul.f32 %v2950_v46, %v839_v48 }
 0x1fe   :  { %v848_v29 = vsel %vm3004_vm2, %v846_v31, 0.0  ;;  %v849_v18 = vsel %vm3008_vm15, %v847_v53, 0.0 }
 0x1ff   :  { %v850_v7 = vadd.f32 %v848_v29, %v830_v22  ;;  %v851_v51 = vadd.f32 %v849_v18, %v831_v11 }
 0x200   :  { %1160 = vrot.lane.b32.xlu1 %v2859_v20, %s2000_s24  ;;  %1151 = vperm.xlu0 %1934, %v1831_v38   ;;  %s2028_s24 = smov 23  }
 0x202   :  { %1467 = vrot.lane.b32.xlu2 %v2861_v45, %s2027_s28  ;;  %v857_v46 = vpop.permute.xlu1 %856  ;;  %v855_v56 = vpop.permute.xlu0 %854 }
 0x203   :  { %v858_v16 = vsel %vm530_vm3, %v855_v56, %v857_v46  ;;  %v859_v55 = vsel %vm530_vm3, %v857_v46, %v855_v56  ;;  %vm784_vm3 = vcmp.ge.s32.totalorder %v3185_v24, 9 }
 0x204   :  { %v865_v58 = vmul.f32 %v2958_v61, %v859_v55  ;;  %v866_v63 = vmul.f32 %v2958_v61, %v858_v16 }
 0x206   :  { %v867_v26 = vadd.f32 %v865_v58, %v850_v7  ;;  %v868_v13 = vadd.f32 %v866_v63, %v851_v51 }
 0x208   :  { %1180 = vrot.lane.b32.xlu1 %v2859_v20, %s2001_s26  ;;  %1169 = vperm.xlu0 %1934, %v1832_v0  }
 0x20a   :  { %1487 = vrot.lane.b32.xlu2 %v2861_v45, %s2028_s24  ;;  %v874_v28 = vpop.permute.xlu1 %873  ;;  %v872_v61 = vpop.permute.xlu0 %871 }
 0x20b   :  { %v876_v34 = vsel %vm875_vm7, %v872_v61, %v874_v28  ;;  %v877_v36 = vsel %vm875_vm7, %v874_v28, %v872_v61  ;;  %vm895_vm7 = vcmp.lt.s32.totalorder %v2365_v52, 90 }
 0x20c   :  { %v883_v44 = vmul.f32 %v2976_v40, %v877_v36  ;;  %v884_v47 = vmul.f32 %v2976_v40, %v876_v34  ;;  %v3192_v40 = vpop.permute.xlu2 %1048 }
 0x20e   :  { %v885_v12 = vsel %vm3046_vm0, %v883_v44, 0.0  ;;  %v886_v2 = vsel %vm3050_vm6, %v884_v47, 0.0  ;;  %vm930_vm6 = vcmp.lt.s32.totalorder %v3185_v24, 22  ;;  %vm786_vm0 = vmand %vm784_vm3, %vm785_vm1  ;;  %vm947_vm1 = vcmp.lt.s32.totalorder %v2365_v52, 57 }
 0x20f   :  { %v887_v21 = vadd.f32 %v885_v12, %v867_v26  ;;  %v888_v4 = vadd.f32 %v886_v2, %v868_v13  ;;  %vm931_vm15 = vmand %vm929_vm10, %vm930_vm6  ;;  %v787_v59 = vsel %vm786_vm0, 1, %v3732_v14  ;;  %vm915_vm10 = vcmp.lt.s32.totalorder %v2365_v52, 87  ;;  %v1835_v13 = vld [vmem:[%s3687_s5 + $0xe0] sm:$0xff] }
 0x210   :  { %1200 = vrot.lane.b32.xlu1 %v2859_v20, %s2003_s29  ;;  %1189 = vperm.xlu0 %1934, %v1833_v33   ;;  %v932_v38 = vsel %vm931_vm15, 1, %v3732_v14  ;;  %v789_v29 = vperm.slane %v787_v59, 1  ;;  %s2032_s29 = smov 109  }
 0x211   :  { %v933_v7 = vperm.slane %v932_v38, 0  ;;  %v934_v51 = vperm.slane %v932_v38, 1 }
 0x212   :  { %1519 = vrot.lane.b32.xlu2 %v2861_v45, %s2029_s23  ;;  %v894_v5 = vpop.permute.xlu1 %893  ;;  %v892_v35 = vpop.permute.xlu0 %891  ;;  %vm3222_vm0 = vcmp.eq.s32.totalorder %v789_v29, 1 }
 0x213   :  { %v896_v10 = vsel %vm895_vm7, %v892_v35, %v894_v5  ;;  %v897_v6 = vsel %vm895_vm7, %v894_v5, %v892_v35  ;;  %vm935_vm6 = vcmp.eq.s32.totalorder %v933_v7, 1  ;;  %vm936_vm3 = vcmp.eq.s32.totalorder %v934_v51, 1 }
 0x214   :  { %v903_v22 = vmul.f32 %v3030_v57, %v897_v6  ;;  %v904_v11 = vmul.f32 %v3030_v57, %v896_v10  ;;  %v788_v57 = vperm.slane %v787_v59, 0  ;;  %v3214_v56 = vpop.permute.xlu2 %1068  ;;  %v793_v44 = vsel %vm3222_vm0, %v3109_v9, 0.0 }
 0x215   :  { %vm965_vm7 = vcmp.lt.s32.totalorder %v2365_v52, 54  ;;  %vm1005_vm0 = vcmp.lt.s32.totalorder %v2365_v52, 48 }
 0x216   :  { %v905_v48 = vsel %vm3071_vm14, %v903_v22, 0.0  ;;  %v906_v60 = vsel %vm3075_vm9, %v904_v11, 0.0  ;;  %vm3218_vm15 = vcmp.eq.s32.totalorder %v788_v57, 1 }
 0x217   :  { %v907_v31 = vadd.f32 %v905_v48, %v887_v21  ;;  %v908_v53 = vadd.f32 %v906_v60, %v888_v4  ;;  %v792_v36 = vsel %vm3218_vm15, %v3107_v37, 0.0  ;;  %v1836_v37 = vld [vmem:[%s3687_s5 + $0xe8] sm:$0xff]  ;;  %vm3804_vm15 = vnez %v3787_v25 }
 0x218   :  { %1222 = vrot.lane.b32.xlu1 %v2859_v20, %s2005_s27  ;;  %1209 = vperm.xlu0 %1934, %v1834_v8  }
 0x21a   :  { %1537 = vrot.lane.b32.xlu2 %v2861_v45, %s2030_s14  ;;  %v914_v18 = vpop.permute.xlu1 %913  ;;  %v912_v46 = vpop.permute.xlu0 %911 }
 0x21b   :  { %v916_v16 = vsel %vm915_vm10, %v912_v46, %v914_v18  ;;  %v917_v55 = vsel %vm915_vm10, %v914_v18, %v912_v46  ;;  %vm985_vm10 = vcmp.lt.s32.totalorder %v2365_v52, 51 }
 0x21c   :  { %v923_v58 = vmul.f32 %v3057_v19, %v917_v55  ;;  %v924_v63 = vmul.f32 %v3057_v19, %v916_v16  ;;  %v3248_v10 = vpop.permute.xlu2 %1100 }
 0x21e   :  { %v925_v28 = vsel %vm3093_vm11, %v923_v58, 0.0  ;;  %v926_v19 = vsel %vm3097_vm13, %v924_v63, 0.0  ;;  %v1838_v63 = vld [vmem:[%s3687_s5 + $0xf8] sm:$0xff] }
 0x21f   :  { %v927_v61 = vadd.f32 %v925_v28, %v907_v31  ;;  %v928_v34 = vadd.f32 %v926_v19, %v908_v53  ;;  %v1837_v31 = vld [vmem:[%s3687_s5 + $0xf0] sm:$0xff] }
 0x220   :  { %1240 = vrot.lane.b32.xlu1 %v2859_v20, %s2007_s13  ;;  %1231 = vperm.xlu0 %1934, %v1835_v13  }
 0x221   :  { %v937_v47 = vsel %vm935_vm6, %v927_v61, 0.0  ;;  %v938_v33 = vsel %vm936_vm3, %v928_v34, 0.0  ;;  %vm1023_vm6 = vcmp.lt.s32.totalorder %v2365_v52, 45  ;;  %vm3805_vm3 = vnez %v3789_v32 }
 0x222   :  { %v3242_v12 = vadd.f32 %v937_v47, %v792_v36  ;;  %v3244_v2 = vadd.f32 %v938_v33, %v793_v44  ;;  %1557 = vrot.lane.b32.xlu2 %v2861_v45, %s2031_s19  ;;  %v946_v21 = vpop.permute.xlu1 %945  ;;  %v944_v4 = vpop.permute.xlu0 %943  ;;  %v1839_v33 = vld [vmem:[%s3687_s5 + $0x100] sm:$0xff] }
 0x223   :  { %v948_v5 = vsel %vm947_vm1, %v944_v4, %v946_v21  ;;  %v949_v35 = vsel %vm947_vm1, %v946_v21, %v944_v4  ;;  %vm3806_vm1 = vnez %v3791_v41 }
 0x224   :  { %v955_v9 = vmul.f32 %v3086_v27, %v949_v35  ;;  %v956_v6 = vmul.f32 %v3086_v27, %v948_v5  ;;  %v3273_v29 = vpop.permute.xlu2 %1118 }
 0x226   :  { %v957_v53 = vsel %vm2996_vm8, %v955_v9, 0.0  ;;  %v958_v27 = vsel %vm3000_vm12, %v956_v6, 0.0 }
 0x228   :  { %1260 = vrot.lane.b32.xlu1 %v2859_v20, %s2009_s20  ;;  %1249 = vperm.xlu0 %1934, %v1836_v37  }
 0x22a   :  { %1577 = vrot.lane.b32.xlu2 %v2861_v45, %s1983_s30  ;;  %v964_v22 = vpop.permute.xlu1 %963  ;;  %v962_v11 = vpop.permute.xlu0 %961 }
 0x22b   :  { %v966_v8 = vsel %vm965_vm7, %v962_v11, %v964_v22  ;;  %v967_v59 = vsel %vm965_vm7, %v964_v22, %v962_v11  ;;  %v1840_v11 = vld [vmem:[%s3687_s5 + $0x108] sm:$0xff]  ;;  %vm1043_vm7 = vcmp.lt.s32.totalorder %v2365_v52, 42 }
 0x22c   :  { %v973_v48 = vmul.f32 %v3114_v42, %v967_v59  ;;  %v974_v60 = vmul.f32 %v3114_v42, %v966_v8  ;;  %v3292_v19 = vpop.permute.xlu2 %1138 }
 0x22e   :  { %v975_v38 = vsel %vm2982_vm4, %v973_v48, 0.0  ;;  %v976_v57 = vsel %vm2986_vm5, %v974_v60, 0.0 }
 0x22f   :  { %v977_v18 = vadd.f32 %v975_v38, %v957_v53  ;;  %v978_v42 = vadd.f32 %v976_v57, %v958_v27 }
 0x230   :  { %1280 = vrot.lane.b32.xlu1 %v2859_v20, %s2011_s16  ;;  %1269 = vperm.xlu0 %1934, %v1837_v31   ;;  %s2033_s16 = smov 106   ;;  %v1670_v31 = vld [vmem:[%s3689_s7] sm:$0xff] }
 0x232   :  { %1594 = vrot.lane.b32.xlu2 %v2861_v45, %s2032_s29  ;;  %v984_v7 = vpop.permute.xlu1 %983  ;;  %v982_v51 = vpop.permute.xlu0 %981 }
 0x233   :  { %v986_v46 = vsel %vm985_vm10, %v982_v51, %v984_v7  ;;  %v987_v16 = vsel %vm985_vm10, %v984_v7, %v982_v51  ;;  %vm1077_vm10 = vcmp.ge.s32.totalorder %v3185_v24, 3  ;;  %v1841_v7 = vld [vmem:[%s3687_s5 + $0x110] sm:$0xff] }
 0x234   :  { %v993_v55 = vmul.f32 %v3125_v39, %v987_v16  ;;  %v994_v58 = vmul.f32 %v3125_v39, %v986_v46  ;;  %v3306_v37 = vpop.permute.xlu2 %1162 }
 0x236   :  { %v995_v0 = vsel %vm3004_vm2, %v993_v55, 0.0  ;;  %v996_v26 = vsel %vm3804_vm15, %v994_v58, 0.0  ;;  %v1857_v58 = vld [vmem:[%s3690_s8 + $0x8] sm:$0xff] }
 0x237   :  { %v997_v13 = vadd.f32 %v995_v0, %v977_v18  ;;  %v998_v28 = vadd.f32 %v996_v26, %v978_v42 }
 0x238   :  { %1298 = vrot.lane.b32.xlu1 %v2859_v20, %s2013_s18  ;;  %1289 = vperm.xlu0 %1934, %v1838_v63   ;;  %s2034_s18 = smov 103  }
 0x23a   :  { %1614 = vrot.lane.b32.xlu2 %v2861_v45, %s2033_s16  ;;  %v1004_v39 = vpop.permute.xlu1 %1003  ;;  %v1002_v61 = vpop.permute.xlu0 %1001 }
 0x23b   :  { %v1006_v34 = vsel %vm1005_vm0, %v1002_v61, %v1004_v39  ;;  %v1007_v36 = vsel %vm1005_vm0, %v1004_v39, %v1002_v61  ;;  %vm1078_vm0 = vcmp.lt.s32.totalorder %v3185_v24, 19 }
 0x23c   :  { %v1013_v44 = vmul.f32 %v3144_v17, %v1007_v36  ;;  %v1014_v47 = vmul.f32 %v3144_v17, %v1006_v34  ;;  %v3327_v42 = vpop.permute.xlu2 %1182  ;;  %v1842_v36 = vld [vmem:[%s3687_s5 + $0x118] sm:$0xff] }
 0x23e   :  { %v1015_v21 = vadd.f32 %v1013_v44, %v997_v13  ;;  %v1016_v4 = vadd.f32 %v1014_v47, %v998_v28 }
 0x240   :  { %1318 = vrot.lane.b32.xlu1 %v2859_v20, %s2015_s21  ;;  %1307 = vperm.xlu0 %1934, %v1839_v33  }
 0x242   :  { %1634 = vrot.lane.b32.xlu2 %v2861_v45, %s2034_s18  ;;  %v1022_v5 = vpop.permute.xlu1 %1021  ;;  %v1020_v35 = vpop.permute.xlu0 %1019 }
 0x243   :  { %v1024_v17 = vsel %vm1023_vm6, %v1020_v35, %v1022_v5  ;;  %v1025_v9 = vsel %vm1023_vm6, %v1022_v5, %v1020_v35  ;;  %vm1079_vm6 = vmand %vm1077_vm10, %vm1078_vm0  ;;  %v1860_v35 = vld [vmem:[%s3689_s7 + $0x18] sm:$0xff] }
 0x244   :  { %v1031_v6 = vmul.f32 %v3166_v1, %v1025_v9  ;;  %v1032_v22 = vmul.f32 %v3166_v1, %v1024_v17 }
 0x246   :  { %v1033_v8 = vsel %vm3805_vm3, %v1031_v6, 0.0  ;;  %v1034_v59 = vsel %vm3806_vm1, %v1032_v22, 0.0 }
 0x247   :  { %v1035_v48 = vadd.f32 %v1033_v8, %v1015_v21  ;;  %v1036_v60 = vadd.f32 %v1034_v59, %v1016_v4  ;;  %v3360_v4 = vpop.permute.xlu2 %1202 }
 0x248   :  { %1338 = vrot.lane.b32.xlu1 %v2859_v20, %s2017_s4  ;;  %1327 = vperm.xlu0 %1934, %v1840_v11  }
 0x24a   :  { %1673 = vperm.xlu2 %1933, %v1670_v31   ;;  %v1042_v1 = vpop.permute.xlu1 %1041  ;;  %v1040_v53 = vpop.permute.xlu0 %1039 }
 0x24b   :  { %v1044_v27 = vsel %vm1043_vm7, %v1040_v53, %v1042_v1  ;;  %v1045_v38 = vsel %vm1043_vm7, %v1042_v1, %v1040_v53  ;;  %vm1063_vm7 = vcmp.lt.s32.totalorder %v2365_v52, 39 }
 0x24c   :  { %v1051_v57 = vmul.f32 %v3192_v40, %v1045_v38  ;;  %v1052_v18 = vmul.f32 %v3192_v40, %v1044_v27  ;;  %v1080_v40 = vsel %vm1079_vm6, 1, %v3732_v14  ;;  %vm1095_vm6 = vcmp.lt.s32.totalorder %v2365_v52, 9 }
 0x24d   :  { %v1081_v0 = vperm.slane %v1080_v40, 0  ;;  %v1082_v26 = vperm.slane %v1080_v40, 1 }
 0x24e   :  { %v1053_v51 = vsel %vm3071_vm14, %v1051_v57, 0.0  ;;  %v1054_v46 = vsel %vm3075_vm9, %v1052_v18, 0.0 }
 0x24f   :  { %v1055_v16 = vadd.f32 %v1053_v51, %v1035_v48  ;;  %v1056_v55 = vadd.f32 %v1054_v46, %v1036_v60  ;;  %vm3348_vm10 = vcmp.eq.s32.totalorder %v1081_v0, 1  ;;  %vm3352_vm0 = vcmp.eq.s32.totalorder %v1082_v26, 1  ;;  %v1843_v60 = vld [vmem:[%s3687_s5 + $0x120] sm:$0xff]  ;;  %v3384_v31 = vpop.permute.xlu2 %1224 }
 0x250   :  { %1370 = vrot.lane.b32.xlu1 %v2859_v20, %s2019_s11  ;;  %1347 = vperm.xlu0 %1934, %v1841_v7   ;;  %v1844_v7 = vld [vmem:[%s3687_s5 + $0x128] sm:$0xff]  ;;  %s1775_s11 = sshll.u32 %s3692_s10, 4  ;;  %s1776_s11 = int_to_ptr.hbm [resolvable:$true] %s1775_s11 }
 0x252   :  { %1705 = vperm.xlu2 %1933, %v1857_v58   ;;  %v1062_v63 = vpop.permute.xlu1 %1061  ;;  %v1060_v13 = vpop.permute.xlu0 %1059 }
 0x253   :  { %v1064_v28 = vsel %vm1063_vm7, %v1060_v13, %v1062_v63  ;;  %v1065_v39 = vsel %vm1063_vm7, %v1062_v63, %v1060_v13  ;;  %vm1113_vm7 = vcmp.lt.s32.totalorder %v2365_v52, 6 }
 0x254   :  { %v1071_v61 = vmul.f32 %v3214_v56, %v1065_v39  ;;  %v1072_v34 = vmul.f32 %v3214_v56, %v1064_v28  ;;  %v1845_v39 = vld [vmem:[%s3687_s5 + $0x130] sm:$0xff] }
 0x256   :  { %v1073_v33 = vsel %vm3093_vm11, %v1071_v61, 0.0  ;;  %v1074_v21 = vsel %vm3097_vm13, %v1072_v34, 0.0 }
 0x257   :  { %v1075_v56 = vadd.f32 %v1073_v33, %v1055_v16  ;;  %v1076_v5 = vadd.f32 %v1074_v21, %v1056_v55  ;;  %v3404_v63 = vpop.permute.xlu2 %1242 }
 0x258   :  { %1388 = vrot.lane.b32.xlu1 %v2859_v20, %s2021_s12  ;;  %1379 = vperm.xlu0 %1934, %v1842_v36  }
 0x259   :  { %v1085_v17 = vsel %vm3348_vm10, %v1075_v56, 0.0  ;;  %v1086_v9 = vsel %vm3352_vm0, %v1076_v5, 0.0  ;;  %vm1133_vm10 = vcmp.lt.s32.totalorder %v2365_v52, 3  ;;  %vm1164_vm0 = vcmp.lt.s32.totalorder %v2365_v52, 125 }
 0x25a   :  { %1746 = vperm.xlu2 %1933, %v1860_v35   ;;  %v1094_v6 = vpop.permute.xlu1 %1093  ;;  %v1092_v22 = vpop.permute.xlu0 %1091  ;;  %v3373_v11 = vadd.f32 %v1085_v17, %v3242_v12  ;;  %v3376_v8 = vadd.f32 %v1086_v9, %v3244_v2  ;;  %v1846_v17 = vld [vmem:[%s3687_s5 + $0x138] sm:$0xff] }
 0x25b   :  { %v1096_v59 = vsel %vm1095_vm6, %v1092_v22, %v1094_v6  ;;  %v1097_v48 = vsel %vm1095_vm6, %v1094_v6, %v1092_v22  ;;  %vm1184_vm6 = vcmp.lt.s32.totalorder %v2365_v52, 122 }
 0x25c   :  { %v1103_v12 = vmul.f32 %v3248_v10, %v1097_v48  ;;  %v1104_v1 = vmul.f32 %v3248_v10, %v1096_v59 }
 0x25e   :  { %v1105_v51 = vsel %vm2996_vm8, %v1103_v12, 0.0  ;;  %v1106_v46 = vsel %vm3000_vm12, %v1104_v1, 0.0  ;;  %v1847_v1 = vld [vmem:[%s3687_s5 + $0x140] sm:$0xff] }
 0x25f   :  { %v3419_v56 = vpop.permute.xlu2 %1262 }
 0x260   :  { %1408 = vrot.lane.b32.xlu1 %v2859_v20, %s2023_s15  ;;  %1397 = vperm.xlu0 %1934, %v1843_v60  }
 0x262   :  { %v1112_v2 = vpop.permute.xlu1 %1111  ;;  %v1110_v53 = vpop.permute.xlu0 %1109 }
 0x263   :  { %v1114_v27 = vsel %vm1113_vm7, %v1110_v53, %v1112_v2  ;;  %v1115_v38 = vsel %vm1113_vm7, %v1112_v2, %v1110_v53  ;;  %vm1204_vm7 = vcmp.lt.s32.totalorder %v2365_v52, 119 }
 0x264   :  { %v1121_v57 = vmul.f32 %v3273_v29, %v1115_v38  ;;  %v1122_v18 = vmul.f32 %v3273_v29, %v1114_v27 }
 0x266   :  { %v1123_v10 = vsel %vm2982_vm4, %v1121_v57, 0.0  ;;  %v1124_v16 = vsel %vm2986_vm5, %v1122_v18, 0.0 }
 0x267   :  { %v1125_v55 = vadd.f32 %v1123_v10, %v1105_v51  ;;  %v1126_v58 = vadd.f32 %v1124_v16, %v1106_v46  ;;  %v3436_v27 = vpop.permute.xlu2 %1282  ;;  %v1848_v16 = vld [vmem:[%s3687_s5 + $0x148] sm:$0xff] }
 0x268   :  { %1428 = vrot.lane.b32.xlu1 %v2859_v20, %s1969_s25  ;;  %1417 = vperm.xlu0 %1934, %v1844_v7  }
 0x26a   :  { %v1132_v29 = vpop.permute.xlu1 %1131  ;;  %v1130_v40 = vpop.permute.xlu0 %1129 }
 0x26b   :  { %v1134_v0 = vsel %vm1133_vm10, %v1130_v40, %v1132_v29  ;;  %v1135_v26 = vsel %vm1133_vm10, %v1132_v29, %v1130_v40  ;;  %vm1226_vm10 = vcmp.lt.s32.totalorder %v2365_v52, 89 }
 0x26c   :  { %v1141_v13 = vmul.f32 %v3292_v19, %v1135_v26  ;;  %v1142_v28 = vmul.f32 %v3292_v19, %v1134_v0 }
 0x26e   :  { %v1143_v61 = vsel %vm3004_vm2, %v1141_v13, 0.0  ;;  %v1144_v34 = vsel %vm3804_vm15, %v1142_v28, 0.0 }
 0x26f   :  { %v1145_v36 = vadd.f32 %v1143_v61, %v1125_v55  ;;  %v1146_v44 = vadd.f32 %v1144_v34, %v1126_v58  ;;  %v1849_v34 = vld [vmem:[%s3687_s5 + $0x150] sm:$0xff] }
 0x270   :  { %1445 = vrot.lane.b32.xlu1 %v2859_v20, %s2026_s3  ;;  %1436 = vperm.xlu0 %1934, %v1845_v39  }
 0x272   :  { %v1161_v47 = vpop.permute.xlu1 %1160  ;;  %v1152_v33 = vpop.permute.xlu0 %1151 }
 0x273   :  { %v1154_v19 = vmul.f32 %v1152_v33, %v2859_v20  ;;  %v1155_v21 = vmul.f32 %v1152_v33, %v2861_v45  ;;  %v1165_v9 = vsel %vm1164_vm0, %v1161_v47, %v3306_v37  ;;  %v1166_v6 = vsel %vm1164_vm0, %v3306_v37, %v1161_v47 }
 0x274   :  { %vm1244_vm0 = vcmp.lt.s32.totalorder %v2365_v52, 86 }
 0x275   :  { %v1156_v5 = vadd.f32 %v1154_v19, %v1145_v36  ;;  %v1157_v35 = vadd.f32 %v1155_v21, %v1146_v44 }
 0x278   :  { %1465 = vrot.lane.b32.xlu1 %v2859_v20, %s2027_s28  ;;  %1454 = vperm.xlu0 %1934, %v1846_v17  }
 0x27a   :  { %v1181_v22 = vpop.permute.xlu1 %1180  ;;  %v1170_v45 = vpop.permute.xlu0 %1169 }
 0x27b   :  { %v1172_v59 = vmul.f32 %v1170_v45, %v1165_v9  ;;  %v1173_v48 = vmul.f32 %v1170_v45, %v1166_v6  ;;  %v1185_v37 = vsel %vm1184_vm6, %v1181_v22, %v3327_v42  ;;  %v1186_v38 = vsel %vm1184_vm6, %v3327_v42, %v1181_v22  ;;  %v3453_v42 = vpop.permute.xlu2 %1300 }
 0x27c   :  { %vm1264_vm6 = vcmp.lt.s32.totalorder %v2365_v52, 83 }
 0x27d   :  { %v1174_v60 = vsel %vm3805_vm3, %v1172_v59, 0.0  ;;  %v1175_v12 = vsel %vm3806_vm1, %v1173_v48, 0.0 }
 0x27e   :  { %v1176_v2 = vadd.f32 %v1174_v60, %v1156_v5  ;;  %v1177_v53 = vadd.f32 %v1175_v12, %v1157_v35 }
 0x280   :  { %1485 = vrot.lane.b32.xlu1 %v2859_v20, %s2028_s24  ;;  %1474 = vperm.xlu0 %1934, %v1847_v1  }
 0x282   :  { %v1201_v57 = vpop.permute.xlu1 %1200  ;;  %v1190_v18 = vpop.permute.xlu0 %1189 }
 0x283   :  { %v1192_v7 = vmul.f32 %v1190_v18, %v1185_v37  ;;  %v1193_v51 = vmul.f32 %v1190_v18, %v1186_v38  ;;  %v1205_v29 = vsel %vm1204_vm7, %v1201_v57, %v3360_v4  ;;  %v1206_v40 = vsel %vm1204_vm7, %v3360_v4, %v1201_v57  ;;  %v3475_v35 = vpop.permute.xlu2 %1320 }
 0x284   :  { %vm1284_vm7 = vcmp.lt.s32.totalorder %v2365_v52, 80 }
 0x285   :  { %v1194_v46 = vsel %vm3071_vm14, %v1192_v7, 0.0  ;;  %v1195_v10 = vsel %vm3075_vm9, %v1193_v51, 0.0 }
 0x286   :  { %v1196_v55 = vadd.f32 %v1194_v46, %v1176_v2  ;;  %v1197_v58 = vadd.f32 %v1195_v10, %v1177_v53 }
 0x288   :  { %1517 = vrot.lane.b32.xlu1 %v2859_v20, %s2029_s23  ;;  %1494 = vperm.xlu0 %1934, %v1848_v16  }
 0x28a   :  { %v1223_v0 = vpop.permute.xlu1 %1222  ;;  %v1210_v26 = vpop.permute.xlu0 %1209 }
 0x28b   :  { %v1212_v13 = vmul.f32 %v1210_v26, %v1205_v29  ;;  %v1213_v28 = vmul.f32 %v1210_v26, %v1206_v40  ;;  %v1227_v33 = vsel %vm1226_vm10, %v1223_v0, %v3384_v31  ;;  %v1228_v19 = vsel %vm1226_vm10, %v3384_v31, %v1223_v0  ;;  %v3485_v48 = vpop.permute.xlu2 %1340 }
 0x28c   :  { %vm1302_vm10 = vcmp.lt.s32.totalorder %v2365_v52, 77 }
 0x28d   :  { %v1214_v39 = vsel %vm3093_vm11, %v1212_v13, 0.0  ;;  %v1215_v61 = vsel %vm3097_vm13, %v1213_v28, 0.0 }
 0x28e   :  { %v1216_v36 = vadd.f32 %v1214_v39, %v1196_v55  ;;  %v1217_v44 = vadd.f32 %v1215_v61, %v1197_v58  ;;  %v1852_v55 = vld [vmem:[%s3687_s5 + $0x168] sm:$0xff] }
 0x290   :  { %v3466_v4 = vadd.f32 %v1216_v36, %v3373_v11  ;;  %v3469_v47 = vadd.f32 %v1217_v44, %v3376_v8  ;;  %1535 = vrot.lane.b32.xlu1 %v2859_v20, %s2030_s14  ;;  %1526 = vperm.xlu0 %1934, %v1849_v34   ;;  %v1850_v11 = vld [vmem:[%s3687_s5 + $0x158] sm:$0xff]  ;;  %v1853_v36 = vld [vmem:[%s3687_s5 + $0x170] sm:$0xff] }
 0x292   :  { %v1241_v21 = vpop.permute.xlu1 %1240  ;;  %v1232_v5 = vpop.permute.xlu0 %1231 }
 0x293   :  { %v1234_v17 = vmul.f32 %v1232_v5, %v1227_v33  ;;  %v1235_v9 = vmul.f32 %v1232_v5, %v1228_v19  ;;  %v1245_v8 = vsel %vm1244_vm0, %v1241_v21, %v3404_v63  ;;  %v1246_v31 = vsel %vm1244_vm0, %v3404_v63, %v1241_v21  ;;  %v1851_v63 = vld [vmem:[%s3687_s5 + $0x160] sm:$0xff]  ;;  %v3510_v40 = vpop.permute.xlu2 %1372 }
 0x294   :  { %vm1322_vm0 = vcmp.lt.s32.totalorder %v2365_v52, 74 }
 0x295   :  { %v1236_v60 = vsel %vm2996_vm8, %v1234_v17, 0.0  ;;  %v1237_v12 = vsel %vm3000_vm12, %v1235_v9, 0.0 }
 0x298   :  { %1555 = vrot.lane.b32.xlu1 %v2859_v20, %s2031_s19  ;;  %1544 = vperm.xlu0 %1934, %v1850_v11  }
 0x29a   :  { %v1261_v6 = vpop.permute.xlu1 %1260  ;;  %v1250_v22 = vpop.permute.xlu0 %1249 }
 0x29b   :  { %v1252_v45 = vmul.f32 %v1250_v22, %v1245_v8  ;;  %v1253_v59 = vmul.f32 %v1250_v22, %v1246_v31  ;;  %v1265_v38 = vsel %vm1264_vm6, %v1261_v6, %v3419_v56  ;;  %v1266_v57 = vsel %vm1264_vm6, %v3419_v56, %v1261_v6  ;;  %v3523_v44 = vpop.permute.xlu2 %1390  ;;  %v1854_v8 = vld [vmem:[%s3687_s5 + $0x178] sm:$0xff] }
 0x29c   :  { %vm1356_vm6 = vcmp.ge.s32.totalorder %v3185_v24, 4294967293 }
 0x29d   :  { %v1254_v1 = vsel %vm2982_vm4, %v1252_v45, 0.0  ;;  %v1255_v2 = vsel %vm2986_vm5, %v1253_v59, 0.0 }
 0x29e   :  { %v1256_v53 = vadd.f32 %v1254_v1, %v1236_v60  ;;  %v1257_v37 = vadd.f32 %v1255_v2, %v1237_v12 }
 0x2a0   :  { %1575 = vrot.lane.b32.xlu1 %v2859_v20, %s1983_s30  ;;  %1564 = vperm.xlu0 %1934, %v1851_v63   ;;  %v1662_v63 = vld [vmem:[%s3688_s6] sm:$0xff] }
 0x2a2   :  { %v1281_v18 = vpop.permute.xlu1 %1280  ;;  %v1270_v7 = vpop.permute.xlu0 %1269 }
 0x2a3   :  { %v1272_v51 = vmul.f32 %v1270_v7, %v1265_v38  ;;  %v1273_v46 = vmul.f32 %v1270_v7, %v1266_v57  ;;  %v1285_v56 = vsel %vm1284_vm7, %v1281_v18, %v3436_v27  ;;  %v1286_v0 = vsel %vm1284_vm7, %v3436_v27, %v1281_v18  ;;  %v3541_v60 = vpop.permute.xlu2 %1410 }
 0x2a4   :  { %vm1357_vm7 = vcmp.lt.s32.totalorder %v3185_v24, 13 }
 0x2a5   :  { %v1274_v10 = vsel %vm3004_vm2, %v1272_v51, 0.0  ;;  %v1275_v16 = vsel %vm3804_vm15, %v1273_v46, 0.0 }
 0x2a6   :  { %v1276_v58 = vadd.f32 %v1274_v10, %v1256_v53  ;;  %v1277_v29 = vadd.f32 %v1275_v16, %v1257_v37 }
 0x2a8   :  { %1592 = vrot.lane.b32.xlu1 %v2859_v20, %s2032_s29  ;;  %1583 = vperm.xlu0 %1934, %v1852_v55  }
 0x2aa   :  { %v1299_v26 = vpop.permute.xlu1 %1298  ;;  %v1290_v13 = vpop.permute.xlu0 %1289 }
 0x2ab   :  { %v1292_v28 = vmul.f32 %v1290_v13, %v1285_v56  ;;  %v1293_v39 = vmul.f32 %v1290_v13, %v1286_v0  ;;  %v1303_v27 = vsel %vm1302_vm10, %v1299_v26, %v3453_v42  ;;  %v1304_v33 = vsel %vm1302_vm10, %v3453_v42, %v1299_v26  ;;  %vm1358_vm10 = vmand %vm1356_vm6, %vm1357_vm7  ;;  %v1856_v0 = vld [vmem:[%s3689_s7 + $0x8] sm:$0xff] }
 0x2ac   :  { %v1359_v38 = vsel %vm1358_vm10, 1, %v3732_v14  ;;  %vm1374_vm10 = vcmp.lt.s32.totalorder %v2365_v52, 41 }
 0x2ad   :  { %v1294_v61 = vadd.f32 %v1292_v28, %v1276_v58  ;;  %v1295_v34 = vadd.f32 %v1293_v39, %v1277_v29  ;;  %v1360_v57 = vperm.slane %v1359_v38, 0  ;;  %v1361_v18 = vperm.slane %v1359_v38, 1  ;;  %v1431_v58 = vpop.permute.xlu2 %1430 }
 0x2af   :  { %vm1362_vm6 = vcmp.eq.s32.totalorder %v1360_v57, 1  ;;  %vm1363_vm7 = vcmp.eq.s32.totalorder %v1361_v18, 1 }
 0x2b0   :  { %1612 = vrot.lane.b32.xlu1 %v2859_v20, %s2033_s16  ;;  %1601 = vperm.xlu0 %1934, %v1853_v36  }
 0x2b2   :  { %v1319_v19 = vpop.permute.xlu1 %1318  ;;  %v1308_v21 = vpop.permute.xlu0 %1307 }
 0x2b3   :  { %v1310_v5 = vmul.f32 %v1308_v21, %v1303_v27  ;;  %v1311_v17 = vmul.f32 %v1308_v21, %v1304_v33  ;;  %v1323_v42 = vsel %vm1322_vm0, %v1319_v19, %v3475_v35  ;;  %v1324_v22 = vsel %vm1322_vm0, %v3475_v35, %v1319_v19  ;;  %v1855_v35 = vld [vmem:[%s3687_s5 + $0x180] sm:$0xff] }
 0x2b4   :  { %vm1342_vm0 = vcmp.lt.s32.totalorder %v2365_v52, 71 }
 0x2b5   :  { %v1312_v9 = vsel %vm3805_vm3, %v1310_v5, 0.0  ;;  %v1313_v11 = vsel %vm3806_vm1, %v1311_v17, 0.0  ;;  %v1859_v17 = vld [vmem:[%s3690_s8 + $0x10] sm:$0xff] }
 0x2b6   :  { %v1314_v31 = vadd.f32 %v1312_v9, %v1294_v61  ;;  %v1315_v6 = vadd.f32 %v1313_v11, %v1295_v34  ;;  %v1448_v9 = vpop.permute.xlu2 %1447 }
 0x2b8   :  { %1632 = vrot.lane.b32.xlu1 %v2859_v20, %s2034_s18  ;;  %1621 = vperm.xlu0 %1934, %v1854_v8  }
 0x2ba   :  { %v1339_v45 = vpop.permute.xlu1 %1338  ;;  %v1328_v59 = vpop.permute.xlu0 %1327 }
 0x2bb   :  { %v1330_v12 = vmul.f32 %v1328_v59, %v1323_v42  ;;  %v1331_v1 = vmul.f32 %v1328_v59, %v1324_v22  ;;  %v1343_v7 = vsel %vm1342_vm0, %v1339_v45, %v3485_v48  ;;  %v1344_v51 = vsel %vm1342_vm0, %v3485_v48, %v1339_v45  ;;  %v1678_v48 = vld [vmem:[%s3691_s9] sm:$0xff] }
 0x2bc   :  { %vm1392_vm0 = vcmp.lt.s32.totalorder %v2365_v52, 38 }
 0x2bd   :  { %v1332_v2 = vsel %vm3071_vm14, %v1330_v12, 0.0  ;;  %v1333_v20 = vsel %vm3075_vm9, %v1331_v1, 0.0 }
 0x2be   :  { %v1334_v53 = vadd.f32 %v1332_v2, %v1314_v31  ;;  %v1335_v37 = vadd.f32 %v1333_v20, %v1315_v6  ;;  %v1468_v2 = vpop.permute.xlu2 %1467 }
 0x2c0   :  { %1665 = vperm.xlu1 %1932, %v1662_v63   ;;  %1641 = vperm.xlu0 %1934, %v1855_v35  }
 0x2c2   :  { %v1371_v46 = vpop.permute.xlu1 %1370  ;;  %v1348_v10 = vpop.permute.xlu0 %1347 }
 0x2c3   :  { %v1350_v16 = vmul.f32 %v1348_v10, %v1343_v7  ;;  %v1351_v55 = vmul.f32 %v1348_v10, %v1344_v51  ;;  %v1375_v36 = vsel %vm1374_vm10, %v1371_v46, %v3510_v40  ;;  %v1376_v27 = vsel %vm1374_vm10, %v3510_v40, %v1371_v46 }
 0x2c4   :  { %vm3811_vm10 = vcmp.lt.s32.totalorder %v2365_v52, 32 }
 0x2c5   :  { %v1352_v29 = vsel %vm3093_vm11, %v1350_v16, 0.0  ;;  %v1353_v56 = vsel %vm3097_vm13, %v1351_v55, 0.0 }
 0x2c6   :  { %v1354_v26 = vadd.f32 %v1352_v29, %v1334_v53  ;;  %v1355_v13 = vadd.f32 %v1353_v56, %v1335_v37  ;;  %v1488_v55 = vpop.permute.xlu2 %1487 }
 0x2c8   :  { %v1364_v28 = vsel %vm1362_vm6, %v1354_v26, 0.0  ;;  %v1365_v39 = vsel %vm1363_vm7, %v1355_v13, 0.0  ;;  %1694 = vperm.xlu1 %1932, %v1856_v0   ;;  %1681 = vperm.xlu0 %1934, %v1678_v48   ;;  %vm1412_vm6 = vcmp.lt.s32.totalorder %v2365_v52, 35  ;;  %vm1449_vm7 = vcmp.lt.s32.totalorder %v2365_v52, 29 }
 0x2c9   :  { %v3569_v61 = vadd.f32 %v1364_v28, %v3466_v4  ;;  %v3572_v34 = vadd.f32 %v1365_v39, %v3469_v47  ;;  %v1858_v4 = vld [vmem:[%s3689_s7 + $0x10] sm:$0xff] }
 0x2ca   :  { %v1389_v33 = vpop.permute.xlu1 %1388  ;;  %v1380_v19 = vpop.permute.xlu0 %1379 }
 0x2cb   :  { %v1382_v21 = vmul.f32 %v1380_v19, %v1375_v36  ;;  %v1383_v5 = vmul.f32 %v1380_v19, %v1376_v27  ;;  %v1393_v47 = vsel %vm1392_vm0, %v1389_v33, %v3523_v44  ;;  %v1394_v40 = vsel %vm1392_vm0, %v3523_v44, %v1389_v33  ;;  %v1861_v44 = vld [vmem:[%s3690_s8 + $0x18] sm:$0xff]  ;;  %vm3812_vm0 = vmmov %vm3811_vm10 }
 0x2cd   :  { %v1384_v42 = vsel %vm2996_vm8, %v1382_v21, 0.0  ;;  %v1385_v22 = vsel %vm3000_vm12, %v1383_v5, 0.0 }
 0x2ce   :  { %v1520_v19 = vpop.permute.xlu2 %1519 }
 0x2d0   :  { %1731 = vperm.xlu1 %1932, %v1859_v17   ;;  %1720 = vperm.xlu0 %1934, %v1858_v4  }
 0x2d2   :  { %v1409_v11 = vpop.permute.xlu1 %1408  ;;  %v1398_v8 = vpop.permute.xlu0 %1397 }
 0x2d3   :  { %v1400_v31 = vmul.f32 %v1398_v8, %v1393_v47  ;;  %v1401_v6 = vmul.f32 %v1398_v8, %v1394_v40  ;;  %v1413_v20 = vsel %vm1412_vm6, %v1409_v11, %v3541_v60  ;;  %v1414_v63 = vsel %vm1412_vm6, %v3541_v60, %v1409_v11 }
 0x2d4   :  { %vm1469_vm6 = vcmp.lt.s32.totalorder %v2365_v52, 26 }
 0x2d5   :  { %v1402_v45 = vsel %vm2982_vm4, %v1400_v31, 0.0  ;;  %v1403_v59 = vsel %vm2986_vm5, %v1401_v6, 0.0 }
 0x2d6   :  { %v1404_v12 = vadd.f32 %v1402_v45, %v1384_v42  ;;  %v1405_v1 = vadd.f32 %v1403_v59, %v1385_v22  ;;  %v1538_v45 = vpop.permute.xlu2 %1537 }
 0x2d8   :  { %1757 = vperm.xlu0 %1934, %v1861_v44  }
 0x2da   :  { %v1429_v35 = vpop.permute.xlu1 %1428  ;;  %v1418_v53 = vpop.permute.xlu0 %1417 }
 0x2db   :  { %v1420_v37 = vmul.f32 %v1418_v53, %v1413_v20  ;;  %v1421_v38 = vmul.f32 %v1418_v53, %v1414_v63  ;;  %v1432_v46 = vsel %vm3811_vm10, %v1429_v35, %v1431_v58  ;;  %v1433_v60 = vsel %vm3812_vm0, %v1431_v58, %v1429_v35 }
 0x2dc   :  { %vm1504_vm10 = vcmp.lt.s32.totalorder %v3185_v24, 10 }
 0x2dd   :  { %v1422_v57 = vsel %vm3004_vm2, %v1420_v37, 0.0  ;;  %v1423_v18 = vsel %vm3804_vm15, %v1421_v38, 0.0 }
 0x2de   :  { %v1424_v7 = vadd.f32 %v1422_v57, %v1404_v12  ;;  %v1425_v51 = vadd.f32 %v1423_v18, %v1405_v1 }
 0x2e2   :  { %v1446_v10 = vpop.permute.xlu1 %1445  ;;  %v1437_v16 = vpop.permute.xlu0 %1436 }
 0x2e3   :  { %v1450_v29 = vsel %vm1449_vm7, %v1446_v10, %v1448_v9  ;;  %v1451_v56 = vsel %vm1449_vm7, %v1448_v9, %v1446_v10  ;;  %v1439_v0 = vmul.f32 %v1437_v16, %v1432_v46  ;;  %v1440_v48 = vmul.f32 %v1437_v16, %v1433_v60 }
 0x2e4   :  { %vm1503_vm7 = vcmp.ge.s32.totalorder %v3185_v24, 4294967290 }
 0x2e5   :  { %v1441_v26 = vadd.f32 %v1439_v0, %v1424_v7  ;;  %v1442_v13 = vadd.f32 %v1440_v48, %v1425_v51  ;;  %vm1505_vm0 = vmand %vm1503_vm7, %vm1504_vm10  ;;  %v1558_v7 = vpop.permute.xlu2 %1557  ;;  %vm1521_vm10 = vcmp.lt.s32.totalorder %v2365_v52, 121 }
 0x2e6   :  { %v1506_v22 = vsel %vm1505_vm0, 1, %v3732_v14  ;;  %vm1559_vm0 = vcmp.lt.s32.totalorder %v2365_v52, 115 }
 0x2e7   :  { %v1507_v24 = vperm.slane %v1506_v22, 0  ;;  %v1508_v59 = vperm.slane %v1506_v22, 1 }
 0x2e9   :  { %vm1510_vm7 = vcmp.eq.s32.totalorder %v1508_v59, 1 }
 0x2ea   :  { %v1466_v28 = vpop.permute.xlu1 %1465  ;;  %v1455_v39 = vpop.permute.xlu0 %1454 }
 0x2eb   :  { %v1471_v36 = vsel %vm1469_vm6, %v1468_v2, %v1466_v28  ;;  %v1457_v27 = vmul.f32 %v1455_v39, %v1450_v29  ;;  %v1458_v33 = vmul.f32 %v1455_v39, %v1451_v56  ;;  %v1470_v4 = vsel %vm1469_vm6, %v1466_v28, %v1468_v2 }
 0x2ec   :  { %vm1509_vm6 = vcmp.eq.s32.totalorder %v1507_v24, 1 }
 0x2ed   :  { %v1459_v58 = vsel %vm3805_vm3, %v1457_v27, 0.0  ;;  %v1460_v21 = vsel %vm3806_vm1, %v1458_v33, 0.0  ;;  %vm1489_vm1 = vcmp.lt.s32.totalorder %v2365_v52, 23  ;;  %v1578_v29 = vpop.permute.xlu2 %1577 }
 0x2ee   :  { %v1461_v5 = vadd.f32 %v1459_v58, %v1441_v26  ;;  %v1462_v17 = vadd.f32 %v1460_v21, %v1442_v13 }
 0x2f2   :  { %v1486_v9 = vpop.permute.xlu1 %1485  ;;  %v1475_v47 = vpop.permute.xlu0 %1474 }
 0x2f3   :  { %v1477_v40 = vmul.f32 %v1475_v47, %v1470_v4  ;;  %v1478_v11 = vmul.f32 %v1475_v47, %v1471_v36  ;;  %v1490_v44 = vsel %vm1489_vm1, %v1486_v9, %v1488_v55  ;;  %v1491_v12 = vsel %vm1489_vm1, %v1488_v55, %v1486_v9 }
 0x2f4   :  { %vm1539_vm1 = vcmp.lt.s32.totalorder %v2365_v52, 118 }
 0x2f5   :  { %v1479_v8 = vsel %vm3071_vm14, %v1477_v40, 0.0  ;;  %v1480_v31 = vsel %vm3075_vm9, %v1478_v11, 0.0  ;;  %v1595_v48 = vpop.permute.xlu2 %1594 }
 0x2f6   :  { %v1481_v6 = vadd.f32 %v1479_v8, %v1461_v5  ;;  %v1482_v42 = vadd.f32 %v1480_v31, %v1462_v17 }
 0x2fa   :  { %v1518_v1 = vpop.permute.xlu1 %1517  ;;  %v1495_v2 = vpop.permute.xlu0 %1494 }
 0x2fb   :  { %v1497_v20 = vmul.f32 %v1495_v2, %v1490_v44  ;;  %v1498_v63 = vmul.f32 %v1495_v2, %v1491_v12  ;;  %v1522_v58 = vsel %vm1521_vm10, %v1518_v1, %v1520_v19  ;;  %v1523_v21 = vsel %vm1521_vm10, %v1520_v19, %v1518_v1 }
 0x2fd   :  { %v1499_v35 = vsel %vm3093_vm11, %v1497_v20, 0.0  ;;  %v1500_v53 = vsel %vm3097_vm13, %v1498_v63, 0.0  ;;  %v1615_v28 = vpop.permute.xlu2 %1614 }
 0x2fe   :  { %v1501_v37 = vadd.f32 %v1499_v35, %v1481_v6  ;;  %v1502_v38 = vadd.f32 %v1500_v53, %v1482_v42  ;;  %v1937_v6 = vld [vmem:[%s3683_s1] sm:$0x3]  ;;  %s2035_s1 = smov [#allocation2]  }
 0x2ff   :  { %s1773_s24 = sshll.u32 %s2035_s1, 4  ;;  %s1774_s24 = int_to_ptr.vmem [resolvable:$true] %s1773_s24 }
 0x300   :  { %v1511_v57 = vsel %vm1509_vm6, %v1501_v37, 0.0  ;;  %v1512_v18 = vsel %vm1510_vm7, %v1502_v38, 0.0  ;;  %vm1596_vm6 = vcmp.lt.s32.totalorder %v2365_v52, 109  ;;  %vm1650_vm7 = vcmp.ge.s32.totalorder %v1937_v6, 4294967287 }
 0x301   :  { %v3626_v51 = vadd.f32 %v1511_v57, %v3569_v61  ;;  %v3629_v46 = vadd.f32 %v1512_v18, %v3572_v34 }
 0x302   :  { %v1536_v60 = vpop.permute.xlu1 %1535  ;;  %v1527_v10 = vpop.permute.xlu0 %1526 }
 0x303   :  { %v1540_v61 = vsel %vm1539_vm1, %v1536_v60, %v1538_v45  ;;  %v1541_v39 = vsel %vm1539_vm1, %v1538_v45, %v1536_v60  ;;  %v1529_v5 = vmul.f32 %v1527_v10, %v1523_v21  ;;  %v1530_v17 = vmul.f32 %v1527_v10, %v1522_v58 }
 0x304   :  { %vm1651_vm1 = vcmp.lt.s32.totalorder %v1937_v6, 7 }
 0x305   :  { %v1531_v31 = vsel %vm2996_vm8, %v1529_v5, 0.0  ;;  %v1532_v19 = vsel %vm3000_vm12, %v1530_v17, 0.0  ;;  %v1635_v23 = vpop.permute.xlu2 %1634  ;;  %vm1652_vm8 = vmand %vm1650_vm7, %vm1651_vm1  ;;  %vm3815_vm12 = vnez %v3791_v41 }
 0x30a   :  { %v1556_v16 = vpop.permute.xlu1 %1555  ;;  %v1545_v55 = vpop.permute.xlu0 %1544 }
 0x30b   :  { %v1547_v36 = vmul.f32 %v1545_v55, %v1541_v39  ;;  %v1548_v34 = vmul.f32 %v1545_v55, %v1540_v61  ;;  %v1560_v4 = vsel %vm1559_vm0, %v1556_v16, %v1558_v7  ;;  %v1561_v9 = vsel %vm1559_vm0, %v1558_v7, %v1556_v16 }
 0x30c   :  { %v1653_v7 = vsel %vm1652_vm8, 1, %v3732_v14 }
 0x30d   :  { %v1549_v47 = vsel %vm2982_vm4, %v1547_v36, 0.0  ;;  %v1550_v40 = vsel %vm2986_vm5, %v1548_v34, 0.0  ;;  %vm1616_vm4 = vcmp.lt.s32.totalorder %v2365_v52, 106  ;;  %vm3813_vm5 = vcmp.lt.s32.totalorder %v2365_v52, 112  ;;  %v1674_v61 = vpop.permute.xlu2 %1673 }
 0x30e   :  { %v1551_v42 = vadd.f32 %v1549_v47, %v1531_v31  ;;  %v1552_v50 = vadd.f32 %v1550_v40, %v1532_v19  ;;  %vm3814_vm10 = vmmov %vm3813_vm5 }
 0x312   :  { %v1576_v56 = vpop.permute.xlu1 %1575  ;;  %v1565_v0 = vpop.permute.xlu0 %1564 }
 0x313   :  { %v1567_v11 = vmul.f32 %v1565_v0, %v1561_v9  ;;  %v1568_v8 = vmul.f32 %v1565_v0, %v1560_v4  ;;  %v1579_v22 = vsel %vm3813_vm5, %v1576_v56, %v1578_v29  ;;  %v1580_v62 = vsel %vm3814_vm10, %v1578_v29, %v1576_v56 }
 0x314   :  { %v1654_v29 = vperm.slane %v1653_v7, 0  ;;  %v1655_v56 = vperm.slane %v1653_v7, 1 }
 0x315   :  { %v1569_v44 = vsel %vm3004_vm2, %v1567_v11, 0.0  ;;  %v1570_v12 = vsel %vm3804_vm15, %v1568_v8, 0.0  ;;  %vm1636_vm2 = vcmp.lt.s32.totalorder %v2365_v52, 103  ;;  %v1706_v8 = vpop.permute.xlu2 %1705 }
 0x316   :  { %v1571_v57 = vadd.f32 %v1569_v44, %v1551_v42  ;;  %v1572_v18 = vadd.f32 %v1570_v12, %v1552_v50  ;;  %vm1656_vm15 = vcmp.eq.s32.totalorder %v1654_v29, 1 }
 0x31a   :  { %v1593_v26 = vpop.permute.xlu1 %1592  ;;  %v1584_v13 = vpop.permute.xlu0 %1583 }
 0x31b   :  { %v1597_v45 = vsel %vm1596_vm6, %v1593_v26, %v1595_v48  ;;  %v1598_v54 = vsel %vm1596_vm6, %v1595_v48, %v1593_v26  ;;  %v1586_v20 = vmul.f32 %v1584_v13, %v1580_v62  ;;  %v1587_v63 = vmul.f32 %v1584_v13, %v1579_v22 }
 0x31d   :  { %v1588_v60 = vadd.f32 %v1586_v20, %v1571_v57  ;;  %v1589_v10 = vadd.f32 %v1587_v63, %v1572_v18  ;;  %v1747_v18 = vpop.permute.xlu2 %1746 }
 0x322   :  { %v1613_v27 = vpop.permute.xlu1 %1612  ;;  %v1602_v33 = vpop.permute.xlu0 %1601 }
 0x323   :  { %v1604_v1 = vmul.f32 %v1602_v33, %v1598_v54  ;;  %v1605_v2 = vmul.f32 %v1602_v33, %v1597_v45  ;;  %v1617_v35 = vsel %vm1616_vm4, %v1613_v27, %v1615_v28  ;;  %v1618_v53 = vsel %vm1616_vm4, %v1615_v28, %v1613_v27 }
 0x325   :  { %v1606_v30 = vsel %vm3805_vm3, %v1604_v1, 0.0  ;;  %v1607_v25 = vsel %vm3815_vm12, %v1605_v2, 0.0  ;;  %vm1657_vm3 = vcmp.eq.s32.totalorder %v1655_v56, 1 }
 0x326   :  { %v1608_v0 = vadd.f32 %v1606_v30, %v1588_v60  ;;  %v1609_v14 = vadd.f32 %v1607_v25, %v1589_v10 }
 0x32a   :  { %v1633_v24 = vpop.permute.xlu1 %1632  ;;  %v1622_v59 = vpop.permute.xlu0 %1621 }
 0x32b   :  { %v1624_v37 = vmul.f32 %v1622_v59, %v1618_v53  ;;  %v1625_v38 = vmul.f32 %v1622_v59, %v1617_v35  ;;  %v1637_v48 = vsel %vm1636_vm2, %v1633_v24, %v1635_v23  ;;  %v1638_v32 = vsel %vm1636_vm2, %v1635_v23, %v1633_v24 }
 0x32d   :  { %v1626_v16 = vsel %vm3071_vm14, %v1624_v37, 0.0  ;;  %v1627_v55 = vsel %vm3075_vm9, %v1625_v38, 0.0 }
 0x32e   :  { %v1628_v52 = vadd.f32 %v1626_v16, %v1608_v0  ;;  %v1629_v39 = vadd.f32 %v1627_v55, %v1609_v14 }
 0x332   :  { %v1666_v26 = vpop.permute.xlu1 %1665  ;;  %v1642_v13 = vpop.permute.xlu0 %1641 }
 0x333   :  { %v1644_v41 = vmul.f32 %v1642_v13, %v1638_v32  ;;  %v1645_v28 = vmul.f32 %v1642_v13, %v1637_v48 }
 0x335   :  { %v1646_v49 = vsel %vm3093_vm11, %v1644_v41, 0.0  ;;  %v1647_v3 = vsel %vm3097_vm13, %v1645_v28, 0.0  ;;  %v1939_v41 = vld [vmem:[%s3682_s0 + $0x8] sm:$0xff] }
 0x336   :  { %v1648_v36 = vadd.f32 %v1646_v49, %v1628_v52  ;;  %v1649_v34 = vadd.f32 %v1647_v3, %v1629_v39 }
 0x338   :  { %v1658_v27 = vsel %vm1656_vm15, %v1648_v36, 0.0  ;;  %v1659_v33 = vsel %vm1657_vm3, %v1649_v34, 0.0 }
 0x339   :  { %v1660_v58 = vadd.f32 %v1658_v27, %v3626_v51  ;;  %v1661_v21 = vadd.f32 %v1659_v33, %v3629_v46 }
 0x33a   :  { %v1695_v5 = vpop.permute.xlu1 %1694  ;;  %v1682_v17 = vpop.permute.xlu0 %1681 }
 0x33b   :  { %v1668_v4 = vadd.f32 %v1666_v26, %v1660_v58  ;;  %v1669_v9 = vadd.f32 %v1666_v26, %v1661_v21  ;;  %v1938_v26 = vld [vmem:[%s3682_s0] sm:$0xff] }
 0x33d   :  { %v1686_v47 = vrot.slane %v1668_v4, 1  ;;  %v1687_v40 = vrot.slane %v1669_v9, 1  ;;  %v1676_v11 = vmul.f32 %v1674_v61, %v1668_v4  ;;  %v1677_v15 = vmul.f32 %v1674_v61, %v1669_v9 }
 0x33e   :  { %v1688_v31 = vrot.slane %v1668_v4, 5  ;;  %v1689_v43 = vrot.slane %v1669_v9, 5  ;;  %v1712_v46 = vrot.slane %v1668_v4, 2  ;;  %v1713_v45 = vrot.slane %v1669_v9, 2 }
 0x33f   :  { %v1697_v19 = vmul.f32 %v1695_v5, %v1686_v47  ;;  %v1698_v6 = vmul.f32 %v1695_v5, %v1687_v40  ;;  %v1684_v23 = vadd.f32 %v1682_v17, %v1676_v11  ;;  %v1685_v42 = vadd.f32 %v1682_v17, %v1677_v15 }
 0x340   :  { %v1708_v51 = vmul.f32 %v1706_v8, %v1688_v31  ;;  %v1709_v62 = vmul.f32 %v1706_v8, %v1689_v43  ;;  %v1714_v12 = vrot.slane %v1668_v4, 6  ;;  %v1715_v1 = vrot.slane %v1669_v9, 6 }
 0x341   :  { %v1699_v50 = vadd.f32 %v1697_v19, %v1684_v23  ;;  %v1700_v22 = vadd.f32 %v1698_v6, %v1685_v42  ;;  %v1738_v63 = vrot.slane %v1668_v4, 3  ;;  %v1739_v35 = vrot.slane %v1669_v9, 3 }
 0x342   :  { %v1721_v54 = vpop.permute.xlu0 %1720  ;;  %v1732_v24 = vpop.permute.xlu1 %1731  ;;  %v1740_v25 = vrot.slane %v1668_v4, 7  ;;  %v1741_v60 = vrot.slane %v1669_v9, 7 }
 0x343   :  { %v1710_v59 = vadd.f32 %v1708_v51, %v1699_v50  ;;  %v1711_v44 = vadd.f32 %v1709_v62, %v1700_v22  ;;  %v1723_v2 = vmul.f32 %v1721_v54, %v1712_v46  ;;  %v1724_v20 = vmul.f32 %v1721_v54, %v1713_v45 }
 0x344   :  { %v1734_v53 = vmul.f32 %v1732_v24, %v1714_v12  ;;  %v1735_v37 = vmul.f32 %v1732_v24, %v1715_v1  ;;  %v1749_v10 = vmul.f32 %v1747_v18, %v1738_v63  ;;  %v1750_v16 = vmul.f32 %v1747_v18, %v1739_v35 }
 0x345   :  { %v1725_v38 = vadd.f32 %v1723_v2, %v1710_v59  ;;  %v1726_v57 = vadd.f32 %v1724_v20, %v1711_v44 }
 0x347   :  { %v1736_v7 = vadd.f32 %v1734_v53, %v1725_v38  ;;  %v1737_v30 = vadd.f32 %v1735_v37, %v1726_v57 }
 0x349   :  { %v1751_v29 = vadd.f32 %v1749_v10, %v1736_v7  ;;  %v1752_v56 = vadd.f32 %v1750_v16, %v1737_v30 }
 0x34a   :  { %v1758_v55 = vpop.permute.xlu0 %1757 }
 0x34b   :  { %v1760_v0 = vmul.f32 %v1758_v55, %v1740_v25  ;;  %v1761_v14 = vmul.f32 %v1758_v55, %v1741_v60 }
 0x34d   :  { %v1762_v48 = vadd.f32 %v1760_v0, %v1751_v29  ;;  %v1763_v32 = vadd.f32 %v1761_v14, %v1752_v56 }
 0x34f   :  { %v1764_v13 = vmul.f32 %v1938_v26, %v1762_v48  ;;  %v1765_v28 = vmul.f32 %v1939_v41, %v1763_v32 }
 0x351   :  { %1766 = vst [vmem:[#allocation2] sm:$0xff] %v1764_v13 }
 0x352   :  { %1767 = vst [vmem:[#allocation2 + $0x8] sm:$0xff] %v1765_v28 }
 0x353   :  { %1778 = dma.vmem_to_hbm [thread:$0]  %s1774_s24, 256, %s1776_s11, [#allocation3]  }
 0x354   :  { %1964 = dma.done.wait [#allocation3], 256  }
 0x355   :  { %1965 = vsyncadd [#allocation3], 4294967040 }
 0x356   :  { %1783 = vsyncpa [#allocation3], 1 }

</bundles_post_ra>
